<compile_context>
chip_gen: v6e
topology: v6e:2x2x1
jax: 0.10.0
libtpu: 0.0.40
codegen_flags: <defaults>
</compile_context>

<pallas_src>
import functools

import jax
import jax.numpy as jnp
from jax import lax
from jax.experimental import pallas as pl
from jax.experimental.pallas import tpu as pltpu

KSIZE = 10          # Conv1d kernel_size in CodeCNN
BN_EPS = 1e-5
MODS = ("med", "proc", "lab", "out")   # chart CodeCNN params are not packed (dead compute)


def _spec(shape):
    nd = len(shape)
    return pl.BlockSpec(shape, lambda i, _nd=nd: (0,) * _nd)


def _round_up(x, m):
    return ((x + m - 1) // m) * m


# ----------------------------- fused Pallas kernel -----------------------------

def fused_forward_kernel(codes_ref, vmask_ref, embed_ref, convw_ref, convb_ref,
                         bng_ref, bnb_ref, conds_ref, condw_ref, demo_ref, demow_ref,
                         fc1code_ref, fc1cond_ref, fc1demo_ref, fc2_ref, fc3_ref,
                         sig_ref, logit_ref, *, B, L, K):
    """Entire CNNBaseH forward in one kernel.

    codes_ref  : (NPAD, M*T) int32  per-(b,l) code rows for all 4 modalities, vocab-offset per
                                    modality block, zero rows map to each block's padding row
    vmask_ref  : (B*L, 1) f32       1/(B*Lo) on valid conv rows, 0 on cross-batch rows
    embed_ref  : (M*Vmax, M*E)      block-diagonal code embedding table
    convw_ref  : (K*M*E, M*R)       block-diagonal im2col conv weight
    convb/bng/bnb : (1, M*R)        conv bias / BN affine, concatenated over modalities
    conds_ref  : (B, S) int32       position-offset cond codes;   condw_ref: (S*Vc, R) fused table
    demo_ref   : (B, 3) int32       offset eth/gender/age codes;  demow_ref: (Vtot, R) fused table
    fc1code/fc1cond/fc1demo : per-slot fc1 row blocks (chart slot folded into the code block)
    fc2/fc3    : pre-transposed head weights
    outputs    : sig (B, 1), logit (B, 1)
    """
    NPAD, MT = codes_ref.shape
    VTOT = embed_ref.shape[0]
    Lo = L - K + 1
    BL = B * L
    f32 = jnp.float32

    # ---- all four CodeCNN embedding-sums as ONE multi-hot-count MXU matmul -------------------
    codes = codes_ref[...]                                                  # (NPAD, M*T)
    iota_v = lax.broadcasted_iota(jnp.int32, (NPAD, VTOT), 1)
    counts = (iota_v == codes[:, 0:1]).astype(f32)
    for j in range(1, MT):
        counts = counts + (iota_v == codes[:, j:j + 1]).astype(f32)
    feat = jnp.dot(counts, embed_ref[...], preferred_element_type=f32)      # (NPAD, M*E)

    # ---- all four Conv1d(k=K, valid) as ONE im2col matmul (block-diagonal weight) ------------
    x_col = jnp.concatenate([feat[k:k + BL, :] for k in range(K)], axis=1)  # (BL, K*M*E)
    conv = (jnp.dot(x_col, convw_ref[...], preferred_element_type=f32)
            + convb_ref[...])                                               # (BL, M*R)

    # ---- BatchNorm1d (training-mode batch stats, biased var) over valid positions only -------
    vmask = vmask_ref[...]                                                  # (BL, 1), pre-scaled
    mean = jnp.sum(conv * vmask, axis=0, keepdims=True)                     # (1, M*R)
    d = conv - mean
    var = jnp.sum(d * d * vmask, axis=0, keepdims=True)
    y = d * (bng_ref[...] * lax.rsqrt(var + BN_EPS)) + bnb_ref[...]         # (BL, M*R)

    # ---- AdaptiveMaxPool1d(1): per-batch max over the Lo valid conv positions ----------------
    code_h = jnp.concatenate(
        [jnp.max(y[b * L:b * L + Lo, :], axis=0, keepdims=True) for b in range(B)],
        axis=0)                                                             # (B, M*R) = [med|proc|lab|out]

    # ---- cond / demo branches: embed -> flatten -> fc folded into one multi-hot matmul each --
    def multihot_matmul(idx, table_ref):
        V = table_ref.shape[0]
        io = lax.broadcasted_iota(jnp.int32, (idx.shape[0], V), 1)
        mh = (io == idx[:, 0:1]).astype(f32)
        for s in range(1, idx.shape[1]):
            mh = mh + (io == idx[:, s:s + 1]).astype(f32)
        return jnp.dot(mh, table_ref[...], preferred_element_type=f32)

    cond_h = multihot_matmul(conds_ref[...], condw_ref)                     # (B, R)
    demo_h = multihot_matmul(demo_ref[...], demow_ref)                      # (B, R)

    # ---- head: fc1 split per concat slot (dead chart slot folded into the code block) --------
    h = (jnp.dot(code_h, fc1code_ref[...], preferred_element_type=f32)
         + jnp.dot(cond_h, fc1cond_ref[...], preferred_element_type=f32)
         + jnp.dot(demo_h, fc1demo_ref[...], preferred_element_type=f32))
    h = jnp.dot(h, fc2_ref[...], preferred_element_type=f32)
    logit = jnp.dot(h, fc3_ref[...], preferred_element_type=f32)
    logit_ref[...] = logit
    sig_ref[...] = jax.nn.sigmoid(logit)


# ----------------------------- wrapper / parameter packing -----------------------------

def prepare_params(params):
    """One-time packing of module parameters into the fused-kernel layout."""
    E = params["med"]["embed"].shape[1]
    R = params["med"]["conv_b"].shape[-1]
    M = len(MODS)
    vmax = max(params[m]["embed"].shape[0] for m in MODS)

    # Block-diagonal embedding table (M*Vmax, M*E): modality m's vocab rows feed only its E cols.
    embed_bd = jnp.zeros((M * vmax, M * E), jnp.float32)
    for i, m in enumerate(MODS):
        tab = params[m]["embed"]
        embed_bd = embed_bd.at[i * vmax:i * vmax + tab.shape[0], i * E:(i + 1) * E].set(tab)

    # Block-diagonal im2col conv weight (K*M*E, M*R): row (k, m, e) -> col block (m, :).
    conv_bd = jnp.zeros((KSIZE, M, E, M, R), jnp.float32)
    for i, m in enumerate(MODS):
        conv_bd = conv_bd.at[:, i, :, i, :].set(params[m]["conv_w"])
    conv_bd = conv_bd.reshape(KSIZE * M * E, M * R)

    convb = jnp.concatenate([params[m]["conv_b"] for m in MODS], axis=1)    # (1, M*R)
    bng = jnp.concatenate([params[m]["bn_g"] for m in MODS], axis=1)
    bnb = jnp.concatenate([params[m]["bn_b"] for m in MODS], axis=1)

    # cond branch fused table: rows [s*Vc:(s+1)*Vc] = cond_embed @ condfc[s*E:(s+1)*E].
    condfc = params["condfc_wT"]
    S = condfc.shape[0] // E
    cond_fused = jnp.concatenate(
        [params["cond_embed"] @ condfc[s * E:(s + 1) * E] for s in range(S)], axis=0)

    # demo branch fused table: [eth; gender; age] embeddings pre-multiplied by their fc slice.
    dfc = params["demo_fc_wT"]
    eth_f = params["eth_embed"] @ dfc[0:E]
    gen_f = params["gender_embed"] @ dfc[E:2 * E]
    age_f = params["age_embed"] @ dfc[2 * E:3 * E]
    demo_fused = jnp.concatenate([eth_f, gen_f, age_f], axis=0)
    demo_offsets = (0, eth_f.shape[0], eth_f.shape[0] + gen_f.shape[0])

    # fc1 split per concat slot; dead "chart" slot (== out features, reference bug) folded in.
    fc1 = params["fc1_wT"]
    fc1_code = jnp.concatenate([fc1[0:R], fc1[R:2 * R], fc1[2 * R:3 * R],
                                fc1[3 * R:4 * R] + fc1[4 * R:5 * R]], axis=0)   # (M*R, H1)

    return dict(embed_bd=embed_bd, conv_bd=conv_bd, convb=convb, bng=bng, bnb=bnb,
                cond_fused=cond_fused, cond_vocab=params["cond_embed"].shape[0],
                demo_fused=demo_fused, demo_offsets=demo_offsets,
                fc1_code=fc1_code, fc1_cond=fc1[5 * R:6 * R], fc1_demo=fc1[6 * R:7 * R],
                fc2=params["fc2_wT"], fc3=params["fc3_wT"], code_vocab_pad=vmax)


def cnn_base_h_forward(pp, meds, procs, outs, charts, labs, conds, demo, contrib=None):
    """Fused CNNBaseH forward: one pallas_call producing (sigmoid(logit), logit).

    The chart CodeCNN is not executed: its output is dead in the reference (the chart slot of
    the concatenation is overwritten with the `outs` features), so only the argument remains.
    """
    del charts, contrib
    B, T, L = meds.shape
    Lo = L - KSIZE + 1
    BL = B * L
    npad = _round_up(BL + KSIZE - 1, 8)
    vmax = pp["code_vocab_pad"]

    def prep_codes(c, off):
        # (B, T, L) -> one row of T codes per (b, l): (B*L, T); pad rows / code 0 stay at the
        # modality's zero padding row after the block offset is added.
        c2 = jnp.transpose(c, (0, 2, 1)).reshape(BL, T)
        c2 = jnp.pad(c2, ((0, npad - BL), (0, 0)))
        return c2.astype(jnp.int32) + off

    codes = jnp.concatenate(
        [prep_codes(x, i * vmax) for i, x in enumerate((meds, procs, labs, outs))],
        axis=1)                                                            # (npad, M*T)

    # Valid conv positions of the flat (B*L) row axis, pre-scaled by 1/(B*Lo) for BN stats.
    vmask = (jnp.tile(jnp.arange(L) < Lo, B).astype(jnp.float32) / float(B * Lo)).reshape(BL, 1)

    # Position / modality offsets pre-added so the kernel builds multi-hots against flat tables.
    S = conds.shape[1]
    conds_off = conds.astype(jnp.int32) + jnp.arange(S, dtype=jnp.int32)[None, :] * pp["cond_vocab"]
    demo_off = (jnp.transpose(demo, (1, 0)).astype(jnp.int32)
                + jnp.asarray(pp["demo_offsets"], jnp.int32)[None, :])     # (B, 3)

    kernel = functools.partial(fused_forward_kernel, B=B, L=L, K=KSIZE)
    operands = (codes, vmask, pp["embed_bd"], pp["conv_bd"], pp["convb"], pp["bng"], pp["bnb"],
                conds_off, pp["cond_fused"], demo_off, pp["demo_fused"],
                pp["fc1_code"], pp["fc1_cond"], pp["fc1_demo"], pp["fc2"], pp["fc3"])
    sig, logit = pl.pallas_call(
        kernel,
        grid=(1,),
        in_specs=[_spec(x.shape) for x in operands],
        out_specs=(_spec((B, 1)), _spec((B, 1))),
        out_shape=(jax.ShapeDtypeStruct((B, 1), jnp.float32),
                   jax.ShapeDtypeStruct((B, 1), jnp.float32)),
        compiler_params=pltpu.CompilerParams(dimension_semantics=("arbitrary",)),
    )(*operands)
    return sig, logit


# ----------------------------- pure-JAX reference (for sanity checking) -----------------------------

def _reference_forward(params, meds, procs, outs, charts, labs, conds, demo):
    del charts

    def codecnn(codes, p):
        emb = jnp.take(p["embed"], codes, axis=0)          # (B, T, L, E)
        feat = jnp.sum(emb, axis=1)                        # (B, L, E)
        K = KSIZE
        Lo = feat.shape[1] - K + 1
        R = p["conv_w"].shape[-1]
        conv = jnp.zeros((feat.shape[0], Lo, R), jnp.float32)
        for k in range(K):
            conv = conv + jnp.einsum("ble,er->blr", feat[:, k:k + Lo, :], p["conv_w"][k])
        conv = conv + p["conv_b"]
        mean = jnp.mean(conv, axis=(0, 1))
        var = jnp.mean((conv - mean) ** 2, axis=(0, 1))
        y = (conv - mean) * (p["bn_g"][0] / jnp.sqrt(var + BN_EPS)) + p["bn_b"][0]
        return jnp.max(y, axis=1)                          # (B, R)

    med_h = codecnn(meds, params["med"])
    proc_h = codecnn(procs, params["proc"])
    lab_h = codecnn(labs, params["lab"])
    out_h = codecnn(outs, params["out"])
    cond_flat = jnp.take(params["cond_embed"], conds, axis=0).reshape(conds.shape[0], -1)
    cond_h = cond_flat @ params["condfc_wT"]
    demog = jnp.concatenate([jnp.take(params["eth_embed"], demo[0], axis=0),
                             jnp.take(params["gender_embed"], demo[1], axis=0),
                             jnp.take(params["age_embed"], demo[2], axis=0)], axis=1)
    demo_h = demog @ params["demo_fc_wT"]
    out1 = jnp.concatenate([med_h, proc_h, lab_h, out_h, out_h, cond_h, demo_h], axis=1)
    logit = ((out1 @ params["fc1_wT"]) @ params["fc2_wT"]) @ params["fc3_wT"]
    return jax.nn.sigmoid(logit), logit


# ----------------------------- deterministic parameter init -----------------------------

def _embed_table(key, vocab, embed):
    t = 0.1 * jax.random.normal(key, (vocab, embed), jnp.float32)
    return t.at[0].set(0.0)     # padding_idx = 0


def _codecnn_params(key, vocab, E, R):
    k1, k2, k3, k4, k5 = jax.random.split(key, 5)
    return dict(
        embed=_embed_table(k1, vocab, E),
        conv_w=0.1 * jax.random.normal(k2, (KSIZE, E, R), jnp.float32),
        conv_b=0.1 * jax.random.normal(k3, (1, R), jnp.float32),
        bn_g=1.0 + 0.1 * jax.random.normal(k4, (1, R), jnp.float32),
        bn_b=0.1 * jax.random.normal(k5, (1, R), jnp.float32),
    )


if __name__ == "__main__":
    B, E, R = 4, 8, 32            # batch (!=2 -> simple CodeCNN path), embed, rnn_size
    T, L = 3, 16                  # per-modality code tensors are (B, T, L); conv needs L >= 10
    COND_S = 6                    # cond_seq_len
    MODALITIES = 5                # med, proc, out, chart, lab

    vocabs = dict(med=40, proc=25, out=20, chart=35, lab=28,
                  cond=30, eth=5, gender=3, age=10)

    key = jax.random.PRNGKey(0)
    keys = jax.random.split(key, 16)
    params = {
        "med": _codecnn_params(keys[0], vocabs["med"], E, R),
        "proc": _codecnn_params(keys[1], vocabs["proc"], E, R),
        "out": _codecnn_params(keys[2], vocabs["out"], E, R),
        "chart": _codecnn_params(keys[3], vocabs["chart"], E, R),   # built (as in the module) but dead
        "lab": _codecnn_params(keys[4], vocabs["lab"], E, R),
        "cond_embed": _embed_table(keys[5], vocabs["cond"], E),
        "condfc_wT": 0.1 * jax.random.normal(keys[6], (E * COND_S, R), jnp.float32),
        "eth_embed": _embed_table(keys[7], vocabs["eth"], E),
        "gender_embed": _embed_table(keys[8], vocabs["gender"], E),
        "age_embed": _embed_table(keys[9], vocabs["age"], E),
        "demo_fc_wT": 0.1 * jax.random.normal(keys[10], (3 * E, R), jnp.float32),
        "fc1_wT": 0.1 * jax.random.normal(keys[11], (R * (MODALITIES + 2), R * (MODALITIES + 2) // 2), jnp.float32),
        "fc2_wT": 0.1 * jax.random.normal(keys[12], (R * (MODALITIES + 2) // 2, R * (MODALITIES + 2) // 4), jnp.float32),
        "fc3_wT": 0.1 * jax.random.normal(keys[13], (R * (MODALITIES + 2) // 4, 1), jnp.float32),
    }

    dk = jax.random.split(keys[14], 9)
    meds = jax.random.randint(dk[0], (B, T, L), 0, vocabs["med"], jnp.int32)
    procs = jax.random.randint(dk[1], (B, T, L), 0, vocabs["proc"], jnp.int32)
    outs = jax.random.randint(dk[2], (B, T, L), 0, vocabs["out"], jnp.int32)
    charts = jax.random.randint(dk[3], (B, T, L), 0, vocabs["chart"], jnp.int32)
    labs = jax.random.randint(dk[4], (B, T, L), 0, vocabs["lab"], jnp.int32)
    conds = jax.random.randint(dk[5], (B, COND_S), 0, vocabs["cond"], jnp.int32)
    demo = jnp.stack([
        jax.random.randint(dk[6], (B,), 0, vocabs["eth"], jnp.int32),
        jax.random.randint(dk[7], (B,), 0, vocabs["gender"], jnp.int32),
        jax.random.randint(dk[8], (B,), 0, vocabs["age"], jnp.int32),
    ], axis=0)                                             # (3, B)

    pp = prepare_params(params)
    fwd = jax.jit(functools.partial(cnn_base_h_forward, pp))
    sig, logit = fwd(meds, procs, outs, charts, labs, conds, demo)
    jax.block_until_ready((sig, logit))

    assert sig.shape == (B, 1) and logit.shape == (B, 1)
    assert bool(jnp.all((sig > 0.0) & (sig < 1.0)))

    # Numerical sanity check against a pure-JAX reference (loose tolerance: XLA's default f32
    # MXU precision may differ slightly from the in-kernel f32 matmuls).
    ref_sig, ref_logit = _reference_forward(params, meds, procs, outs, charts, labs, conds, demo)
    assert bool(jnp.max(jnp.abs(logit - ref_logit)) < 0.15)
    assert bool(jnp.max(jnp.abs(sig - ref_sig)) < 0.05)

    print("KERNEL_OK")
</pallas_src>

<mosaic_0001>
module attributes {stable_mosaic.version = 11 : i64} {
  func.func @fused_forward_kernel(%arg0: i32, %arg1: memref<80x12xi32, #tpu.memory_space<vmem>>, %arg2: memref<64x1xf32, #tpu.memory_space<vmem>>, %arg3: memref<160x32xf32, #tpu.memory_space<vmem>>, %arg4: memref<320x128xf32, #tpu.memory_space<vmem>>, %arg5: memref<1x128xf32, #tpu.memory_space<vmem>>, %arg6: memref<1x128xf32, #tpu.memory_space<vmem>>, %arg7: memref<1x128xf32, #tpu.memory_space<vmem>>, %arg8: memref<4x6xi32, #tpu.memory_space<vmem>>, %arg9: memref<180x32xf32, #tpu.memory_space<vmem>>, %arg10: memref<4x3xi32, #tpu.memory_space<vmem>>, %arg11: memref<18x32xf32, #tpu.memory_space<vmem>>, %arg12: memref<128x112xf32, #tpu.memory_space<vmem>>, %arg13: memref<32x112xf32, #tpu.memory_space<vmem>>, %arg14: memref<32x112xf32, #tpu.memory_space<vmem>>, %arg15: memref<112x56xf32, #tpu.memory_space<vmem>>, %arg16: memref<56x1xf32, #tpu.memory_space<vmem>>, %arg17: memref<4x1xf32, #tpu.memory_space<vmem>>, %arg18: memref<4x1xf32, #tpu.memory_space<vmem>>) attributes {dimension_semantics = [#tpu.dimension_semantics<arbitrary>], iteration_bounds = array<i64: 1>, scalar_prefetch = 0 : i64, scratch_operands = 0 : i64, tpu.core_type = #tpu.core_type<tc>, window_params = [{pipeline_mode = #tpu.pipeline_mode<synchronous>, transform_indices = @transform_0, window_bounds = array<i64: 80, 12>}, {pipeline_mode = #tpu.pipeline_mode<synchronous>, transform_indices = @transform_1, window_bounds = array<i64: 64, 1>}, {pipeline_mode = #tpu.pipeline_mode<synchronous>, transform_indices = @transform_2, window_bounds = array<i64: 160, 32>}, {pipeline_mode = #tpu.pipeline_mode<synchronous>, transform_indices = @transform_3, window_bounds = array<i64: 320, 128>}, {pipeline_mode = #tpu.pipeline_mode<synchronous>, transform_indices = @transform_4, window_bounds = array<i64: 1, 128>}, {pipeline_mode = #tpu.pipeline_mode<synchronous>, transform_indices = @transform_5, window_bounds = array<i64: 1, 128>}, {pipeline_mode = #tpu.pipeline_mode<synchronous>, transform_indices = @transform_6, window_bounds = array<i64: 1, 128>}, {pipeline_mode = #tpu.pipeline_mode<synchronous>, transform_indices = @transform_7, window_bounds = array<i64: 4, 6>}, {pipeline_mode = #tpu.pipeline_mode<synchronous>, transform_indices = @transform_8, window_bounds = array<i64: 180, 32>}, {pipeline_mode = #tpu.pipeline_mode<synchronous>, transform_indices = @transform_9, window_bounds = array<i64: 4, 3>}, {pipeline_mode = #tpu.pipeline_mode<synchronous>, transform_indices = @transform_10, window_bounds = array<i64: 18, 32>}, {pipeline_mode = #tpu.pipeline_mode<synchronous>, transform_indices = @transform_11, window_bounds = array<i64: 128, 112>}, {pipeline_mode = #tpu.pipeline_mode<synchronous>, transform_indices = @transform_12, window_bounds = array<i64: 32, 112>}, {pipeline_mode = #tpu.pipeline_mode<synchronous>, transform_indices = @transform_13, window_bounds = array<i64: 32, 112>}, {pipeline_mode = #tpu.pipeline_mode<synchronous>, transform_indices = @transform_14, window_bounds = array<i64: 112, 56>}, {pipeline_mode = #tpu.pipeline_mode<synchronous>, transform_indices = @transform_15, window_bounds = array<i64: 56, 1>}, {pipeline_mode = #tpu.pipeline_mode<synchronous>, transform_indices = @transform_16, window_bounds = array<i64: 4, 1>}, {pipeline_mode = #tpu.pipeline_mode<synchronous>, transform_indices = @transform_17, window_bounds = array<i64: 4, 1>}]} {
    %c0 = arith.constant 0 : index
    %c0_0 = arith.constant 0 : index
    %0 = vector.load %arg1[%c0, %c0_0] : memref<80x12xi32, #tpu.memory_space<vmem>>, vector<80x12xi32>
    %1 = tpu.iota {dimensions = array<i32: 1>} : vector<80x160xi32>
    %2 = vector.extract_strided_slice %0 {offsets = [0, 0], sizes = [80, 1], strides = [1, 1]} : vector<80x12xi32> to vector<80x1xi32>
    %3 = vector.broadcast %2 : vector<80x1xi32> to vector<80x160xi32>
    %4 = arith.cmpi eq, %1, %3 : vector<80x160xi32>
    %5 = arith.extui %4 : vector<80x160xi1> to vector<80x160xi32>
    %6 = arith.sitofp %5 : vector<80x160xi32> to vector<80x160xf32>
    %7 = vector.extract_strided_slice %0 {offsets = [0, 1], sizes = [80, 1], strides = [1, 1]} : vector<80x12xi32> to vector<80x1xi32>
    %8 = vector.broadcast %7 : vector<80x1xi32> to vector<80x160xi32>
    %9 = arith.cmpi eq, %1, %8 : vector<80x160xi32>
    %10 = arith.extui %9 : vector<80x160xi1> to vector<80x160xi32>
    %11 = arith.sitofp %10 : vector<80x160xi32> to vector<80x160xf32>
    %12 = arith.addf %6, %11 : vector<80x160xf32>
    %13 = vector.extract_strided_slice %0 {offsets = [0, 2], sizes = [80, 1], strides = [1, 1]} : vector<80x12xi32> to vector<80x1xi32>
    %14 = vector.broadcast %13 : vector<80x1xi32> to vector<80x160xi32>
    %15 = arith.cmpi eq, %1, %14 : vector<80x160xi32>
    %16 = arith.extui %15 : vector<80x160xi1> to vector<80x160xi32>
    %17 = arith.sitofp %16 : vector<80x160xi32> to vector<80x160xf32>
    %18 = arith.addf %12, %17 : vector<80x160xf32>
    %19 = vector.extract_strided_slice %0 {offsets = [0, 3], sizes = [80, 1], strides = [1, 1]} : vector<80x12xi32> to vector<80x1xi32>
    %20 = vector.broadcast %19 : vector<80x1xi32> to vector<80x160xi32>
    %21 = arith.cmpi eq, %1, %20 : vector<80x160xi32>
    %22 = arith.extui %21 : vector<80x160xi1> to vector<80x160xi32>
    %23 = arith.sitofp %22 : vector<80x160xi32> to vector<80x160xf32>
    %24 = arith.addf %18, %23 : vector<80x160xf32>
    %25 = vector.extract_strided_slice %0 {offsets = [0, 4], sizes = [80, 1], strides = [1, 1]} : vector<80x12xi32> to vector<80x1xi32>
    %26 = vector.broadcast %25 : vector<80x1xi32> to vector<80x160xi32>
    %27 = arith.cmpi eq, %1, %26 : vector<80x160xi32>
    %28 = arith.extui %27 : vector<80x160xi1> to vector<80x160xi32>
    %29 = arith.sitofp %28 : vector<80x160xi32> to vector<80x160xf32>
    %30 = arith.addf %24, %29 : vector<80x160xf32>
    %31 = vector.extract_strided_slice %0 {offsets = [0, 5], sizes = [80, 1], strides = [1, 1]} : vector<80x12xi32> to vector<80x1xi32>
    %32 = vector.broadcast %31 : vector<80x1xi32> to vector<80x160xi32>
    %33 = arith.cmpi eq, %1, %32 : vector<80x160xi32>
    %34 = arith.extui %33 : vector<80x160xi1> to vector<80x160xi32>
    %35 = arith.sitofp %34 : vector<80x160xi32> to vector<80x160xf32>
    %36 = arith.addf %30, %35 : vector<80x160xf32>
    %37 = vector.extract_strided_slice %0 {offsets = [0, 6], sizes = [80, 1], strides = [1, 1]} : vector<80x12xi32> to vector<80x1xi32>
    %38 = vector.broadcast %37 : vector<80x1xi32> to vector<80x160xi32>
    %39 = arith.cmpi eq, %1, %38 : vector<80x160xi32>
    %40 = arith.extui %39 : vector<80x160xi1> to vector<80x160xi32>
    %41 = arith.sitofp %40 : vector<80x160xi32> to vector<80x160xf32>
    %42 = arith.addf %36, %41 : vector<80x160xf32>
    %43 = vector.extract_strided_slice %0 {offsets = [0, 7], sizes = [80, 1], strides = [1, 1]} : vector<80x12xi32> to vector<80x1xi32>
    %44 = vector.broadcast %43 : vector<80x1xi32> to vector<80x160xi32>
    %45 = arith.cmpi eq, %1, %44 : vector<80x160xi32>
    %46 = arith.extui %45 : vector<80x160xi1> to vector<80x160xi32>
    %47 = arith.sitofp %46 : vector<80x160xi32> to vector<80x160xf32>
    %48 = arith.addf %42, %47 : vector<80x160xf32>
    %49 = vector.extract_strided_slice %0 {offsets = [0, 8], sizes = [80, 1], strides = [1, 1]} : vector<80x12xi32> to vector<80x1xi32>
    %50 = vector.broadcast %49 : vector<80x1xi32> to vector<80x160xi32>
    %51 = arith.cmpi eq, %1, %50 : vector<80x160xi32>
    %52 = arith.extui %51 : vector<80x160xi1> to vector<80x160xi32>
    %53 = arith.sitofp %52 : vector<80x160xi32> to vector<80x160xf32>
    %54 = arith.addf %48, %53 : vector<80x160xf32>
    %55 = vector.extract_strided_slice %0 {offsets = [0, 9], sizes = [80, 1], strides = [1, 1]} : vector<80x12xi32> to vector<80x1xi32>
    %56 = vector.broadcast %55 : vector<80x1xi32> to vector<80x160xi32>
    %57 = arith.cmpi eq, %1, %56 : vector<80x160xi32>
    %58 = arith.extui %57 : vector<80x160xi1> to vector<80x160xi32>
    %59 = arith.sitofp %58 : vector<80x160xi32> to vector<80x160xf32>
    %60 = arith.addf %54, %59 : vector<80x160xf32>
    %61 = vector.extract_strided_slice %0 {offsets = [0, 10], sizes = [80, 1], strides = [1, 1]} : vector<80x12xi32> to vector<80x1xi32>
    %62 = vector.broadcast %61 : vector<80x1xi32> to vector<80x160xi32>
    %63 = arith.cmpi eq, %1, %62 : vector<80x160xi32>
    %64 = arith.extui %63 : vector<80x160xi1> to vector<80x160xi32>
    %65 = arith.sitofp %64 : vector<80x160xi32> to vector<80x160xf32>
    %66 = arith.addf %60, %65 : vector<80x160xf32>
    %67 = vector.extract_strided_slice %0 {offsets = [0, 11], sizes = [80, 1], strides = [1, 1]} : vector<80x12xi32> to vector<80x1xi32>
    %68 = vector.broadcast %67 : vector<80x1xi32> to vector<80x160xi32>
    %69 = arith.cmpi eq, %1, %68 : vector<80x160xi32>
    %70 = arith.extui %69 : vector<80x160xi1> to vector<80x160xi32>
    %71 = arith.sitofp %70 : vector<80x160xi32> to vector<80x160xf32>
    %72 = arith.addf %66, %71 : vector<80x160xf32>
    %c0_1 = arith.constant 0 : index
    %c0_2 = arith.constant 0 : index
    %73 = vector.load %arg3[%c0_1, %c0_2] : memref<160x32xf32, #tpu.memory_space<vmem>>, vector<160x32xf32>
    %cst = arith.constant dense<0.000000e+00> : vector<80x32xf32>
    %74 = tpu.matmul %72, %73, %cst {dimension_numbers = #tpu.dot_dimension_numbers<[1], [0], [0], [1], [0, 0, 1, 1], [], []>} : vector<80x160xf32>, vector<160x32xf32>, vector<80x32xf32> -> vector<80x32xf32>
    %75 = vector.extract_strided_slice %74 {offsets = [0, 0], sizes = [64, 32], strides = [1, 1]} : vector<80x32xf32> to vector<64x32xf32>
    %76 = vector.extract_strided_slice %74 {offsets = [1, 0], sizes = [64, 32], strides = [1, 1]} : vector<80x32xf32> to vector<64x32xf32>
    %77 = vector.extract_strided_slice %74 {offsets = [2, 0], sizes = [64, 32], strides = [1, 1]} : vector<80x32xf32> to vector<64x32xf32>
    %78 = vector.extract_strided_slice %74 {offsets = [3, 0], sizes = [64, 32], strides = [1, 1]} : vector<80x32xf32> to vector<64x32xf32>
    %79 = vector.extract_strided_slice %74 {offsets = [4, 0], sizes = [64, 32], strides = [1, 1]} : vector<80x32xf32> to vector<64x32xf32>
    %80 = vector.extract_strided_slice %74 {offsets = [5, 0], sizes = [64, 32], strides = [1, 1]} : vector<80x32xf32> to vector<64x32xf32>
    %81 = vector.extract_strided_slice %74 {offsets = [6, 0], sizes = [64, 32], strides = [1, 1]} : vector<80x32xf32> to vector<64x32xf32>
    %82 = vector.extract_strided_slice %74 {offsets = [7, 0], sizes = [64, 32], strides = [1, 1]} : vector<80x32xf32> to vector<64x32xf32>
    %83 = vector.extract_strided_slice %74 {offsets = [8, 0], sizes = [64, 32], strides = [1, 1]} : vector<80x32xf32> to vector<64x32xf32>
    %84 = vector.extract_strided_slice %74 {offsets = [9, 0], sizes = [64, 32], strides = [1, 1]} : vector<80x32xf32> to vector<64x32xf32>
    %85 = tpu.concatenate %75, %76, %77, %78, %79, %80, %81, %82, %83, %84 in 1 : vector<64x32xf32>, vector<64x32xf32>, vector<64x32xf32>, vector<64x32xf32>, vector<64x32xf32>, vector<64x32xf32>, vector<64x32xf32>, vector<64x32xf32>, vector<64x32xf32>, vector<64x32xf32> -> vector<64x320xf32>
    %c0_3 = arith.constant 0 : index
    %c0_4 = arith.constant 0 : index
    %86 = vector.load %arg4[%c0_3, %c0_4] : memref<320x128xf32, #tpu.memory_space<vmem>>, vector<320x128xf32>
    %cst_5 = arith.constant dense<0.000000e+00> : vector<64x128xf32>
    %87 = tpu.matmul %85, %86, %cst_5 {dimension_numbers = #tpu.dot_dimension_numbers<[1], [0], [0], [1], [0, 0, 1, 1], [], []>} : vector<64x320xf32>, vector<320x128xf32>, vector<64x128xf32> -> vector<64x128xf32>
    %c0_6 = arith.constant 0 : index
    %c0_7 = arith.constant 0 : index
    %88 = vector.load %arg5[%c0_6, %c0_7] : memref<1x128xf32, #tpu.memory_space<vmem>>, vector<1x128xf32>
    %89 = vector.broadcast %88 : vector<1x128xf32> to vector<64x128xf32>
    %90 = arith.addf %87, %89 : vector<64x128xf32>
    %c0_8 = arith.constant 0 : index
    %c0_9 = arith.constant 0 : index
    %91 = vector.load %arg2[%c0_8, %c0_9] : memref<64x1xf32, #tpu.memory_space<vmem>>, vector<64x1xf32>
    %92 = vector.broadcast %91 : vector<64x1xf32> to vector<64x128xf32>
    %93 = arith.mulf %90, %92 : vector<64x128xf32>
    %cst_10 = arith.constant dense<0.000000e+00> : vector<128xf32>
    %94 = vector.multi_reduction <add>, %93, %cst_10 [0] : vector<64x128xf32> to vector<128xf32>
    %95 = vector.shape_cast %94 : vector<128xf32> to vector<1x128xf32>
    %96 = vector.broadcast %95 : vector<1x128xf32> to vector<64x128xf32>
    %97 = arith.subf %90, %96 : vector<64x128xf32>
    %98 = arith.mulf %97, %97 : vector<64x128xf32>
    %99 = vector.broadcast %91 : vector<64x1xf32> to vector<64x128xf32>
    %100 = arith.mulf %98, %99 : vector<64x128xf32>
    %cst_11 = arith.constant dense<0.000000e+00> : vector<128xf32>
    %101 = vector.multi_reduction <add>, %100, %cst_11 [0] : vector<64x128xf32> to vector<128xf32>
    %102 = vector.shape_cast %101 : vector<128xf32> to vector<1x128xf32>
    %c0_12 = arith.constant 0 : index
    %c0_13 = arith.constant 0 : index
    %103 = vector.load %arg6[%c0_12, %c0_13] : memref<1x128xf32, #tpu.memory_space<vmem>>, vector<1x128xf32>
    %cst_14 = arith.constant 9.99999974E-6 : f32
    %104 = vector.broadcast %cst_14 : f32 to vector<1x128xf32>
    %105 = arith.addf %102, %104 : vector<1x128xf32>
    %106 = math.rsqrt %105 : vector<1x128xf32>
    %107 = arith.mulf %103, %106 : vector<1x128xf32>
    %108 = vector.broadcast %107 : vector<1x128xf32> to vector<64x128xf32>
    %109 = arith.mulf %97, %108 : vector<64x128xf32>
    %c0_15 = arith.constant 0 : index
    %c0_16 = arith.constant 0 : index
    %110 = vector.load %arg7[%c0_15, %c0_16] : memref<1x128xf32, #tpu.memory_space<vmem>>, vector<1x128xf32>
    %111 = vector.broadcast %110 : vector<1x128xf32> to vector<64x128xf32>
    %112 = arith.addf %109, %111 : vector<64x128xf32>
    %113 = vector.extract_strided_slice %112 {offsets = [0, 0], sizes = [7, 128], strides = [1, 1]} : vector<64x128xf32> to vector<7x128xf32>
    %cst_17 = arith.constant dense<0xFF800000> : vector<128xf32>
    %114 = vector.multi_reduction <maximumf>, %113, %cst_17 [0] : vector<7x128xf32> to vector<128xf32>
    %115 = vector.shape_cast %114 : vector<128xf32> to vector<1x128xf32>
    %116 = vector.extract_strided_slice %112 {offsets = [16, 0], sizes = [7, 128], strides = [1, 1]} : vector<64x128xf32> to vector<7x128xf32>
    %cst_18 = arith.constant dense<0xFF800000> : vector<128xf32>
    %117 = vector.multi_reduction <maximumf>, %116, %cst_18 [0] : vector<7x128xf32> to vector<128xf32>
    %118 = vector.shape_cast %117 : vector<128xf32> to vector<1x128xf32>
    %119 = vector.extract_strided_slice %112 {offsets = [32, 0], sizes = [7, 128], strides = [1, 1]} : vector<64x128xf32> to vector<7x128xf32>
    %cst_19 = arith.constant dense<0xFF800000> : vector<128xf32>
    %120 = vector.multi_reduction <maximumf>, %119, %cst_19 [0] : vector<7x128xf32> to vector<128xf32>
    %121 = vector.shape_cast %120 : vector<128xf32> to vector<1x128xf32>
    %122 = vector.extract_strided_slice %112 {offsets = [48, 0], sizes = [7, 128], strides = [1, 1]} : vector<64x128xf32> to vector<7x128xf32>
    %cst_20 = arith.constant dense<0xFF800000> : vector<128xf32>
    %123 = vector.multi_reduction <maximumf>, %122, %cst_20 [0] : vector<7x128xf32> to vector<128xf32>
    %124 = vector.shape_cast %123 : vector<128xf32> to vector<1x128xf32>
    %125 = tpu.concatenate %115, %118, %121, %124 in 0 : vector<1x128xf32>, vector<1x128xf32>, vector<1x128xf32>, vector<1x128xf32> -> vector<4x128xf32>
    %c0_21 = arith.constant 0 : index
    %c0_22 = arith.constant 0 : index
    %126 = vector.load %arg8[%c0_21, %c0_22] : memref<4x6xi32, #tpu.memory_space<vmem>>, vector<4x6xi32>
    %127 = tpu.iota {dimensions = array<i32: 1>} : vector<4x180xi32>
    %128 = vector.extract_strided_slice %126 {offsets = [0, 0], sizes = [4, 1], strides = [1, 1]} : vector<4x6xi32> to vector<4x1xi32>
    %129 = vector.broadcast %128 : vector<4x1xi32> to vector<4x180xi32>
    %130 = arith.cmpi eq, %127, %129 : vector<4x180xi32>
    %131 = arith.extui %130 : vector<4x180xi1> to vector<4x180xi32>
    %132 = arith.sitofp %131 : vector<4x180xi32> to vector<4x180xf32>
    %133 = vector.extract_strided_slice %126 {offsets = [0, 1], sizes = [4, 1], strides = [1, 1]} : vector<4x6xi32> to vector<4x1xi32>
    %134 = vector.broadcast %133 : vector<4x1xi32> to vector<4x180xi32>
    %135 = arith.cmpi eq, %127, %134 : vector<4x180xi32>
    %136 = arith.extui %135 : vector<4x180xi1> to vector<4x180xi32>
    %137 = arith.sitofp %136 : vector<4x180xi32> to vector<4x180xf32>
    %138 = arith.addf %132, %137 : vector<4x180xf32>
    %139 = vector.extract_strided_slice %126 {offsets = [0, 2], sizes = [4, 1], strides = [1, 1]} : vector<4x6xi32> to vector<4x1xi32>
    %140 = vector.broadcast %139 : vector<4x1xi32> to vector<4x180xi32>
    %141 = arith.cmpi eq, %127, %140 : vector<4x180xi32>
    %142 = arith.extui %141 : vector<4x180xi1> to vector<4x180xi32>
    %143 = arith.sitofp %142 : vector<4x180xi32> to vector<4x180xf32>
    %144 = arith.addf %138, %143 : vector<4x180xf32>
    %145 = vector.extract_strided_slice %126 {offsets = [0, 3], sizes = [4, 1], strides = [1, 1]} : vector<4x6xi32> to vector<4x1xi32>
    %146 = vector.broadcast %145 : vector<4x1xi32> to vector<4x180xi32>
    %147 = arith.cmpi eq, %127, %146 : vector<4x180xi32>
    %148 = arith.extui %147 : vector<4x180xi1> to vector<4x180xi32>
    %149 = arith.sitofp %148 : vector<4x180xi32> to vector<4x180xf32>
    %150 = arith.addf %144, %149 : vector<4x180xf32>
    %151 = vector.extract_strided_slice %126 {offsets = [0, 4], sizes = [4, 1], strides = [1, 1]} : vector<4x6xi32> to vector<4x1xi32>
    %152 = vector.broadcast %151 : vector<4x1xi32> to vector<4x180xi32>
    %153 = arith.cmpi eq, %127, %152 : vector<4x180xi32>
    %154 = arith.extui %153 : vector<4x180xi1> to vector<4x180xi32>
    %155 = arith.sitofp %154 : vector<4x180xi32> to vector<4x180xf32>
    %156 = arith.addf %150, %155 : vector<4x180xf32>
    %157 = vector.extract_strided_slice %126 {offsets = [0, 5], sizes = [4, 1], strides = [1, 1]} : vector<4x6xi32> to vector<4x1xi32>
    %158 = vector.broadcast %157 : vector<4x1xi32> to vector<4x180xi32>
    %159 = arith.cmpi eq, %127, %158 : vector<4x180xi32>
    %160 = arith.extui %159 : vector<4x180xi1> to vector<4x180xi32>
    %161 = arith.sitofp %160 : vector<4x180xi32> to vector<4x180xf32>
    %162 = arith.addf %156, %161 : vector<4x180xf32>
    %c0_23 = arith.constant 0 : index
    %c0_24 = arith.constant 0 : index
    %163 = vector.load %arg9[%c0_23, %c0_24] : memref<180x32xf32, #tpu.memory_space<vmem>>, vector<180x32xf32>
    %cst_25 = arith.constant dense<0.000000e+00> : vector<4x32xf32>
    %164 = tpu.matmul %162, %163, %cst_25 {dimension_numbers = #tpu.dot_dimension_numbers<[1], [0], [0], [1], [0, 0, 1, 1], [], []>} : vector<4x180xf32>, vector<180x32xf32>, vector<4x32xf32> -> vector<4x32xf32>
    %c0_26 = arith.constant 0 : index
    %c0_27 = arith.constant 0 : index
    %165 = vector.load %arg10[%c0_26, %c0_27] : memref<4x3xi32, #tpu.memory_space<vmem>>, vector<4x3xi32>
    %166 = tpu.iota {dimensions = array<i32: 1>} : vector<4x18xi32>
    %167 = vector.extract_strided_slice %165 {offsets = [0, 0], sizes = [4, 1], strides = [1, 1]} : vector<4x3xi32> to vector<4x1xi32>
    %168 = vector.broadcast %167 : vector<4x1xi32> to vector<4x18xi32>
    %169 = arith.cmpi eq, %166, %168 : vector<4x18xi32>
    %170 = arith.extui %169 : vector<4x18xi1> to vector<4x18xi32>
    %171 = arith.sitofp %170 : vector<4x18xi32> to vector<4x18xf32>
    %172 = vector.extract_strided_slice %165 {offsets = [0, 1], sizes = [4, 1], strides = [1, 1]} : vector<4x3xi32> to vector<4x1xi32>
    %173 = vector.broadcast %172 : vector<4x1xi32> to vector<4x18xi32>
    %174 = arith.cmpi eq, %166, %173 : vector<4x18xi32>
    %175 = arith.extui %174 : vector<4x18xi1> to vector<4x18xi32>
    %176 = arith.sitofp %175 : vector<4x18xi32> to vector<4x18xf32>
    %177 = arith.addf %171, %176 : vector<4x18xf32>
    %178 = vector.extract_strided_slice %165 {offsets = [0, 2], sizes = [4, 1], strides = [1, 1]} : vector<4x3xi32> to vector<4x1xi32>
    %179 = vector.broadcast %178 : vector<4x1xi32> to vector<4x18xi32>
    %180 = arith.cmpi eq, %166, %179 : vector<4x18xi32>
    %181 = arith.extui %180 : vector<4x18xi1> to vector<4x18xi32>
    %182 = arith.sitofp %181 : vector<4x18xi32> to vector<4x18xf32>
    %183 = arith.addf %177, %182 : vector<4x18xf32>
    %c0_28 = arith.constant 0 : index
    %c0_29 = arith.constant 0 : index
    %184 = vector.load %arg11[%c0_28, %c0_29] : memref<18x32xf32, #tpu.memory_space<vmem>>, vector<18x32xf32>
    %cst_30 = arith.constant dense<0.000000e+00> : vector<4x32xf32>
    %185 = tpu.matmul %183, %184, %cst_30 {dimension_numbers = #tpu.dot_dimension_numbers<[1], [0], [0], [1], [0, 0, 1, 1], [], []>} : vector<4x18xf32>, vector<18x32xf32>, vector<4x32xf32> -> vector<4x32xf32>
    %c0_31 = arith.constant 0 : index
    %c0_32 = arith.constant 0 : index
    %186 = vector.load %arg12[%c0_31, %c0_32] : memref<128x112xf32, #tpu.memory_space<vmem>>, vector<128x112xf32>
    %cst_33 = arith.constant dense<0.000000e+00> : vector<4x112xf32>
    %187 = tpu.matmul %125, %186, %cst_33 {dimension_numbers = #tpu.dot_dimension_numbers<[1], [0], [0], [1], [0, 0, 1, 1], [], []>} : vector<4x128xf32>, vector<128x112xf32>, vector<4x112xf32> -> vector<4x112xf32>
    %c0_34 = arith.constant 0 : index
    %c0_35 = arith.constant 0 : index
    %188 = vector.load %arg13[%c0_34, %c0_35] : memref<32x112xf32, #tpu.memory_space<vmem>>, vector<32x112xf32>
    %cst_36 = arith.constant dense<0.000000e+00> : vector<4x112xf32>
    %189 = tpu.matmul %164, %188, %cst_36 {dimension_numbers = #tpu.dot_dimension_numbers<[1], [0], [0], [1], [0, 0, 1, 1], [], []>} : vector<4x32xf32>, vector<32x112xf32>, vector<4x112xf32> -> vector<4x112xf32>
    %190 = arith.addf %187, %189 : vector<4x112xf32>
    %c0_37 = arith.constant 0 : index
    %c0_38 = arith.constant 0 : index
    %191 = vector.load %arg14[%c0_37, %c0_38] : memref<32x112xf32, #tpu.memory_space<vmem>>, vector<32x112xf32>
    %cst_39 = arith.constant dense<0.000000e+00> : vector<4x112xf32>
    %192 = tpu.matmul %185, %191, %cst_39 {dimension_numbers = #tpu.dot_dimension_numbers<[1], [0], [0], [1], [0, 0, 1, 1], [], []>} : vector<4x32xf32>, vector<32x112xf32>, vector<4x112xf32> -> vector<4x112xf32>
    %193 = arith.addf %190, %192 : vector<4x112xf32>
    %c0_40 = arith.constant 0 : index
    %c0_41 = arith.constant 0 : index
    %194 = vector.load %arg15[%c0_40, %c0_41] : memref<112x56xf32, #tpu.memory_space<vmem>>, vector<112x56xf32>
    %cst_42 = arith.constant dense<0.000000e+00> : vector<4x56xf32>
    %195 = tpu.matmul %193, %194, %cst_42 {dimension_numbers = #tpu.dot_dimension_numbers<[1], [0], [0], [1], [0, 0, 1, 1], [], []>} : vector<4x112xf32>, vector<112x56xf32>, vector<4x56xf32> -> vector<4x56xf32>
    %c0_43 = arith.constant 0 : index
    %c0_44 = arith.constant 0 : index
    %196 = vector.load %arg16[%c0_43, %c0_44] : memref<56x1xf32, #tpu.memory_space<vmem>>, vector<56x1xf32>
    %cst_45 = arith.constant dense<0.000000e+00> : vector<4x1xf32>
    %197 = tpu.matmul %195, %196, %cst_45 {dimension_numbers = #tpu.dot_dimension_numbers<[1], [0], [0], [1], [0, 0, 1, 1], [], []>} : vector<4x56xf32>, vector<56x1xf32>, vector<4x1xf32> -> vector<4x1xf32>
    %c0_46 = arith.constant 0 : index
    %c0_47 = arith.constant 0 : index
    %198 = vector.load %arg18[%c0_46, %c0_47] : memref<4x1xf32, #tpu.memory_space<vmem>>, vector<4x1xf32>
    tpu.vector_store %arg18[%c0_46, %c0_47], %197 {strides = array<i32>} : memref<4x1xf32, #tpu.memory_space<vmem>>, vector<4x1xf32>,
    %199 = arith.negf %197 : vector<4x1xf32>
    %200 = math.exp %199 : vector<4x1xf32>
    %cst_48 = arith.constant 1.000000e+00 : f32
    %201 = vector.broadcast %cst_48 : f32 to vector<4x1xf32>
    %202 = arith.addf %201, %200 : vector<4x1xf32>
    %203 = arith.divf %201, %202 : vector<4x1xf32>
    %c0_49 = arith.constant 0 : index
    %c0_50 = arith.constant 0 : index
    %204 = vector.load %arg17[%c0_49, %c0_50] : memref<4x1xf32, #tpu.memory_space<vmem>>, vector<4x1xf32>
    tpu.vector_store %arg17[%c0_49, %c0_50], %203 {strides = array<i32>} : memref<4x1xf32, #tpu.memory_space<vmem>>, vector<4x1xf32>,
    return
  }
  func.func @transform_0(%arg0: i32) -> (i32, i32) {
    %c0_i32 = arith.constant 0 : i32
    %c0_i32_0 = arith.constant 0 : i32
    %c0_i32_1 = arith.constant 0 : i32
    return %c0_i32, %c0_i32_0 : i32, i32
  }
  func.func @transform_1(%arg0: i32) -> (i32, i32) {
    %c0_i32 = arith.constant 0 : i32
    %c0_i32_0 = arith.constant 0 : i32
    %c0_i32_1 = arith.constant 0 : i32
    return %c0_i32, %c0_i32_0 : i32, i32
  }
  func.func @transform_2(%arg0: i32) -> (i32, i32) {
    %c0_i32 = arith.constant 0 : i32
    %c0_i32_0 = arith.constant 0 : i32
    %c0_i32_1 = arith.constant 0 : i32
    return %c0_i32, %c0_i32_0 : i32, i32
  }
  func.func @transform_3(%arg0: i32) -> (i32, i32) {
    %c0_i32 = arith.constant 0 : i32
    %c0_i32_0 = arith.constant 0 : i32
    %c0_i32_1 = arith.constant 0 : i32
    return %c0_i32, %c0_i32_0 : i32, i32
  }
  func.func @transform_4(%arg0: i32) -> (i32, i32) {
    %c0_i32 = arith.constant 0 : i32
    %c0_i32_0 = arith.constant 0 : i32
    %c0_i32_1 = arith.constant 0 : i32
    return %c0_i32, %c0_i32_0 : i32, i32
  }
  func.func @transform_5(%arg0: i32) -> (i32, i32) {
    %c0_i32 = arith.constant 0 : i32
    %c0_i32_0 = arith.constant 0 : i32
    %c0_i32_1 = arith.constant 0 : i32
    return %c0_i32, %c0_i32_0 : i32, i32
  }
  func.func @transform_6(%arg0: i32) -> (i32, i32) {
    %c0_i32 = arith.constant 0 : i32
    %c0_i32_0 = arith.constant 0 : i32
    %c0_i32_1 = arith.constant 0 : i32
    return %c0_i32, %c0_i32_0 : i32, i32
  }
  func.func @transform_7(%arg0: i32) -> (i32, i32) {
    %c0_i32 = arith.constant 0 : i32
    %c0_i32_0 = arith.constant 0 : i32
    %c0_i32_1 = arith.constant 0 : i32
    return %c0_i32, %c0_i32_0 : i32, i32
  }
  func.func @transform_8(%arg0: i32) -> (i32, i32) {
    %c0_i32 = arith.constant 0 : i32
    %c0_i32_0 = arith.constant 0 : i32
    %c0_i32_1 = arith.constant 0 : i32
    return %c0_i32, %c0_i32_0 : i32, i32
  }
  func.func @transform_9(%arg0: i32) -> (i32, i32) {
    %c0_i32 = arith.constant 0 : i32
    %c0_i32_0 = arith.constant 0 : i32
    %c0_i32_1 = arith.constant 0 : i32
    return %c0_i32, %c0_i32_0 : i32, i32
  }
  func.func @transform_10(%arg0: i32) -> (i32, i32) {
    %c0_i32 = arith.constant 0 : i32
    %c0_i32_0 = arith.constant 0 : i32
    %c0_i32_1 = arith.constant 0 : i32
    return %c0_i32, %c0_i32_0 : i32, i32
  }
  func.func @transform_11(%arg0: i32) -> (i32, i32) {
    %c0_i32 = arith.constant 0 : i32
    %c0_i32_0 = arith.constant 0 : i32
    %c0_i32_1 = arith.constant 0 : i32
    return %c0_i32, %c0_i32_0 : i32, i32
  }
  func.func @transform_12(%arg0: i32) -> (i32, i32) {
    %c0_i32 = arith.constant 0 : i32
    %c0_i32_0 = arith.constant 0 : i32
    %c0_i32_1 = arith.constant 0 : i32
    return %c0_i32, %c0_i32_0 : i32, i32
  }
  func.func @transform_13(%arg0: i32) -> (i32, i32) {
    %c0_i32 = arith.constant 0 : i32
    %c0_i32_0 = arith.constant 0 : i32
    %c0_i32_1 = arith.constant 0 : i32
    return %c0_i32, %c0_i32_0 : i32, i32
  }
  func.func @transform_14(%arg0: i32) -> (i32, i32) {
    %c0_i32 = arith.constant 0 : i32
    %c0_i32_0 = arith.constant 0 : i32
    %c0_i32_1 = arith.constant 0 : i32
    return %c0_i32, %c0_i32_0 : i32, i32
  }
  func.func @transform_15(%arg0: i32) -> (i32, i32) {
    %c0_i32 = arith.constant 0 : i32
    %c0_i32_0 = arith.constant 0 : i32
    %c0_i32_1 = arith.constant 0 : i32
    return %c0_i32, %c0_i32_0 : i32, i32
  }
  func.func @transform_16(%arg0: i32) -> (i32, i32) {
    %c0_i32 = arith.constant 0 : i32
    %c0_i32_0 = arith.constant 0 : i32
    %c0_i32_1 = arith.constant 0 : i32
    return %c0_i32, %c0_i32_0 : i32, i32
  }
  func.func @transform_17(%arg0: i32) -> (i32, i32) {
    %c0_i32 = arith.constant 0 : i32
    %c0_i32_0 = arith.constant 0 : i32
    %c0_i32_1 = arith.constant 0 : i32
    return %c0_i32, %c0_i32_0 : i32, i32
  }
}

</mosaic_0001>

<bundles_post_ra>
// kernel: cnn_base_h_forward.1
= control target key start
LH: loop header
LB: loop body
LE: loop exit
PB: predicated region body
PF: predicated region fallthrough
CT: control target
= control target key end

     0   :  { %s6187_s0 = inlined_call_operand.vmem [shape: s32[80,12], index: 0, kind: input, shape index: {}]   ;;  %s6188_s1 = inlined_call_operand.vmem [shape: f32[64,1], index: 1, kind: input, shape index: {}]   ;;  %s6189_s2 = inlined_call_operand.hbm [shape: f32[160,32], index: 2, kind: input, shape index: {}]   ;;  %s6190_s3 = inlined_call_operand.vmem [shape: f32[320,128], index: 3, kind: input, shape index: {}]   ;;  %s6191_s4 = inlined_call_operand.vmem [shape: f32[1,128], index: 4, kind: input, shape index: {}]   ;;  %s6192_s5 = inlined_call_operand.vmem [shape: f32[1,128], index: 5, kind: input, shape index: {}]   ;;  %s6193_s6 = inlined_call_operand.hbm [shape: f32[1,128], index: 6, kind: input, shape index: {}]   ;;  %s6194_s7 = inlined_call_operand.vmem [shape: s32[4,6], index: 7, kind: input, shape index: {}]   ;;  %s6195_s8 = inlined_call_operand.hbm [shape: f32[180,32], index: 8, kind: input, shape index: {}]   ;;  %s6196_s9 = inlined_call_operand.vmem [shape: s32[4,3], index: 9, kind: input, shape index: {}]   ;;  %s6197_s10 = inlined_call_operand.hbm [shape: f32[18,32], index: 10, kind: input, shape index: {}]   ;;  %s6198_s11 = inlined_call_operand.hbm [shape: f32[128,112], index: 11, kind: input, shape index: {}]   ;;  %s6199_s12 = inlined_call_operand.vmem [shape: f32[32,112], index: 12, kind: input, shape index: {}]   ;;  %s6200_s13 = inlined_call_operand.hbm [shape: f32[32,112], index: 13, kind: input, shape index: {}]   ;;  %s6201_s14 = inlined_call_operand.hbm [shape: f32[112,56], index: 14, kind: input, shape index: {}]   ;;  %s6202_s15 = inlined_call_operand.hbm [shape: f32[56,1], index: 15, kind: input, shape index: {}]   ;;  %s6203_s16 = inlined_call_operand.vmem [shape: f32[4,1], index: 16, kind: output, shape index: {0}]   ;;  %s6204_s17 = inlined_call_operand.vmem [shape: f32[4,1], index: 17, kind: output, shape index: {1}]  }
   0x1   :  { %6232 = sst [smem:[#allocation20_spill]] %s6187_s0 }
   0x2   :  { %6233 = sst [smem:[#allocation21_spill]] %s6188_s1 }
   0x3   :  { %23 = vsyncpa [#allocation3], 0 }
   0x4   :  { %24 = vsyncpa [#allocation5], 0 }
   0x5   :  { %25 = vsyncpa [#allocation8], 0 }
   0x6   :  { %26 = vsyncpa [#allocation11], 0 }
   0x7   :  { %27 = vsyncpa [#allocation14], 0  ;;  %s4092_s24 = smov [#allocation4]  }
   0x8   :  { %s56_s25 = sshll.u32 %s4092_s24, 4  ;;  %s57_s25 = int_to_ptr.vmem [resolvable:$true] %s56_s25 }
   0x9   :  { %s3930_s26 = scalar_lea.vmem %s57_s25, 16  ;;  %s3934_s27 = scalar_lea.vmem %s57_s25, 32 }
   0xa   :  { %p3931_p0 = scmp.ne.s32.totalorder %s57_s25, %s3930_s26  ;;  %p3935_p1 = scmp.lt.s32.totalorder %s57_s25, %s57_s25 }
   0xb   :  { %p3936_p2 = scmp.lt.s32.totalorder %s3934_s27, %s3930_s26 }
   0xd   :  { %p3937_p3 = por %p3936_p2, %p3935_p1 }
   0xf   :  { %p3938_p4 = pnand %p3937_p3, %p3931_p0 }
  0x11   :  { %3941 = shalt.err (!%p3938_p4)
}
  0x12   :  { %59 = dma.hbm_to_vmem [thread:$0]  %s6193_s6, 16, %s57_s25, [#allocation5]  }
  0x13   :  { %s4093_s0 = smov [#allocation7]   ;;  %s4094_s18 = smov [#allocation10]  }
  0x14   :  { %s81_s30 = sshll.u32 %s4093_s0, 4  ;;  %s107_s19 = sshll.u32 %s4094_s18, 4  ;;  %s82_s30 = int_to_ptr.vmem [resolvable:$true] %s81_s30  ;;  %s108_s19 = int_to_ptr.vmem [resolvable:$true] %s107_s19 }
  0x15   :  { %s3950_s1 = scalar_lea.vmem %s82_s30, 384  ;;  %p3955_p6 = scmp.lt.s32.totalorder %s82_s30, %s82_s30 }
  0x16   :  { %p3951_p5 = scmp.ne.s32.totalorder %s82_s30, %s3950_s1  ;;  %p3956_p7 = scmp.lt.s32.totalorder %s3950_s1, %s3950_s1 }
  0x18   :  { %p3957_p8 = por %p3956_p7, %p3955_p6 }
  0x1a   :  { %p3958_p9 = pnand %p3957_p8, %p3951_p5 }
  0x1c   :  { %3961 = shalt.err (!%p3958_p9)
}
  0x1d   :  { %s4095_s20 = smov 128   ;;  %s4096_s21 = smov 8  }
  0x1e   :  { %87 = dma.hbm_to_vmem [thread:$0]  %s6197_s10, 384, %s82_s30, [#allocation8], %s4095_s20, %s4095_s20, %s4096_s21  }
  0x1f   :  { %s3970_s6 = scalar_lea.vmem %s108_s19, 512  ;;  %p3975_p11 = scmp.lt.s32.totalorder %s108_s19, %s108_s19 }
  0x20   :  { %p3971_p10 = scmp.ne.s32.totalorder %s108_s19, %s3970_s6  ;;  %p3976_p12 = scmp.lt.s32.totalorder %s3970_s6, %s3970_s6 }
  0x22   :  { %p3977_p13 = por %p3976_p12, %p3975_p11 }
  0x24   :  { %p3978_p0 = pnand %p3977_p13, %p3971_p10 }
  0x26   :  { %3981 = shalt.err (!%p3978_p0)
}
  0x27   :  { %113 = dma.hbm_to_vmem [thread:$0]  %s6200_s13, 512, %s108_s19, [#allocation11], %s4095_s20, %s4095_s20, %s4096_s21  }
  0x28   :  { %s4097_s26 = smov [#allocation2]   ;;  %s4098_s28 = smov [#allocation6]  }
  0x29   :  { %s37_s27 = sshll.u32 %s4097_s26, 4  ;;  %s67_s10 = sshll.u32 %s4098_s28, 4  ;;  %s38_s27 = int_to_ptr.vmem [resolvable:$true] %s37_s27  ;;  %s68_s10 = int_to_ptr.vmem [resolvable:$true] %s67_s10 }
  0x2a   :  { %s3990_s29 = scalar_lea.vmem %s38_s27, 2560  ;;  %p3995_p2 = scmp.lt.s32.totalorder %s38_s27, %s38_s27 }
  0x2b   :  { %p3991_p1 = scmp.ne.s32.totalorder %s38_s27, %s3990_s29  ;;  %p3996_p3 = scmp.lt.s32.totalorder %s3990_s29, %s3990_s29 }
  0x2d   :  { %p3997_p4 = por %p3996_p3, %p3995_p2 }
  0x2f   :  { %p3998_p5 = pnand %p3997_p4, %p3991_p1 }
  0x31   :  { %4001 = shalt.err (!%p3998_p5)
}
  0x32   :  { %43 = dma.hbm_to_vmem [thread:$0]  %s6189_s2, 2560, %s38_s27, [#allocation3], %s4095_s20, %s4095_s20, %s4096_s21  }
  0x33   :  { %s4010_s13 = scalar_lea.vmem %s68_s10, 2944  ;;  %p4015_p7 = scmp.lt.s32.totalorder %s68_s10, %s68_s10 }
  0x34   :  { %p4011_p6 = scmp.ne.s32.totalorder %s68_s10, %s4010_s13  ;;  %p4016_p8 = scmp.lt.s32.totalorder %s4010_s13, %s4010_s13 }
  0x36   :  { %p4017_p9 = por %p4016_p8, %p4015_p7 }
  0x38   :  { %p4018_p10 = pnand %p4017_p9, %p4011_p6 }
  0x3a   :  { %4021 = shalt.err (!%p4018_p10)
}
  0x3b   :  { %73 = dma.hbm_to_vmem [thread:$0]  %s6195_s8, 2944, %s68_s10, [#allocation5], %s4095_s20, %s4095_s20, %s4096_s21  }
  0x3c   :  { %s4099_s1 = smov [#allocation9]   ;;  %s4100_s23 = smov [#allocation12]  }
  0x3d   :  { %s93_s22 = sshll.u32 %s4099_s1, 4  ;;  %s119_s2 = sshll.u32 %s4100_s23, 4  ;;  %s94_s22 = int_to_ptr.vmem [resolvable:$true] %s93_s22  ;;  %s120_s2 = int_to_ptr.vmem [resolvable:$true] %s119_s2 }
  0x3e   :  { %s4030_s6 = scalar_lea.vmem %s94_s22, 2048  ;;  %p4035_p12 = scmp.lt.s32.totalorder %s94_s22, %s94_s22 }
  0x3f   :  { %p4031_p11 = scmp.ne.s32.totalorder %s94_s22, %s4030_s6  ;;  %p4036_p13 = scmp.lt.s32.totalorder %s4030_s6, %s4030_s6 }
  0x41   :  { %p4037_p0 = por %p4036_p13, %p4035_p12 }
  0x43   :  { %p4038_p1 = pnand %p4037_p0, %p4031_p11 }
  0x45   :  { %4041 = shalt.err (!%p4038_p1)
}
  0x46   :  { %99 = dma.hbm_to_vmem [thread:$0]  %s6198_s11, 2048, %s94_s22, [#allocation8], %s4095_s20, %s4095_s20, %s4096_s21  }
  0x47   :  { %s4050_s8 = scalar_lea.vmem %s120_s2, 1792  ;;  %p4055_p3 = scmp.lt.s32.totalorder %s120_s2, %s120_s2 }
  0x48   :  { %p4051_p2 = scmp.ne.s32.totalorder %s120_s2, %s4050_s8  ;;  %p4056_p4 = scmp.lt.s32.totalorder %s4050_s8, %s4050_s8 }
  0x4a   :  { %p4057_p5 = por %p4056_p4, %p4055_p3 }
  0x4c   :  { %p4058_p6 = pnand %p4057_p5, %p4051_p2 }
  0x4e   :  { %4061 = shalt.err (!%p4058_p6)
}
  0x4f   :  { %125 = dma.hbm_to_vmem [thread:$0]  %s6201_s14, 1792, %s120_s2, [#allocation11], %s4095_s20, %s4095_s20, %s4096_s21  }
  0x50   :  { %s4101_s28 = smov [#allocation13]  }
  0x51   :  { %s131_s10 = sshll.u32 %s4101_s28, 4  ;;  %s132_s10 = int_to_ptr.vmem [resolvable:$true] %s131_s10 }
  0x52   :  { %s4070_s29 = scalar_lea.vmem %s132_s10, 896  ;;  %p4075_p8 = scmp.lt.s32.totalorder %s132_s10, %s132_s10 }
  0x53   :  { %p4071_p7 = scmp.ne.s32.totalorder %s132_s10, %s4070_s29  ;;  %p4076_p9 = scmp.lt.s32.totalorder %s4070_s29, %s4070_s29 }
  0x55   :  { %p4077_p10 = por %p4076_p9, %p4075_p8 }
  0x57   :  { %p4078_p11 = pnand %p4077_p10, %p4071_p7 }
  0x59   :  { %4081 = shalt.err (!%p4078_p11)
}
  0x5a   :  { %137 = dma.hbm_to_vmem [thread:$0]  %s6202_s15, 896, %s132_s10, [#allocation14], %s4095_s20, %s4095_s20, %s4096_s21  }
  0x5b   :  { %4082 = dma.done.wait [#allocation3], 2560  }
  0x5c   :  { %4083 = vsyncadd [#allocation3], 4294964736 }
  0x5d   :  { %4084 = dma.done.wait [#allocation5], 2960  }
  0x5e   :  { %4085 = vsyncadd [#allocation5], 4294964336 }
  0x5f   :  { %4086 = dma.done.wait [#allocation8], 2432  }
  0x60   :  { %4087 = vsyncadd [#allocation8], 4294964864 }
  0x61   :  { %4088 = dma.done.wait [#allocation11], 2304  }
  0x62   :  { %4089 = vsyncadd [#allocation11], 4294964992 }
  0x63   :  { %4090 = dma.done.wait [#allocation14], 896  }
  0x64   :  { %4091 = vsyncadd [#allocation14], 4294966400  ;;  %v6230_v0 = vmov 2   ;;  %v6220_v1 = vmov 1   ;;  %v4104_v2 = vmov 0.0   ;;  %s6234_s20 = sld [smem:[#allocation20_spill]] }
  0x65   :  { %3706 = vset.pattern.permute.xlu1 %v6230_v0  ;;  %3705 = vset.pattern.permute.xlu0 %v6220_v1  ;;  %v6208_v6 = vmov 0   ;;  %v6226_v7 = vmov 8   ;;  %v6212_v8 = vmov 9   ;;  %v6228_v9 = vmov 4   ;;  %v1490_v20 = vld [vmem:[#allocation2 + $0x78] sm:$0xff]  ;;  %v1489_v21 = vld [vmem:[#allocation2 + $0x70] sm:$0xff] }
  0x66   :  { %1526 = vmatprep.subr.mxu0 %v4104_v2  ;;  %v6218_v12 = vmov 3   ;;  %v6222_v16 = vmov 5   ;;  %v6214_v17 = vmov 7   ;;  %v6210_v18 = vmov 6   ;;  %v1488_v22 = vld [vmem:[#allocation2 + $0x68] sm:$0xff]  ;;  %v1487_v23 = vld [vmem:[#allocation2 + $0x60] sm:$0xff] }
  0x67   :  { %1527 = vmatpush1.msra.mxu0 %v1490_v20  ;;  %v1486_v24 = vld [vmem:[#allocation2 + $0x58] sm:$0xff]  ;;  %v1485_v25 = vld [vmem:[#allocation2 + $0x50] sm:$0xff]  ;;  %v1484_v26 = vld [vmem:[#allocation2 + $0x48] sm:$0xff]  ;;  %v6224_v33 = vmov 10   ;;  %v6216_v39 = vmov 11   ;;  %s4115_s15 = smov 96  }
  0x68   :  { %1528 = vmatprep.subr.mxu0 %v4104_v2  ;;  %v1483_v27 = vld [vmem:[#allocation2 + $0x40] sm:$0xff]  ;;  %v1482_v28 = vld [vmem:[#allocation2 + $0x38] sm:$0xff]  ;;  %v1481_v29 = vld [vmem:[#allocation2 + $0x30] sm:$0xff]  ;;  %s4116_s21 = smov 32   ;;  %s4117_s30 = smov 64  }
  0x69   :  { %1529 = vmatpush1.msra.mxu0 %v1489_v21  ;;  %v1480_v30 = vld [vmem:[#allocation2 + $0x28] sm:$0xff]  ;;  %v1479_v31 = vld [vmem:[#allocation2 + $0x20] sm:$0xff]  ;;  %v1478_v32 = vld [vmem:[#allocation2 + $0x18] sm:$0xff]  ;;  %s6247_s14 = sld [smem:[#allocation21_spill]] }
  0x6a   :  { %v4260_v3 = vld [vmem:[%s6234_s20] sm:$0xff]  ;;  %v4267_v4 = vld [vmem:[%s6234_s20 + $0x8] sm:$0xff]  ;;  %v4272_v5 = vld [vmem:[%s6234_s20 + $0x18] sm:$0xff]  ;;  %1530 = vmatprep.subr.mxu0 %v4104_v2 }
  0x6b   :  { %376 = vperm.xlu1 %3706, %v4260_v3   ;;  %266 = vperm.xlu0 %3705, %v4260_v3   ;;  %v4293_v10 = vld [vmem:[%s6234_s20 + $0x10] sm:$0xff]  ;;  %v4301_v11 = vld [vmem:[%s6234_s20 + $0x28] sm:$0xff]  ;;  %v4315_v14 = vld [vmem:[%s6234_s20 + $0x38] sm:$0xff] }
  0x6c   :  { %v4308_v13 = vld [vmem:[%s6234_s20 + $0x30] sm:$0xff]  ;;  %v4323_v15 = vld [vmem:[%s6234_s20 + $0x40] sm:$0xff]  ;;  %1531 = vmatpush1.msra.mxu0 %v1488_v22  ;;  %v1476_v35 = vld [vmem:[#allocation2 + $0x8] sm:$0xff] }
  0x6d   :  { %v4352_v19 = vld [vmem:[%s6234_s20 + $0x20] sm:$0xff]  ;;  %1532 = vmatprep.subr.mxu0 %v4104_v2  ;;  %v1477_v34 = vld [vmem:[#allocation2 + $0x10] sm:$0xff]  ;;  %v1494_v37 = vld [vmem:[#allocation2 + $0x98] sm:$0xff] }
  0x6e   :  { %1533 = vmatpush1.msra.mxu0 %v1487_v23  ;;  %v1475_v36 = vld [vmem:[#allocation2] sm:$0xff]  ;;  %v1493_v38 = vld [vmem:[#allocation2 + $0x90] sm:$0xff]  ;;  %v1492_v42 = vld [vmem:[#allocation2 + $0x88] sm:$0xff] }
  0x6f   :  { %3707 = vset.pattern.permute.xlu1 %v6208_v6  ;;  %3719 = vset.pattern.permute.xlu0 %v6230_v0  ;;  %v1491_v43 = vld [vmem:[#allocation2 + $0x80] sm:$0xff] }
  0x70   :  { %179 = vperm.xlu1 %3707, %v4267_v4   ;;  %385 = vperm.xlu0 %3719, %v4272_v5  }
  0x71   :  { %1534 = vmatprep.subr.mxu0 %v4104_v2 }
  0x72   :  { %1535 = vmatpush1.msra.mxu0 %v1486_v24 }
  0x73   :  { %1536 = vmatprep.subr.mxu0 %v4104_v2 }
  0x74   :  { %3708 = vset.pattern.permute.xlu1 %v6220_v1  ;;  %3722 = vset.pattern.permute.xlu0 %v6226_v7 }
  0x75   :  { %269 = vperm.xlu1 %3708, %v4267_v4   ;;  %1036 = vperm.xlu0 %3722, %v4260_v3  }
  0x76   :  { %1537 = vmatpush1.msra.mxu0 %v1485_v25 }
  0x77   :  { %1538 = vmatprep.subr.mxu0 %v4104_v2 }
  0x78   :  { %1539 = vmatpush1.msra.mxu0 %v1484_v26 }
  0x79   :  { %3709 = vset.pattern.permute.xlu1 %v6230_v0  ;;  %3727 = vset.pattern.permute.xlu0 %v6212_v8 }
  0x7a   :  { %379 = vperm.xlu1 %3709, %v4267_v4   ;;  %1146 = vperm.xlu0 %3727, %v4260_v3  }
  0x7b   :  { %1540 = vmatprep.subr.mxu0 %v4104_v2 }
  0x7c   :  { %1541 = vmatpush1.msra.mxu0 %v1483_v27 }
  0x7d   :  { %1542 = vmatprep.subr.mxu0 %v4104_v2 }
  0x7e   :  { %3710 = vset.pattern.permute.xlu1 %v6228_v9  ;;  %3728 = vset.pattern.permute.xlu0 %v6208_v6 }
  0x7f   :  { %596 = vperm.xlu1 %3710, %v4260_v3   ;;  %176 = vperm.xlu0 %3728, %v4260_v3  }
  0x80   :  { %1543 = vmatpush1.msra.mxu0 %v1482_v28  ;;  %v6207_v28 = vlaneseq }
  0x81   :  { %1544 = vmatprep.subr.mxu0 %v4104_v2 }
  0x82   :  { %1545 = vmatpush1.msra.mxu0 %v1481_v29 }
  0x83   :  { %3711 = vset.pattern.permute.xlu1 %v6220_v1  ;;  %182 = vperm.xlu0 %3728, %v4293_v10  }
  0x84   :  { %272 = vperm.xlu1 %3711, %v4293_v10   ;;  %1546 = vmatprep.subr.mxu0 %v4104_v2 }
  0x85   :  { %1547 = vmatpush1.msra.mxu0 %v1480_v30  ;;  %v4513_v30 = vand.u32 127, %v6207_v28 }
  0x86   :  { %1548 = vmatprep.subr.mxu0 %v4104_v2 }
  0x87   :  { %191 = vperm.xlu0 %3728, %v4301_v11   ;;  %1549 = vmatpush1.msra.mxu0 %v1479_v31 }
  0x88   :  { %3712 = vset.pattern.permute.xlu1 %v6218_v12  ;;  %1550 = vmatprep.subr.mxu0 %v4104_v2 }
  0x89   :  { %489 = vperm.xlu1 %3712, %v4267_v4   ;;  %1551 = vmatpush1.msra.mxu0 %v1478_v32  ;;  %v4522_v32 = vadd.s32 128, %v4513_v30 }
  0x8a   :  { %1552 = vmatprep.subr.mxu0 %v4104_v2 }
  0x8b   :  { %194 = vperm.xlu0 %3728, %v4308_v13   ;;  %1553 = vmatpush1.msra.mxu0 %v1477_v34 }
  0x8c   :  { %1554 = vmatprep.subr.mxu0 %v4104_v2 }
  0x8d   :  { %3713 = vset.pattern.permute.xlu1 %v6230_v0  ;;  %1555 = vmatpush1.msra.mxu0 %v1476_v35 }
  0x8e   :  { %382 = vperm.xlu1 %3713, %v4293_v10   ;;  %1556 = vmatprep.subr.mxu0 %v4104_v2 }
  0x8f   :  { %197 = vperm.xlu0 %3728, %v4315_v14   ;;  %1557 = vmatpush1.msra.mxu0 %v1475_v36 }
  0x90   :  { %1582 = vmatprep.subr.mxu0 %v4104_v2 }
  0x91   :  { %1583 = vmatpush2.msra.mxu0 %v1494_v37 }
  0x92   :  { %3714 = vset.pattern.permute.xlu1 %v6228_v9  ;;  %1584 = vmatprep.subr.mxu0 %v4104_v2 }
  0x93   :  { %599 = vperm.xlu1 %3714, %v4267_v4   ;;  %200 = vperm.xlu0 %3728, %v4323_v15  }
  0x94   :  { %1585 = vmatpush2.msra.mxu0 %v1493_v38 }
  0x95   :  { %1586 = vmatprep.subr.mxu0 %v4104_v2 }
  0x96   :  { %1587 = vmatpush2.msra.mxu0 %v1492_v42 }
  0x97   :  { %3715 = vset.pattern.permute.xlu1 %v6208_v6  ;;  %3757 = vset.pattern.permute.xlu0 %v6218_v12 }
  0x98   :  { %185 = vperm.xlu1 %3715, %v4272_v5   ;;  %486 = vperm.xlu0 %3757, %v4260_v3  }
  0x99   :  { %1588 = vmatprep.subr.mxu0 %v4104_v2 }
  0x9a   :  { %1589 = vmatpush2.msra.mxu0 %v1491_v43 }
  0x9b   :  { %2523 = vmatprep.subr.mxu0 %v4104_v2 }
  0x9c   :  { %3716 = vset.pattern.permute.xlu1 %v6220_v1  ;;  %492 = vperm.xlu0 %3757, %v4293_v10  }
  0x9d   :  { %275 = vperm.xlu1 %3716, %v4272_v5  }
  0xa0   :  { %495 = vperm.xlu0 %3757, %v4272_v5  }
  0xa1   :  { %3717 = vset.pattern.permute.xlu1 %v6222_v16 }
  0xa2   :  { %709 = vperm.xlu1 %3717, %v4267_v4  }
  0xa4   :  { %510 = vperm.xlu0 %3757, %v4323_v15  }
  0xa6   :  { %3718 = vset.pattern.permute.xlu1 %v6214_v17 }
  0xa7   :  { %926 = vperm.xlu1 %3718, %v4260_v3  }
  0xa8   :  { %3766 = vset.pattern.permute.xlu0 %v6210_v18 }
  0xa9   :  { %816 = vperm.xlu0 %3766, %v4260_v3  }
  0xab   :  { %3720 = vset.pattern.permute.xlu1 %v6228_v9 }
  0xac   :  { %602 = vperm.xlu1 %3720, %v4293_v10  }
  0xad   :  { %822 = vperm.xlu0 %3766, %v4293_v10  }
  0xb0   :  { %3721 = vset.pattern.permute.xlu1 %v6210_v18 }
  0xb1   :  { %819 = vperm.xlu1 %3721, %v4267_v4   ;;  %825 = vperm.xlu0 %3766, %v4272_v5  }
  0xb5   :  { %3723 = vset.pattern.permute.xlu1 %v6208_v6  ;;  %828 = vperm.xlu0 %3766, %v4352_v19  }
  0xb6   :  { %188 = vperm.xlu1 %3723, %v4352_v19  }
  0xb9   :  { %831 = vperm.xlu0 %3766, %v4301_v11  }
  0xba   :  { %3724 = vset.pattern.permute.xlu1 %v6220_v1 }
  0xbb   :  { %278 = vperm.xlu1 %3724, %v4352_v19  }
  0xbd   :  { %834 = vperm.xlu0 %3766, %v4308_v13  }
  0xbf   :  { %3725 = vset.pattern.permute.xlu1 %v6222_v16 }
  0xc0   :  { %712 = vperm.xlu1 %3725, %v4293_v10  }
  0xc1   :  { %837 = vperm.xlu0 %3766, %v4315_v14  }
  0xc4   :  { %3726 = vset.pattern.permute.xlu1 %v6214_v17 }
  0xc5   :  { %929 = vperm.xlu1 %3726, %v4267_v4   ;;  %3771 = vset.pattern.permute.xlu0 %v6222_v16 }
  0xc6   :  { %706 = vperm.xlu0 %3771, %v4260_v3  }
  0xc9   :  { %3729 = vset.pattern.permute.xlu1 %v6230_v0 }
  0xca   :  { %388 = vperm.xlu1 %3729, %v4352_v19   ;;  %715 = vperm.xlu0 %3771, %v4272_v5  }
  0xce   :  { %3730 = vset.pattern.permute.xlu1 %v6228_v9  ;;  %718 = vperm.xlu0 %3771, %v4352_v19  }
  0xcf   :  { %605 = vperm.xlu1 %3730, %v4272_v5  }
  0xd2   :  { %721 = vperm.xlu0 %3771, %v4301_v11  }
  0xd3   :  { %3731 = vset.pattern.permute.xlu1 %v6226_v7 }
  0xd4   :  { %1039 = vperm.xlu1 %3731, %v4267_v4  }
  0xd6   :  { %724 = vperm.xlu0 %3771, %v4308_v13  }
  0xd8   :  { %3732 = vset.pattern.permute.xlu1 %v6224_v33 }
  0xd9   :  { %1256 = vperm.xlu1 %3732, %v4260_v3  }
  0xda   :  { %730 = vperm.xlu0 %3771, %v4323_v15  }
  0xdd   :  { %3733 = vset.pattern.permute.xlu1 %v6220_v1 }
  0xde   :  { %281 = vperm.xlu1 %3733, %v4301_v11   ;;  %3778 = vset.pattern.permute.xlu0 %v6224_v33 }
  0xdf   :  { %1274 = vperm.xlu0 %3778, %v4308_v13  }
  0xe2   :  { %3734 = vset.pattern.permute.xlu1 %v6218_v12 }
  0xe3   :  { %498 = vperm.xlu1 %3734, %v4352_v19   ;;  %3779 = vset.pattern.permute.xlu0 %v6216_v39 }
  0xe4   :  { %1366 = vperm.xlu0 %3779, %v4260_v3  }
  0xe6   :  { %v4406_v40 = vpop.permute.xlu1 %376  ;;  %v4408_v41 = vpop.permute.xlu0 %266 }
  0xe7   :  { %3735 = vset.pattern.permute.xlu1 %v6214_v17  ;;  %vm295_vm0 = vcmp.eq.s32.totalorder %v4513_v30, %v4408_v41  ;;  %vm296_vm1 = vcmp.eq.s32.totalorder %v4522_v32, %v4408_v41  ;;  %vm405_vm6 = vcmp.eq.s32.totalorder %v4513_v30, %v4406_v40  ;;  %vm406_vm7 = vcmp.eq.s32.totalorder %v4522_v32, %v4406_v40 }
  0xe8   :  { %932 = vperm.xlu1 %3735, %v4293_v10   ;;  %1369 = vperm.xlu0 %3779, %v4267_v4   ;;  %v3146_v36 = vsel %vm295_vm0, 1.0, %v4104_v2  ;;  %v3147_v37 = vsel %vm296_vm1, 1.0, %v4104_v2 }
  0xeb   :  { %v4415_v44 = vpop.permute.xlu1 %179  ;;  %v4417_v45 = vpop.permute.xlu0 %385 }
  0xec   :  { %3736 = vset.pattern.permute.xlu1 %v6212_v8  ;;  %1372 = vperm.xlu0 %3779, %v4293_v10   ;;  %vm411_vm12 = vcmp.eq.s32.totalorder %v4513_v30, %v4417_v45  ;;  %vm412_vm13 = vcmp.eq.s32.totalorder %v4522_v32, %v4417_v45 }
  0xed   :  { %1149 = vperm.xlu1 %3736, %v4267_v4   ;;  %v3172_v45 = vsel %vm411_vm12, 1.0, %v4104_v2  ;;  %v3173_v39 = vsel %vm412_vm13, 1.0, %v4104_v2 }
  0xf0   :  { %v4423_v46 = vpop.permute.xlu1 %269  ;;  %v4425_v47 = vpop.permute.xlu0 %1036  ;;  %1375 = vperm.xlu0 %3779, %v4272_v5  }
  0xf1   :  { %3737 = vset.pattern.permute.xlu1 %v6230_v0 }
  0xf2   :  { %391 = vperm.xlu1 %3737, %v4301_v11  }
  0xf4   :  { %1381 = vperm.xlu0 %3779, %v4301_v11  }
  0xf5   :  { %v4430_v48 = vpop.permute.xlu1 %379  ;;  %v4432_v49 = vpop.permute.xlu0 %1146 }
  0xf6   :  { %3738 = vset.pattern.permute.xlu1 %v6228_v9 }
  0xf7   :  { %608 = vperm.xlu1 %3738, %v4352_v19  }
  0xf8   :  { %1384 = vperm.xlu0 %3779, %v4308_v13  }
  0xfa   :  { %v4437_v50 = vpop.permute.xlu1 %596  ;;  %v4439_v51 = vpop.permute.xlu0 %176 }
  0xfb   :  { %3739 = vset.pattern.permute.xlu1 %v6226_v7  ;;  %vm205_vm2 = vcmp.eq.s32.totalorder %v4513_v30, %v4439_v51  ;;  %vm206_vm3 = vcmp.eq.s32.totalorder %v4522_v32, %v4439_v51  ;;  %vm625_vm0 = vcmp.eq.s32.totalorder %v4513_v30, %v4437_v50  ;;  %vm626_vm1 = vcmp.eq.s32.totalorder %v4522_v32, %v4437_v50 }
  0xfc   :  { %1042 = vperm.xlu1 %3739, %v4293_v10   ;;  %3782 = vset.pattern.permute.xlu0 %v6212_v8  ;;  %v3126_v38 = vsel %vm205_vm2, 1.0, %v4104_v2  ;;  %v3127_v41 = vsel %vm206_vm3, 1.0, %v4104_v2  ;;  %v3207_v16 = vsel %vm626_vm1, 1.0, %v4104_v2  ;;  %vm1176_vm1 = vcmp.eq.s32.totalorder %v4522_v32, %v4432_v49 }
  0xfd   :  { %1161 = vperm.xlu0 %3782, %v4301_v11   ;;  %v355_v51 = vadd.f32 %v3146_v36, %v3126_v38  ;;  %v356_v28 = vadd.f32 %v3147_v37, %v3127_v41  ;;  %v3167_v36 = vsel %vm406_vm7, 1.0, %v4104_v2 }
  0xfe   :  { %v4444_v52 = vpop.permute.xlu0 %182 }
  0xff   :  { %v4446_v53 = vpop.permute.xlu1 %272 }
 0x100   :  { %3740 = vset.pattern.permute.xlu1 %v6224_v33 }
 0x101   :  { %1259 = vperm.xlu1 %3740, %v4267_v4   ;;  %1170 = vperm.xlu0 %3782, %v4323_v15  }
 0x102   :  { %v4452_v54 = vpop.permute.xlu0 %191 }
 0x104   :  { %v4454_v55 = vpop.permute.xlu1 %489 }
 0x105   :  { %3741 = vset.pattern.permute.xlu1 %v6220_v1  ;;  %3787 = vset.pattern.permute.xlu0 %v6208_v6 }
 0x106   :  { %284 = vperm.xlu1 %3741, %v4308_v13   ;;  %v4459_v56 = vpop.permute.xlu0 %194 }
 0x109   :  { %v4461_v57 = vpop.permute.xlu1 %382 }
 0x10a   :  { %3742 = vset.pattern.permute.xlu1 %v6218_v12  ;;  %v4465_v58 = vpop.permute.xlu0 %197 }
 0x10b   :  { %501 = vperm.xlu1 %3742, %v4301_v11  }
 0x10e   :  { %v4468_v59 = vpop.permute.xlu1 %599  ;;  %v4470_v60 = vpop.permute.xlu0 %200 }
 0x10f   :  { %3743 = vset.pattern.permute.xlu1 %v6214_v17 }
 0x110   :  { %935 = vperm.xlu1 %3743, %v4272_v5  }
 0x113   :  { %v4474_v61 = vpop.permute.xlu1 %185  ;;  %v4476_v62 = vpop.permute.xlu0 %486 }
 0x114   :  { %3744 = vset.pattern.permute.xlu1 %v6212_v8  ;;  %vm211_vm8 = vcmp.eq.s32.totalorder %v4513_v30, %v4474_v61  ;;  %vm212_vm9 = vcmp.eq.s32.totalorder %v4522_v32, %v4474_v61  ;;  %vm515_vm10 = vcmp.eq.s32.totalorder %v4513_v30, %v4476_v62  ;;  %vm516_vm11 = vcmp.eq.s32.totalorder %v4522_v32, %v4476_v62 }
 0x115   :  { %1152 = vperm.xlu1 %3744, %v4293_v10   ;;  %v3166_v61 = vsel %vm405_vm6, 1.0, %v4104_v2  ;;  %v3132_v37 = vsel %vm211_vm8, 1.0, %v4104_v2  ;;  %v3133_v38 = vsel %vm212_vm9, 1.0, %v4104_v2  ;;  %v3186_v62 = vsel %vm515_vm10, 1.0, %v4104_v2 }
 0x116   :  { %v3187_v6 = vsel %vm516_vm11, 1.0, %v4104_v2 }
 0x117   :  { %v4480_v63 = vpop.permute.xlu0 %492 }
 0x118   :  { %v276_v3 = vpop.permute.xlu1 %275 }
 0x119   :  { %3745 = vset.pattern.permute.xlu1 %v6230_v0  ;;  %vm301_vm4 = vcmp.eq.s32.totalorder %v4513_v30, %v276_v3  ;;  %vm302_vm5 = vcmp.eq.s32.totalorder %v4522_v32, %v276_v3 }
 0x11a   :  { %394 = vperm.xlu1 %3745, %v4308_v13   ;;  %v3152_v40 = vsel %vm301_vm4, 1.0, %v4104_v2  ;;  %v3153_v3 = vsel %vm302_vm5, 1.0, %v4104_v2 }
 0x11b   :  { %v4484_v4 = vpop.permute.xlu0 %495  ;;  %v361_v18 = vadd.f32 %v3152_v40, %v3132_v37 }
 0x11c   :  { %vm521_vm14 = vcmp.eq.s32.totalorder %v4513_v30, %v4484_v4  ;;  %vm522_vm15 = vcmp.eq.s32.totalorder %v4522_v32, %v4484_v4  ;;  %v3206_v4 = vsel %vm625_vm0, 1.0, %v4104_v2  ;;  %vm1175_vm0 = vcmp.eq.s32.totalorder %v4513_v30, %v4432_v49 }
 0x11d   :  { %v4486_v20 = vpop.permute.xlu1 %709  ;;  %v471_v37 = vadd.f32 %v3172_v45, %v361_v18  ;;  %v3307_v49 = vsel %vm1176_vm1, 1.0, %v4104_v2 }
 0x11e   :  { %3746 = vset.pattern.permute.xlu1 %v6228_v9  ;;  %vm737_vm1 = vcmp.eq.s32.totalorder %v4513_v30, %v4486_v20 }
 0x11f   :  { %611 = vperm.xlu1 %3746, %v4301_v11   ;;  %v4490_v21 = vpop.permute.xlu0 %510 }
 0x122   :  { %v4492_v22 = vpop.permute.xlu1 %926 }
 0x123   :  { %3747 = vset.pattern.permute.xlu1 %v6226_v7  ;;  %vm955_vm12 = vcmp.eq.s32.totalorder %v4513_v30, %v4492_v22  ;;  %vm956_vm13 = vcmp.eq.s32.totalorder %v4522_v32, %v4492_v22 }
 0x124   :  { %1045 = vperm.xlu1 %3747, %v4272_v5   ;;  %v4496_v23 = vpop.permute.xlu0 %816 }
 0x125   :  { %vm845_vm6 = vcmp.eq.s32.totalorder %v4513_v30, %v4496_v23  ;;  %vm846_vm7 = vcmp.eq.s32.totalorder %v4522_v32, %v4496_v23 }
 0x127   :  { %v4498_v24 = vpop.permute.xlu1 %602 }
 0x128   :  { %3748 = vset.pattern.permute.xlu1 %v6224_v33  ;;  %v4501_v25 = vpop.permute.xlu0 %822 }
 0x129   :  { %1262 = vperm.xlu1 %3748, %v4293_v10  }
 0x12c   :  { %v4504_v26 = vpop.permute.xlu1 %819  ;;  %v4506_v27 = vpop.permute.xlu0 %825 }
 0x12d   :  { %3749 = vset.pattern.permute.xlu1 %v6220_v1  ;;  %v466_v1 = vadd.f32 %v3167_v36, %v356_v28  ;;  %v3193_v36 = vsel %vm522_vm15, 1.0, %v4104_v2  ;;  %vm851_vm8 = vcmp.eq.s32.totalorder %v4513_v30, %v4506_v27  ;;  %vm852_vm9 = vcmp.eq.s32.totalorder %v4522_v32, %v4506_v27 }
 0x12e   :  { %287 = vperm.xlu1 %3749, %v4315_v14   ;;  %vm1066_vm15 = vcmp.eq.s32.totalorder %v4522_v32, %v4425_v47 }
 0x130   :  { %v4510_v29 = vpop.permute.xlu0 %828 }
 0x131   :  { %v4515_v31 = vpop.permute.xlu1 %188 }
 0x132   :  { %3750 = vset.pattern.permute.xlu1 %v6218_v12  ;;  %v465_v12 = vadd.f32 %v3166_v61, %v355_v51  ;;  %v3192_v61 = vsel %vm521_vm14, 1.0, %v4104_v2  ;;  %vm1065_vm14 = vcmp.eq.s32.totalorder %v4513_v30, %v4425_v47  ;;  %v3287_v47 = vsel %vm1066_vm15, 1.0, %v4104_v2 }
 0x133   :  { %504 = vperm.xlu1 %3750, %v4308_v13   ;;  %v3286_v22 = vsel %vm1065_vm14, 1.0, %v4104_v2  ;;  %vm518_vm14 = vcmp.eq.s32.totalorder %v4522_v32, %v4454_v55  ;;  %vm627_vm15 = vcmp.eq.s32.totalorder %v4513_v30, %v4468_v59 }
 0x134   :  { %v4519_v10 = vpop.permute.xlu0 %831  ;;  %v575_v40 = vadd.f32 %v3186_v62, %v465_v12 }
 0x136   :  { %v4524_v34 = vpop.permute.xlu1 %278 }
 0x137   :  { %3751 = vset.pattern.permute.xlu1 %v6214_v17 }
 0x138   :  { %938 = vperm.xlu1 %3751, %v4352_v19   ;;  %v4536_v35 = vpop.permute.xlu0 %834 }
 0x13b   :  { %v4544_v42 = vpop.permute.xlu1 %712 }
 0x13c   :  { %3752 = vset.pattern.permute.xlu1 %v6212_v8  ;;  %v4551_v43 = vpop.permute.xlu0 %837  ;;  %v362_v8 = vadd.f32 %v3153_v3, %v3133_v38  ;;  %v576_v3 = vadd.f32 %v3187_v6, %v466_v1  ;;  %v685_v1 = vadd.f32 %v3206_v4, %v575_v40  ;;  %v3252_v4 = vsel %vm851_vm8, 1.0, %v4104_v2 }
 0x13d   :  { %1155 = vperm.xlu1 %3752, %v4272_v5   ;;  %vm208_vm8 = vcmp.eq.s32.totalorder %v4522_v32, %v4415_v44 }
 0x13e   :  { %v472_v38 = vadd.f32 %v3173_v39, %v362_v8  ;;  %v686_v6 = vadd.f32 %v3207_v16, %v576_v3  ;;  %v581_v8 = vadd.f32 %v3192_v61, %v471_v37  ;;  %v4612_v39 = vld [vmem:[%s6234_s20 + $0x48] sm:$0xff] }
 0x13f   :  { %203 = vperm.xlu0 %3787, %v4612_v39  }
 0x140   :  { %v4572_v41 = vpop.permute.xlu1 %929  ;;  %v582_v12 = vadd.f32 %v3193_v36, %v472_v38  ;;  %v3246_v36 = vsel %vm845_vm6, 1.0, %v4104_v2  ;;  %vm207_vm6 = vcmp.eq.s32.totalorder %v4513_v30, %v4415_v44  ;;  %v6240_v44 = vmov 9  }
 0x141   :  { %3753 = vset.pattern.permute.xlu1 %v6230_v0  ;;  %v707_v17 = vpop.permute.xlu0 %706 }
 0x142   :  { %397 = vperm.xlu1 %3753, %v4315_v14   ;;  %vm735_vm2 = vcmp.eq.s32.totalorder %v4513_v30, %v707_v17  ;;  %vm736_vm3 = vcmp.eq.s32.totalorder %v4522_v32, %v707_v17 }
 0x143   :  { %v3226_v16 = vsel %vm735_vm2, 1.0, %v4104_v2  ;;  %v3227_v50 = vsel %vm736_vm3, 1.0, %v4104_v2  ;;  %3790 = vset.pattern.permute.xlu0 %v6230_v0 }
 0x144   :  { %v795_v37 = vadd.f32 %v3226_v16, %v685_v1  ;;  %v796_v1 = vadd.f32 %v3227_v50, %v686_v6  ;;  %403 = vperm.xlu0 %3790, %v4612_v39  }
 0x145   :  { %v4588_v51 = vpop.permute.xlu1 %388  ;;  %v716_v28 = vpop.permute.xlu0 %715 }
 0x146   :  { %3754 = vset.pattern.permute.xlu1 %v6228_v9  ;;  %vm741_vm4 = vcmp.eq.s32.totalorder %v4513_v30, %v716_v28  ;;  %vm742_vm5 = vcmp.eq.s32.totalorder %v4522_v32, %v716_v28  ;;  %v905_v27 = vadd.f32 %v3246_v36, %v795_v37  ;;  %v3267_v37 = vsel %vm956_vm13, 1.0, %v4104_v2 }
 0x147   :  { %614 = vperm.xlu1 %3754, %v4308_v13   ;;  %v3232_v62 = vsel %vm741_vm4, 1.0, %v4104_v2  ;;  %v3233_v45 = vsel %vm742_vm5, 1.0, %v4104_v2  ;;  %vm297_vm4 = vcmp.eq.s32.totalorder %v4513_v30, %v4423_v46  ;;  %vm1495_vm5 = vcmask 261120  }
 0x148   :  { %vm517_vm13 = vcmp.eq.s32.totalorder %v4513_v30, %v4454_v55 }
 0x149   :  { %v4600_v18 = vpop.permute.xlu0 %718  ;;  %v3188_v55 = vsel %vm517_vm13, 1.0, %v4104_v2 }
 0x14a   :  { %v606_v17 = vpop.permute.xlu1 %605 }
 0x14b   :  { %vm631_vm10 = vcmp.eq.s32.totalorder %v4513_v30, %v606_v17  ;;  %vm632_vm11 = vcmp.eq.s32.totalorder %v4522_v32, %v606_v17  ;;  %3755 = vset.pattern.permute.xlu1 %v6226_v7  ;;  %v3253_v17 = vsel %vm852_vm9, 1.0, %v4104_v2  ;;  %vm407_vm9 = vcmp.eq.s32.totalorder %v4513_v30, %v4430_v48 }
 0x14c   :  { %v3212_v40 = vsel %vm631_vm10, 1.0, %v4104_v2  ;;  %v3213_v3 = vsel %vm632_vm11, 1.0, %v4104_v2  ;;  %1048 = vperm.xlu1 %3755, %v4352_v19   ;;  %vm408_vm10 = vcmp.eq.s32.totalorder %v4522_v32, %v4430_v48  ;;  %v3189_v48 = vsel %vm518_vm14, 1.0, %v4104_v2 }
 0x14d   :  { %v691_v38 = vadd.f32 %v3212_v40, %v581_v8  ;;  %v692_v28 = vadd.f32 %v3213_v3, %v582_v12  ;;  %v4626_v61 = vpop.permute.xlu0 %721  ;;  %v3247_v8 = vsel %vm846_vm7, 1.0, %v4104_v2  ;;  %vm298_vm7 = vcmp.eq.s32.totalorder %v4522_v32, %v4423_v46 }
 0x14e   :  { %v3168_v46 = vsel %vm407_vm9, 1.0, %v4104_v2  ;;  %v3169_v9 = vsel %vm408_vm10, 1.0, %v4104_v2  ;;  %vm214_vm9 = vcmp.eq.s32.totalorder %v4522_v32, %v4515_v31  ;;  %vm413_vm10 = vcmp.eq.s32.totalorder %v4513_v30, %v4588_v51 }
 0x14f   :  { %v801_v12 = vadd.f32 %v3232_v62, %v691_v38  ;;  %v802_v16 = vadd.f32 %v3233_v45, %v692_v28  ;;  %v4644_v40 = vpop.permute.xlu1 %1039  ;;  %v906_v62 = vadd.f32 %v3247_v8, %v796_v1  ;;  %v3266_v45 = vsel %vm955_vm12, 1.0, %v4104_v2 }
 0x150   :  { %3756 = vset.pattern.permute.xlu1 %v6224_v33  ;;  %v1015_v38 = vadd.f32 %v3266_v45, %v905_v27  ;;  %v6236_v28 = vmov 1   ;;  %v6237_v8 = vmov 3   ;;  %v3306_v27 = vsel %vm1175_vm0, 1.0, %v4104_v2 }
 0x151   :  { %1265 = vperm.xlu1 %3756, %v4272_v5   ;;  %v4652_v6 = vpop.permute.xlu0 %724  ;;  %v4654_v23 = vadd.f32 %v3252_v4, %v801_v12  ;;  %v4656_v50 = vadd.f32 %v3253_v17, %v802_v16  ;;  %v6235_v5 = vmov 5   ;;  %v1016_v4 = vadd.f32 %v3267_v37, %v906_v62 }
 0x152   :  { %3793 = vset.pattern.permute.xlu0 %v6235_v5  ;;  %v1125_v17 = vadd.f32 %v3286_v22, %v1015_v38  ;;  %v6238_v22 = vmov 11   ;;  %vm628_vm0 = vcmp.eq.s32.totalorder %v4522_v32, %v4468_v59  ;;  %v3208_v59 = vsel %vm627_vm15, 1.0, %v4104_v2 }
 0x153   :  { %733 = vperm.xlu0 %3793, %v4612_v39   ;;  %v1126_v16 = vadd.f32 %v3287_v47, %v1016_v4  ;;  %v3148_v4 = vsel %vm297_vm4, 1.0, %v4104_v2  ;;  %v6239_v47 = vmov 7   ;;  %vm304_vm4 = vcmp.eq.s32.totalorder %v4522_v32, %v4524_v34 }
 0x154   :  { %v1257_v3 = vpop.permute.xlu1 %1256  ;;  %vm743_vm14 = vcmp.eq.s32.totalorder %v4513_v30, %v4600_v18  ;;  %vm744_vm15 = vcmp.eq.s32.totalorder %v4522_v32, %v4600_v18  ;;  %v6243_v18 = vmov 8  }
 0x155   :  { %3758 = vset.pattern.permute.xlu1 %v6236_v28  ;;  %v4668_v36 = vpop.permute.xlu0 %730  ;;  %vm1285_vm2 = vcmp.eq.s32.totalorder %v4513_v30, %v1257_v3  ;;  %vm1286_vm3 = vcmp.eq.s32.totalorder %v4522_v32, %v1257_v3  ;;  %v1235_v3 = vadd.f32 %v3306_v27, %v1125_v17  ;;  %v1236_v38 = vadd.f32 %v3307_v49, %v1126_v16 }
 0x156   :  { %290 = vperm.xlu1 %3758, %v4323_v15   ;;  %v3326_v62 = vsel %vm1285_vm2, 1.0, %v4104_v2  ;;  %v3327_v45 = vsel %vm1286_vm3, 1.0, %v4104_v2  ;;  %v3128_v27 = vsel %vm207_vm6, 1.0, %v4104_v2  ;;  %v3149_v49 = vsel %vm298_vm7, 1.0, %v4104_v2 }
 0x157   :  { %3796 = vset.pattern.permute.xlu0 %v6226_v7  ;;  %v1345_v17 = vadd.f32 %v3326_v62, %v1235_v3  ;;  %v1346_v16 = vadd.f32 %v3327_v45, %v1236_v38  ;;  %v3129_v3 = vsel %vm208_vm8, 1.0, %v4104_v2  ;;  %v357_v38 = vadd.f32 %v3148_v4, %v3128_v27 }
 0x158   :  { %1063 = vperm.xlu0 %3796, %v4612_v39   ;;  %vm738_vm2 = vcmp.eq.s32.totalorder %v4522_v32, %v4486_v20  ;;  %vm303_vm3 = vcmp.eq.s32.totalorder %v4513_v30, %v4524_v34  ;;  %vm847_vm6 = vcmp.eq.s32.totalorder %v4513_v30, %v4504_v26  ;;  %vm848_vm7 = vcmp.eq.s32.totalorder %v4522_v32, %v4504_v26 }
 0x159   :  { %v4678_v1 = vpop.permute.xlu1 %281  ;;  %v467_v4 = vadd.f32 %v3168_v46, %v357_v38  ;;  %vm213_vm8 = vcmp.eq.s32.totalorder %v4513_v30, %v4515_v31  ;;  %v3154_v46 = vsel %vm303_vm3, 1.0, %v4104_v2  ;;  %v3155_v26 = vsel %vm304_vm4, 1.0, %v4104_v2 }
 0x15a   :  { %3759 = vset.pattern.permute.xlu1 %v6237_v8  ;;  %v4684_v12 = vpop.permute.xlu0 %1274  ;;  %vm958_vm3 = vcmp.eq.s32.totalorder %v4522_v32, %v4572_v41 }
 0x15b   :  { %507 = vperm.xlu1 %3759, %v4315_v14   ;;  %v577_v27 = vadd.f32 %v3188_v55, %v467_v4  ;;  %v3135_v55 = vsel %vm214_vm9, 1.0, %v4104_v2 }
 0x15c   :  { %3799 = vset.pattern.permute.xlu0 %v6238_v22 }
 0x15d   :  { %1393 = vperm.xlu0 %3799, %v4612_v39   ;;  %v687_v20 = vadd.f32 %v3208_v59, %v577_v27 }
 0x15e   :  { %v4698_v37 = vpop.permute.xlu1 %498 }
 0x15f   :  { %3760 = vset.pattern.permute.xlu1 %v6239_v47  ;;  %v1367_v33 = vpop.permute.xlu0 %1366  ;;  %vm524_vm13 = vcmp.eq.s32.totalorder %v4522_v32, %v4698_v37 }
 0x160   :  { %vm1395_vm11 = vcmp.eq.s32.totalorder %v4513_v30, %v1367_v33  ;;  %vm1396_vm12 = vcmp.eq.s32.totalorder %v4522_v32, %v1367_v33  ;;  %941 = vperm.xlu1 %3760, %v4301_v11  }
 0x161   :  { %v3346_v7 = vsel %vm1395_vm11, 1.0, %v4104_v2  ;;  %v3347_v62 = vsel %vm1396_vm12, 1.0, %v4104_v2  ;;  %3901 = vset.pattern.permute.xlu0 %v6236_v28  ;;  %vm414_vm11 = vcmp.eq.s32.totalorder %v4522_v32, %v4588_v51  ;;  %vm523_vm12 = vcmp.eq.s32.totalorder %v4513_v30, %v4698_v37 }
 0x162   :  { %v1455_v33 = vadd.f32 %v3346_v7, %v1345_v17  ;;  %v1456_v45 = vadd.f32 %v3347_v62, %v1346_v16  ;;  %v358_v7 = vadd.f32 %v3149_v49, %v3129_v3  ;;  %v3209_v16 = vsel %vm628_vm0, 1.0, %v4104_v2 }
 0x163   :  { %v4739_v0 = vpop.permute.xlu1 %932  ;;  %v3134_v51 = vsel %vm213_vm8, 1.0, %v4104_v2  ;;  %v3175_v4 = vsel %vm414_vm11, 1.0, %v4104_v2  ;;  %v3194_v37 = vsel %vm523_vm12, 1.0, %v4104_v2  ;;  %vm853_vm0 = vcmp.eq.s32.totalorder %v4513_v30, %v4510_v29 }
 0x164   :  { %3761 = vset.pattern.permute.xlu1 %v6240_v44  ;;  %3366 = vmatprep.mubr.msk.f32.mxu0 %vm1495_vm5, %v1456_v45  ;;  %v468_v17 = vadd.f32 %v3169_v9, %v358_v7  ;;  %v3228_v45 = vsel %vm737_vm1, 1.0, %v4104_v2  ;;  %v6241_v9 = vmov 2   ;;  %v3249_v7 = vsel %vm848_vm7, 1.0, %v4104_v2 }
 0x165   :  { %1158 = vperm.xlu1 %3761, %v4352_v19   ;;  %1591 = vmatmul.mubr.f32.vlgmr.msra.gmra.mxu0 %v1455_v33  ;;  %v3229_v33 = vsel %vm738_vm2, 1.0, %v4104_v2  ;;  %v797_v34 = vadd.f32 %v3228_v45, %v687_v20  ;;  %v363_v59 = vadd.f32 %v3154_v46, %v3134_v51  ;;  %v3195_v45 = vsel %vm524_vm13, 1.0, %v4104_v2 }
 0x166   :  { %v578_v49 = vadd.f32 %v3189_v48, %v468_v17  ;;  %v3174_v48 = vsel %vm413_vm10, 1.0, %v4104_v2  ;;  %v6242_v17 = vmov 4   ;;  %vm854_vm1 = vcmp.eq.s32.totalorder %v4522_v32, %v4510_v29 }
 0x167   :  { %vm957_vm2 = vcmp.eq.s32.totalorder %v4513_v30, %v4572_v41  ;;  %v3234_v46 = vsel %vm743_vm14, 1.0, %v4104_v2  ;;  %vm1067_vm7 = vcmp.eq.s32.totalorder %v4513_v30, %v4644_v40  ;;  %vm1068_vm8 = vcmp.eq.s32.totalorder %v4522_v32, %v4644_v40 }
 0x168   :  { %v4757_v62 = vpop.permute.xlu1 %1149  ;;  %v688_v3 = vadd.f32 %v3209_v16, %v578_v49  ;;  %v364_v16 = vadd.f32 %v3155_v26, %v3135_v55  ;;  %v3235_v26 = vsel %vm744_vm15, 1.0, %v4104_v2  ;;  %v3269_v40 = vsel %vm958_vm3, 1.0, %v4104_v2 }
 0x169   :  { %3762 = vset.pattern.permute.xlu1 %v6241_v9  ;;  %vm1177_vm9 = vcmp.eq.s32.totalorder %v4513_v30, %v4757_v62  ;;  %vm1178_vm10 = vcmp.eq.s32.totalorder %v4522_v32, %v4757_v62  ;;  %vm299_vm15 = vcmp.eq.s32.totalorder %v4513_v30, %v4446_v53  ;;  %vm409_vm3 = vcmp.eq.s32.totalorder %v4513_v30, %v4461_v57 }
 0x16a   :  { %400 = vperm.xlu1 %3762, %v4323_v15   ;;  %v798_v38 = vadd.f32 %v3229_v33, %v688_v3  ;;  %v3248_v15 = vsel %vm847_vm6, 1.0, %v4104_v2  ;;  %v473_v33 = vadd.f32 %v3174_v48, %v363_v59  ;;  %v474_v20 = vadd.f32 %v3175_v4, %v364_v16 }
 0x16b   :  { %v907_v27 = vadd.f32 %v3248_v15, %v797_v34  ;;  %v3254_v48 = vsel %vm853_vm0, 1.0, %v4104_v2  ;;  %v3255_v4 = vsel %vm854_vm1, 1.0, %v4104_v2  ;;  %v3308_v62 = vsel %vm1177_vm9, 1.0, %v4104_v2 }
 0x16c   :  { %v908_v49 = vadd.f32 %v3249_v7, %v798_v38  ;;  %v583_v34 = vadd.f32 %v3194_v37, %v473_v33  ;;  %v584_v38 = vadd.f32 %v3195_v45, %v474_v20  ;;  %v3288_v37 = vsel %vm1067_vm7, 1.0, %v4104_v2  ;;  %v1370_v20 = vpop.permute.xlu0 %1369 }
 0x16d   :  { %v4787_v31 = vpop.permute.xlu1 %391  ;;  %v3289_v45 = vsel %vm1068_vm8, 1.0, %v4104_v2  ;;  %v6244_v33 = vmov 10   ;;  %vm1397_vm11 = vcmp.eq.s32.totalorder %v4513_v30, %v1370_v20  ;;  %vm1398_vm12 = vcmp.eq.s32.totalorder %v4522_v32, %v1370_v20 }
 0x16e   :  { %3763 = vset.pattern.permute.xlu1 %v6242_v17  ;;  %v1018_v41 = vadd.f32 %v3269_v40, %v908_v49  ;;  %vm300_vm0 = vcmp.eq.s32.totalorder %v4522_v32, %v4446_v53  ;;  %vm209_vm1 = vcmp.eq.s32.totalorder %v4513_v30, %v4444_v52  ;;  %vm520_vm7 = vcmp.eq.s32.totalorder %v4522_v32, %v4480_v63 }
 0x16f   :  { %617 = vperm.xlu1 %3763, %v4315_v14   ;;  %v3130_v53 = vsel %vm209_vm1, 1.0, %v4104_v2  ;;  %vm629_vm8 = vcmp.eq.s32.totalorder %v4513_v30, %v4498_v24  ;;  %vm630_vm9 = vcmp.eq.s32.totalorder %v4522_v32, %v4498_v24  ;;  %vm416_vm1 = vcmp.eq.s32.totalorder %v4522_v32, %v4787_v31 }
 0x170   :  { %v3210_v24 = vsel %vm629_vm8, 1.0, %v4104_v2 }
 0x172   :  { %v609_v3 = vpop.permute.xlu1 %608 }
 0x173   :  { %vm633_vm4 = vcmp.eq.s32.totalorder %v4513_v30, %v609_v3  ;;  %vm634_vm6 = vcmp.eq.s32.totalorder %v4522_v32, %v609_v3  ;;  %3764 = vset.pattern.permute.xlu1 %v6243_v18 }
 0x174   :  { %v3214_v15 = vsel %vm633_vm4, 1.0, %v4104_v2  ;;  %v3215_v7 = vsel %vm634_vm6, 1.0, %v4104_v2  ;;  %1051 = vperm.xlu1 %3764, %v4301_v11   ;;  %v3268_v11 = vsel %vm957_vm2, 1.0, %v4104_v2  ;;  %vm210_vm2 = vcmp.eq.s32.totalorder %v4522_v32, %v4444_v52 }
 0x175   :  { %v693_v51 = vadd.f32 %v3214_v15, %v583_v34  ;;  %v694_v55 = vadd.f32 %v3215_v7, %v584_v38  ;;  %v1017_v3 = vadd.f32 %v3268_v11, %v907_v27  ;;  %v1128_v15 = vadd.f32 %v3289_v45, %v1018_v41 }
 0x176   :  { %vm410_vm4 = vcmp.eq.s32.totalorder %v4522_v32, %v4461_v57  ;;  %v3131_v20 = vsel %vm210_vm2, 1.0, %v4104_v2  ;;  %vm519_vm6 = vcmp.eq.s32.totalorder %v4513_v30, %v4480_v63  ;;  %v3170_v52 = vsel %vm409_vm3, 1.0, %v4104_v2  ;;  %v4904_v63 = vld [vmem:[%s6234_s20 + $0x40] sm:$0xff] }
 0x177   :  { %v803_v59 = vadd.f32 %v3234_v46, %v693_v51  ;;  %v804_v16 = vadd.f32 %v3235_v26, %v694_v55  ;;  %v4841_v29 = vpop.permute.xlu1 %1042  ;;  %v3309_v46 = vsel %vm1178_vm10, 1.0, %v4104_v2  ;;  %v1127_v26 = vadd.f32 %v3288_v37, %v1017_v3 }
 0x178   :  { %3765 = vset.pattern.permute.xlu1 %v6244_v33  ;;  %v1238_v27 = vadd.f32 %v3309_v46, %v1128_v15  ;;  %v3171_v57 = vsel %vm410_vm4, 1.0, %v4104_v2  ;;  %v3191_v46 = vsel %vm520_vm7, 1.0, %v4104_v2  ;;  %vm215_vm10 = vcmp.eq.s32.totalorder %v4513_v30, %v4452_v54 }
 0x179   :  { %1268 = vperm.xlu1 %3765, %v4352_v19   ;;  %v4847_v34 = vadd.f32 %v3254_v48, %v803_v59  ;;  %v4849_v38 = vadd.f32 %v3255_v4, %v804_v16  ;;  %v1237_v51 = vadd.f32 %v3308_v62, %v1127_v26  ;;  %v3348_v48 = vsel %vm1397_vm11, 1.0, %v4104_v2 }
 0x17a   :  { %v3349_v4 = vsel %vm1398_vm12, 1.0, %v4104_v2  ;;  %v3190_v62 = vsel %vm519_vm6, 1.0, %v4104_v2  ;;  %vm216_vm11 = vcmp.eq.s32.totalorder %v4522_v32, %v4452_v54  ;;  %vm305_vm12 = vcmp.eq.s32.totalorder %v4513_v30, %v4678_v1 }
 0x17b   :  { %v3136_v54 = vsel %vm215_vm10, 1.0, %v4104_v2  ;;  %vm739_vm2 = vcmp.eq.s32.totalorder %v4513_v30, %v4544_v42  ;;  %vm740_vm3 = vcmp.eq.s32.totalorder %v4522_v32, %v4544_v42  ;;  %vm855_vm4 = vcmp.eq.s32.totalorder %v4513_v30, %v4519_v10 }
 0x17c   :  { %v1260_v7 = vpop.permute.xlu1 %1259  ;;  %vm856_vm6 = vcmp.eq.s32.totalorder %v4522_v32, %v4519_v10  ;;  %vm746_vm10 = vcmp.eq.s32.totalorder %v4522_v32, %v4626_v61 }
 0x17d   :  { %vm1287_vm13 = vcmp.eq.s32.totalorder %v4513_v30, %v1260_v7  ;;  %vm1288_vm14 = vcmp.eq.s32.totalorder %v4522_v32, %v1260_v7  ;;  %3767 = vset.pattern.permute.xlu1 %v6235_v5  ;;  %v3211_v7 = vsel %vm630_vm9, 1.0, %v4104_v2  ;;  %vm745_vm9 = vcmp.eq.s32.totalorder %v4513_v30, %v4626_v61 }
 0x17e   :  { %v3328_v49 = vsel %vm1287_vm13, 1.0, %v4104_v2  ;;  %v3329_v55 = vsel %vm1288_vm14, 1.0, %v4104_v2  ;;  %727 = vperm.xlu1 %3767, %v4315_v14   ;;  %v3151_v14 = vsel %vm300_vm0, 1.0, %v4104_v2  ;;  %vm306_vm13 = vcmp.eq.s32.totalorder %v4522_v32, %v4678_v1 }
 0x17f   :  { %v1347_v11 = vadd.f32 %v3328_v49, %v1237_v51  ;;  %v1348_v40 = vadd.f32 %v3329_v55, %v1238_v27  ;;  %v360_v41 = vadd.f32 %v3151_v14, %v3131_v20  ;;  %v3137_v55 = vsel %vm216_vm11, 1.0, %v4104_v2 }
 0x180   :  { %vm849_vm14 = vcmp.eq.s32.totalorder %v4513_v30, %v4501_v25  ;;  %vm415_vm0 = vcmp.eq.s32.totalorder %v4513_v30, %v4787_v31  ;;  %v3230_v14 = vsel %vm739_vm2, 1.0, %v4104_v2  ;;  %vm959_vm11 = vcmp.eq.s32.totalorder %v4513_v30, %v4739_v0 }
 0x181   :  { %v1457_v59 = vadd.f32 %v3348_v48, %v1347_v11  ;;  %v1458_v16 = vadd.f32 %v3349_v4, %v1348_v40  ;;  %v4863_v37 = vpop.permute.xlu1 %284  ;;  %v470_v15 = vadd.f32 %v3171_v57, %v360_v41  ;;  %v4931_v48 = vld [vmem:[%s6234_s20 + $0x30] sm:$0xff]  ;;  %v3156_v11 = vsel %vm305_vm12, 1.0, %v4104_v2  ;;  %v3920_v57 = vld [vmem:[%s6234_s20 + $0x28] sm:$0xff] }
 0x182   :  { %3768 = vset.pattern.permute.xlu1 %v6239_v47  ;;  %v3157_v40 = vsel %vm306_vm13, 1.0, %v4104_v2  ;;  %v3250_v42 = vsel %vm849_vm14, 1.0, %v4104_v2  ;;  %v365_v20 = vadd.f32 %v3156_v11, %v3136_v54  ;;  %vm960_vm12 = vcmp.eq.s32.totalorder %v4522_v32, %v4739_v0 }
 0x183   :  { %944 = vperm.xlu1 %3768, %v4308_v13   ;;  %3367 = vmatprep.mubr.msk.f32.mxu0 %vm1495_vm5, %v1458_v16  ;;  %v3150_v13 = vsel %vm299_vm15, 1.0, %v4104_v2  ;;  %v580_v49 = vadd.f32 %v3191_v46, %v470_v15  ;;  %vm850_vm15 = vcmp.eq.s32.totalorder %v4522_v32, %v4501_v25  ;;  %v3176_v16 = vsel %vm415_vm0, 1.0, %v4104_v2 }
 0x184   :  { %1596 = vmatmul.mubr.f32.gmra.mxu0 %v1457_v59  ;;  %v359_v3 = vadd.f32 %v3150_v13, %v3130_v53  ;;  %v3251_v59 = vsel %vm850_vm15, 1.0, %v4104_v2  ;;  %v3177_v13 = vsel %vm416_vm1, 1.0, %v4104_v2  ;;  %v3231_v53 = vsel %vm740_vm3, 1.0, %v4104_v2 }
 0x185   :  { %v690_v4 = vadd.f32 %v3211_v7, %v580_v49  ;;  %v3256_v25 = vsel %vm855_vm4, 1.0, %v4104_v2  ;;  %v475_v46 = vadd.f32 %v3176_v16, %v365_v20  ;;  %v3236_v61 = vsel %vm745_vm9, 1.0, %v4104_v2  ;;  %v1373_v20 = vpop.permute.xlu0 %1372 }
 0x186   :  { %v4868_v45 = vpop.permute.xlu1 %501  ;;  %v469_v26 = vadd.f32 %v3170_v52, %v359_v3  ;;  %v366_v52 = vadd.f32 %v3157_v40, %v3137_v55  ;;  %v3257_v3 = vsel %vm856_vm6, 1.0, %v4104_v2  ;;  %v5004_v55 = vld [vmem:[%s6234_s20 + $0x38] sm:$0xff]  ;;  %vm1069_vm15 = vcmp.eq.s32.totalorder %v4513_v30, %v4841_v29 }
 0x187   :  { %3769 = vset.pattern.permute.xlu1 %v6238_v22  ;;  %vm525_vm7 = vcmp.eq.s32.totalorder %v4513_v30, %v4868_v45  ;;  %vm526_vm8 = vcmp.eq.s32.totalorder %v4522_v32, %v4868_v45  ;;  %v800_v15 = vadd.f32 %v3231_v53, %v690_v4  ;;  %vm1070_vm0 = vcmp.eq.s32.totalorder %v4522_v32, %v4841_v29 }
 0x188   :  { %1378 = vperm.xlu1 %3769, %v4352_v19   ;;  %v579_v27 = vadd.f32 %v3190_v62, %v469_v26  ;;  %v3196_v41 = vsel %vm525_vm7, 1.0, %v4104_v2  ;;  %v3197_v62 = vsel %vm526_vm8, 1.0, %v4104_v2  ;;  %v476_v26 = vadd.f32 %v3177_v13, %v366_v52 }
 0x189   :  { %v585_v7 = vadd.f32 %v3196_v41, %v475_v46  ;;  %v910_v40 = vadd.f32 %v3251_v59, %v800_v15  ;;  %v3270_v16 = vsel %vm959_vm11, 1.0, %v4104_v2  ;;  %v3271_v13 = vsel %vm960_vm12, 1.0, %v4104_v2 }
 0x18a   :  { %v689_v1 = vadd.f32 %v3210_v24, %v579_v27  ;;  %v586_v45 = vadd.f32 %v3197_v62, %v476_v26  ;;  %v3237_v27 = vsel %vm746_vm10, 1.0, %v4104_v2  ;;  %v3290_v59 = vsel %vm1069_vm15, 1.0, %v4104_v2 }
 0x18b   :  { %v4892_v19 = vpop.permute.xlu1 %935  ;;  %v3291_v53 = vsel %vm1070_vm0, 1.0, %v4104_v2  ;;  %v1020_v0 = vadd.f32 %v3271_v13, %v910_v40  ;;  %vm1399_vm3 = vcmp.eq.s32.totalorder %v4513_v30, %v1373_v20  ;;  %vm1400_vm4 = vcmp.eq.s32.totalorder %v4522_v32, %v1373_v20 }
 0x18c   :  { %3770 = vset.pattern.permute.xlu1 %v6242_v17  ;;  %v799_v10 = vadd.f32 %v3230_v14, %v689_v1  ;;  %vm217_vm8 = vcmp.eq.s32.totalorder %v4513_v30, %v4459_v56  ;;  %vm218_vm9 = vcmp.eq.s32.totalorder %v4522_v32, %v4459_v56  ;;  %vm307_vm10 = vcmp.eq.s32.totalorder %v4513_v30, %v4863_v37 }
 0x18d   :  { %620 = vperm.xlu1 %3770, %v4904_v63   ;;  %v1130_v26 = vadd.f32 %v3291_v53, %v1020_v0  ;;  %vm308_vm11 = vcmp.eq.s32.totalorder %v4522_v32, %v4863_v37  ;;  %v3139_v56 = vsel %vm218_vm9, 1.0, %v4104_v2  ;;  %v3158_v13 = vsel %vm307_vm10, 1.0, %v4104_v2 }
 0x18e   :  { %v909_v11 = vadd.f32 %v3250_v42, %v799_v10  ;;  %vm747_vm0 = vcmp.eq.s32.totalorder %v4513_v30, %v4652_v6 }
 0x190   :  { %v4915_v51 = vpop.permute.xlu1 %1152  ;;  %v1019_v52 = vadd.f32 %v3270_v16, %v909_v11  ;;  %v3138_v16 = vsel %vm217_vm8, 1.0, %v4104_v2 }
 0x191   :  { %3772 = vset.pattern.permute.xlu1 %v6243_v18  ;;  %vm1179_vm1 = vcmp.eq.s32.totalorder %v4513_v30, %v4915_v51  ;;  %vm1180_vm2 = vcmp.eq.s32.totalorder %v4522_v32, %v4915_v51 }
 0x192   :  { %1054 = vperm.xlu1 %3772, %v4931_v48   ;;  %v3310_v51 = vsel %vm1179_vm1, 1.0, %v4104_v2  ;;  %v3311_v62 = vsel %vm1180_vm2, 1.0, %v4104_v2  ;;  %v1129_v46 = vadd.f32 %v3290_v59, %v1019_v52  ;;  %vm748_vm1 = vcmp.eq.s32.totalorder %v4522_v32, %v4652_v6 }
 0x193   :  { %vm857_vm2 = vcmp.eq.s32.totalorder %v4513_v30, %v4536_v35  ;;  %v3238_v6 = vsel %vm747_vm0, 1.0, %v4104_v2 }
 0x194   :  { %v1239_v15 = vadd.f32 %v3310_v51, %v1129_v46 }
 0x195   :  { %v4952_v31 = vpop.permute.xlu1 %394 }
 0x196   :  { %3773 = vset.pattern.permute.xlu1 %v6244_v33  ;;  %vm417_vm12 = vcmp.eq.s32.totalorder %v4513_v30, %v4952_v31 }
 0x197   :  { %1271 = vperm.xlu1 %3773, %v3920_v57   ;;  %v3178_v37 = vsel %vm417_vm12, 1.0, %v4104_v2 }
 0x19a   :  { %v612_v24 = vpop.permute.xlu1 %611 }
 0x19b   :  { %vm635_vm13 = vcmp.eq.s32.totalorder %v4513_v30, %v612_v24  ;;  %vm636_vm14 = vcmp.eq.s32.totalorder %v4522_v32, %v612_v24  ;;  %3774 = vset.pattern.permute.xlu1 %v6239_v47  ;;  %v1240_v24 = vadd.f32 %v3311_v62, %v1130_v26  ;;  %v3239_v26 = vsel %vm748_vm1, 1.0, %v4104_v2 }
 0x19c   :  { %v3216_v49 = vsel %vm635_vm13, 1.0, %v4104_v2  ;;  %v3217_v54 = vsel %vm636_vm14, 1.0, %v4104_v2  ;;  %947 = vperm.xlu1 %3774, %v5004_v55   ;;  %vm418_vm13 = vcmp.eq.s32.totalorder %v4522_v32, %v4952_v31  ;;  %v367_v31 = vadd.f32 %v3158_v13, %v3138_v16 }
 0x19d   :  { %v695_v1 = vadd.f32 %v3216_v49, %v585_v7  ;;  %v696_v4 = vadd.f32 %v3217_v54, %v586_v45  ;;  %v3350_v7 = vsel %vm1399_vm3, 1.0, %v4104_v2  ;;  %v3351_v45 = vsel %vm1400_vm4, 1.0, %v4104_v2 }
 0x19e   :  { %v477_v52 = vadd.f32 %v3178_v37, %v367_v31  ;;  %vm858_vm3 = vcmp.eq.s32.totalorder %v4522_v32, %v4536_v35  ;;  %vm961_vm4 = vcmp.eq.s32.totalorder %v4513_v30, %v4892_v19 }
 0x19f   :  { %v805_v29 = vadd.f32 %v3236_v61, %v695_v1  ;;  %v806_v14 = vadd.f32 %v3237_v27, %v696_v4  ;;  %v5023_v42 = vpop.permute.xlu1 %1045 }
 0x1a0   :  { %3775 = vset.pattern.permute.xlu1 %v6240_v44  ;;  %vm1071_vm9 = vcmp.eq.s32.totalorder %v4513_v30, %v5023_v42  ;;  %vm1072_vm10 = vcmp.eq.s32.totalorder %v4522_v32, %v5023_v42 }
 0x1a1   :  { %1164 = vperm.xlu1 %3775, %v4931_v48   ;;  %v5029_v57 = vadd.f32 %v3256_v25, %v805_v29  ;;  %v5031_v41 = vadd.f32 %v3257_v3, %v806_v14  ;;  %v6245_v48 = vmov 6   ;;  %v3159_v29 = vsel %vm308_vm11, 1.0, %v4104_v2 }
 0x1a2   :  { %v3179_v14 = vsel %vm418_vm13, 1.0, %v4104_v2  ;;  %v368_v59 = vadd.f32 %v3159_v29, %v3139_v56 }
 0x1a4   :  { %v1263_v10 = vpop.permute.xlu1 %1262  ;;  %v478_v0 = vadd.f32 %v3179_v14, %v368_v59 }
 0x1a5   :  { %vm1289_vm6 = vcmp.eq.s32.totalorder %v4513_v30, %v1263_v10  ;;  %vm1290_vm7 = vcmp.eq.s32.totalorder %v4522_v32, %v1263_v10  ;;  %3776 = vset.pattern.permute.xlu1 %v6245_v48 }
 0x1a6   :  { %v3330_v25 = vsel %vm1289_vm6, 1.0, %v4104_v2  ;;  %v3331_v3 = vsel %vm1290_vm7, 1.0, %v4104_v2  ;;  %840 = vperm.xlu1 %3776, %v4904_v63   ;;  %vm962_vm6 = vcmp.eq.s32.totalorder %v4522_v32, %v4892_v19 }
 0x1a7   :  { %v1349_v61 = vadd.f32 %v3330_v25, %v1239_v15  ;;  %v1350_v27 = vadd.f32 %v3331_v3, %v1240_v24  ;;  %v3258_v3 = vsel %vm857_vm2, 1.0, %v4104_v2  ;;  %v3273_v42 = vsel %vm962_vm6, 1.0, %v4104_v2 }
 0x1a8   :  { %vm221_vm6 = vcmp.eq.s32.totalorder %v4513_v30, %v4470_v60 }
 0x1a9   :  { %v1459_v49 = vadd.f32 %v3350_v7, %v1349_v61  ;;  %v1460_v54 = vadd.f32 %v3351_v45, %v1350_v27  ;;  %v5045_v1 = vpop.permute.xlu1 %287  ;;  %v3259_v7 = vsel %vm858_vm3, 1.0, %v4104_v2  ;;  %v3292_v27 = vsel %vm1071_vm9, 1.0, %v4104_v2 }
 0x1aa   :  { %3777 = vset.pattern.permute.xlu1 %v6243_v18 }
 0x1ab   :  { %1057 = vperm.xlu1 %3777, %v5004_v55   ;;  %3368 = vmatprep.mubr.msk.f32.mxu0 %vm1495_vm5, %v1460_v54  ;;  %v1376_v54 = vpop.permute.xlu0 %1375 }
 0x1ac   :  { %1601 = vmatmul.mubr.f32.gmra.mxu0 %v1459_v49  ;;  %v3293_v49 = vsel %vm1072_vm10, 1.0, %v4104_v2  ;;  %vm1401_vm13 = vcmp.eq.s32.totalorder %v4513_v30, %v1376_v54 }
 0x1ae   :  { %v505_v4 = vpop.permute.xlu1 %504 }
 0x1af   :  { %3780 = vset.pattern.permute.xlu1 %v6239_v47  ;;  %vm527_vm14 = vcmp.eq.s32.totalorder %v4513_v30, %v505_v4  ;;  %vm528_vm15 = vcmp.eq.s32.totalorder %v4522_v32, %v505_v4  ;;  %v1022_v4 = vadd.f32 %v3273_v42, %v4656_v50  ;;  %v3142_v42 = vsel %vm221_vm6, 1.0, %v4104_v2 }
 0x1b0   :  { %950 = vperm.xlu1 %3780, %v4904_v63   ;;  %v3198_v53 = vsel %vm527_vm14, 1.0, %v4104_v2  ;;  %v3199_v20 = vsel %vm528_vm15, 1.0, %v4104_v2  ;;  %vm1402_vm14 = vcmp.eq.s32.totalorder %v4522_v32, %v1376_v54 }
 0x1b1   :  { %v587_v62 = vadd.f32 %v3198_v53, %v477_v52  ;;  %v588_v46 = vadd.f32 %v3199_v20, %v478_v0  ;;  %v1132_v37 = vadd.f32 %v3293_v49, %v1022_v4  ;;  %v3352_v53 = vsel %vm1401_vm13, 1.0, %v4104_v2 }
 0x1b2   :  { %v3353_v20 = vsel %vm1402_vm14, 1.0, %v4104_v2 }
 0x1b3   :  { %v5052_v11 = vpop.permute.xlu1 %938 }
 0x1b4   :  { %3781 = vset.pattern.permute.xlu1 %v6240_v44  ;;  %vm963_vm1 = vcmp.eq.s32.totalorder %v4513_v30, %v5052_v11  ;;  %vm964_vm2 = vcmp.eq.s32.totalorder %v4522_v32, %v5052_v11 }
 0x1b5   :  { %1167 = vperm.xlu1 %3781, %v5004_v55  }
 0x1b8   :  { %v5056_v40 = vpop.permute.xlu1 %1155 }
 0x1b9   :  { %3783 = vset.pattern.permute.xlu1 %v6243_v18  ;;  %vm1181_vm11 = vcmp.eq.s32.totalorder %v4513_v30, %v5056_v40  ;;  %vm1182_vm12 = vcmp.eq.s32.totalorder %v4522_v32, %v5056_v40 }
 0x1ba   :  { %1060 = vperm.xlu1 %3783, %v4904_v63   ;;  %v3312_v56 = vsel %vm1181_vm11, 1.0, %v4104_v2  ;;  %v3313_v13 = vsel %vm1182_vm12, 1.0, %v4104_v2 }
 0x1bb   :  { %v1242_v31 = vadd.f32 %v3313_v13, %v1132_v37 }
 0x1bd   :  { %v5078_v18 = vpop.permute.xlu1 %397 }
 0x1be   :  { %3784 = vset.pattern.permute.xlu1 %v6244_v33 }
 0x1bf   :  { %1277 = vperm.xlu1 %3784, %v5004_v55  }
 0x1c2   :  { %v615_v51 = vpop.permute.xlu1 %614 }
 0x1c3   :  { %vm637_vm7 = vcmp.eq.s32.totalorder %v4513_v30, %v615_v51  ;;  %vm638_vm8 = vcmp.eq.s32.totalorder %v4522_v32, %v615_v51  ;;  %3785 = vset.pattern.permute.xlu1 %v6238_v22 }
 0x1c4   :  { %v3218_v10 = vsel %vm637_vm7, 1.0, %v4104_v2  ;;  %v3219_v15 = vsel %vm638_vm8, 1.0, %v4104_v2  ;;  %1387 = vperm.xlu1 %3785, %v5004_v55   ;;  %v3272_v55 = vsel %vm961_vm4, 1.0, %v4104_v2  ;;  %vm222_vm7 = vcmp.eq.s32.totalorder %v4522_v32, %v4470_v60 }
 0x1c5   :  { %v697_v24 = vadd.f32 %v3218_v10, %v587_v62  ;;  %v698_v25 = vadd.f32 %v3219_v15, %v588_v46  ;;  %v1021_v19 = vadd.f32 %v3272_v55, %v4654_v23 }
 0x1c7   :  { %v807_v45 = vadd.f32 %v3238_v6, %v697_v24  ;;  %v808_v61 = vadd.f32 %v3239_v26, %v698_v25  ;;  %v5130_v35 = vpop.permute.xlu1 %1048  ;;  %v1131_v29 = vadd.f32 %v3292_v27, %v1021_v19  ;;  %v6246_v24 = vmov 0  }
 0x1c8   :  { %3786 = vset.pattern.permute.xlu1 %v6244_v33  ;;  %vm1073_vm3 = vcmp.eq.s32.totalorder %v4513_v30, %v5130_v35  ;;  %vm1074_vm4 = vcmp.eq.s32.totalorder %v4522_v32, %v5130_v35 }
 0x1c9   :  { %1280 = vperm.xlu1 %3786, %v4904_v63   ;;  %v5138_v16 = vadd.f32 %v3258_v3, %v807_v45  ;;  %v5140_v40 = vadd.f32 %v3259_v7, %v808_v61  ;;  %v1241_v23 = vadd.f32 %v3312_v56, %v1131_v29  ;;  %v3294_v11 = vsel %vm1073_vm3, 1.0, %v4104_v2  ;;  %v5204_v7 = vpop.permute.xlu0 %1381 }
 0x1ca   :  { %v3295_v3 = vsel %vm1074_vm4, 1.0, %v4104_v2  ;;  %v3143_v45 = vsel %vm222_vm7, 1.0, %v4104_v2  ;;  %vm751_vm7 = vcmp.eq.s32.totalorder %v4513_v30, %v4668_v36 }
 0x1cc   :  { %v1266_v14 = vpop.permute.xlu1 %1265 }
 0x1cd   :  { %vm1291_vm15 = vcmp.eq.s32.totalorder %v4513_v30, %v1266_v14  ;;  %vm1292_vm0 = vcmp.eq.s32.totalorder %v4522_v32, %v1266_v14  ;;  %3788 = vset.pattern.permute.xlu1 %v6236_v28 }
 0x1ce   :  { %v3332_v50 = vsel %vm1291_vm15, 1.0, %v4104_v2  ;;  %v3333_v59 = vsel %vm1292_vm0, 1.0, %v4104_v2  ;;  %293 = vperm.xlu1 %3788, %v4612_v39   ;;  %vm531_vm0 = vcmp.eq.s32.totalorder %v4513_v30, %v4490_v21 }
 0x1cf   :  { %v1351_v52 = vadd.f32 %v3332_v50, %v1241_v23  ;;  %v1352_v0 = vadd.f32 %v3333_v59, %v1242_v31  ;;  %v5230_v31 = vpop.permute.xlu0 %1384 }
 0x1d1   :  { %v1461_v51 = vadd.f32 %v3352_v53, %v1351_v52  ;;  %v1462_v62 = vadd.f32 %v3353_v20, %v1352_v0  ;;  %v291_v46 = vpop.permute.xlu1 %290 }
 0x1d2   :  { %3789 = vset.pattern.permute.xlu1 %v6238_v22  ;;  %vm311_vm8 = vcmp.eq.s32.totalorder %v4513_v30, %v291_v46  ;;  %vm312_vm9 = vcmp.eq.s32.totalorder %v4522_v32, %v291_v46 }
 0x1d3   :  { %1390 = vperm.xlu1 %3789, %v4904_v63   ;;  %3369 = vmatprep.mubr.msk.f32.mxu0 %vm1495_vm5, %v1462_v62  ;;  %v3162_v55 = vsel %vm311_vm8, 1.0, %v4104_v2  ;;  %v3202_v62 = vsel %vm531_vm0, 1.0, %v4104_v2  ;;  %vm752_vm8 = vcmp.eq.s32.totalorder %v4522_v32, %v4668_v36  ;;  %vm1406_vm0 = vcmp.eq.s32.totalorder %v4522_v32, %v5204_v7 }
 0x1d4   :  { %1606 = vmatmul.mubr.f32.gmra.mxu0 %v1461_v51  ;;  %v371_v4 = vadd.f32 %v3162_v55, %v3142_v42 }
 0x1d6   :  { %v5157_v6 = vpop.permute.xlu1 %507 }
 0x1d7   :  { %3791 = vset.pattern.permute.xlu1 %v6237_v8 }
 0x1d8   :  { %513 = vperm.xlu1 %3791, %v4612_v39  }
 0x1db   :  { %v5161_v26 = vpop.permute.xlu1 %941 }
 0x1dc   :  { %3792 = vset.pattern.permute.xlu1 %v6242_v17  ;;  %vm965_vm4 = vcmp.eq.s32.totalorder %v4513_v30, %v5161_v26  ;;  %vm966_vm6 = vcmp.eq.s32.totalorder %v4522_v32, %v5161_v26 }
 0x1dd   :  { %623 = vperm.xlu1 %3792, %v4612_v39   ;;  %v3276_v26 = vsel %vm965_vm4, 1.0, %v4104_v2 }
 0x1de   :  { %v1025_v42 = vadd.f32 %v3276_v26, %v5029_v57 }
 0x1e0   :  { %v1159_v10 = vpop.permute.xlu1 %1158 }
 0x1e1   :  { %3794 = vset.pattern.permute.xlu1 %v6245_v48  ;;  %vm1183_vm10 = vcmp.eq.s32.totalorder %v4513_v30, %v1159_v10  ;;  %vm1184_vm11 = vcmp.eq.s32.totalorder %v4522_v32, %v1159_v10 }
 0x1e2   :  { %843 = vperm.xlu1 %3794, %v4612_v39   ;;  %v3314_v61 = vsel %vm1183_vm10, 1.0, %v4104_v2  ;;  %v3315_v35 = vsel %vm1184_vm11, 1.0, %v4104_v2 }
 0x1e5   :  { %v401_v22 = vpop.permute.xlu1 %400 }
 0x1e6   :  { %3795 = vset.pattern.permute.xlu1 %v6239_v47  ;;  %v3274_v47 = vsel %vm963_vm1, 1.0, %v4104_v2  ;;  %vm421_vm12 = vcmp.eq.s32.totalorder %v4513_v30, %v401_v22  ;;  %vm422_vm13 = vcmp.eq.s32.totalorder %v4522_v32, %v401_v22  ;;  %vm532_vm1 = vcmp.eq.s32.totalorder %v4522_v32, %v4490_v21 }
 0x1e7   :  { %953 = vperm.xlu1 %3795, %v4612_v39   ;;  %v3182_v54 = vsel %vm421_vm12, 1.0, %v4104_v2  ;;  %v3183_v19 = vsel %vm422_vm13, 1.0, %v4104_v2  ;;  %v3203_v21 = vsel %vm532_vm1, 1.0, %v4104_v2 }
 0x1e8   :  { %v481_v60 = vadd.f32 %v3182_v54, %v371_v4 }
 0x1ea   :  { %v5169_v63 = vpop.permute.xlu1 %617  ;;  %v591_v10 = vadd.f32 %v3202_v62, %v481_v60 }
 0x1eb   :  { %3797 = vset.pattern.permute.xlu1 %v6240_v44  ;;  %v3275_v44 = vsel %vm964_vm2, 1.0, %v4104_v2 }
 0x1ec   :  { %1173 = vperm.xlu1 %3797, %v4612_v39  }
 0x1ef   :  { %v5173_v15 = vpop.permute.xlu1 %1051 }
 0x1f0   :  { %3798 = vset.pattern.permute.xlu1 %v6244_v33  ;;  %v1024_v33 = vadd.f32 %v3275_v44, %v4849_v38  ;;  %vm1076_vm10 = vcmp.eq.s32.totalorder %v4522_v32, %v5173_v15 }
 0x1f1   :  { %1283 = vperm.xlu1 %3798, %v4612_v39   ;;  %v1023_v39 = vadd.f32 %v3274_v47, %v4847_v34  ;;  %v3163_v34 = vsel %vm312_vm9, 1.0, %v4104_v2  ;;  %vm1075_vm9 = vcmp.eq.s32.totalorder %v4513_v30, %v5173_v15  ;;  %v3277_v47 = vsel %vm966_vm6, 1.0, %v4104_v2 }
 0x1f2   :  { %v1134_v49 = vadd.f32 %v3295_v3, %v1024_v33  ;;  %v372_v56 = vadd.f32 %v3163_v34, %v3143_v45  ;;  %v3242_v33 = vsel %vm751_vm7, 1.0, %v4104_v2  ;;  %v3243_v15 = vsel %vm752_vm8, 1.0, %v4104_v2 }
 0x1f3   :  { %v1133_v27 = vadd.f32 %v3294_v11, %v1023_v39  ;;  %v3296_v55 = vsel %vm1075_vm9, 1.0, %v4104_v2  ;;  %v3297_v34 = vsel %vm1076_vm10, 1.0, %v4104_v2  ;;  %v1026_v45 = vadd.f32 %v3277_v47, %v5031_v41 }
 0x1f4   :  { %v1269_v48 = vpop.permute.xlu1 %1268  ;;  %v1244_v14 = vadd.f32 %v3315_v35, %v1134_v49  ;;  %v482_v23 = vadd.f32 %v3183_v19, %v372_v56  ;;  %v1135_v36 = vadd.f32 %v3296_v55, %v1025_v42  ;;  %vm1297_vm8 = vcmp.eq.s32.totalorder %v4513_v30, %v4684_v12  ;;  %v1999_v55 = vld [vmem:[%s6190_s3 + $0x70] sm:$0xff] }
 0x1f5   :  { %3900 = vset.pattern.permute.xlu1 %v6246_v24  ;;  %vm1293_vm14 = vcmp.eq.s32.totalorder %v4513_v30, %v1269_v48  ;;  %vm1294_vm15 = vcmp.eq.s32.totalorder %v4522_v32, %v1269_v48  ;;  %v1243_v37 = vadd.f32 %v3314_v61, %v1133_v27  ;;  %v1162_v48 = vpop.permute.xlu0 %1161  ;;  %v1136_v49 = vadd.f32 %v3297_v34, %v1026_v45  ;;  %v2014_v34 = vld [vmem:[%s6190_s3 + $0xe8] sm:$0xff] }
 0x1f6   :  { %v3334_v13 = vsel %vm1293_vm14, 1.0, %v4104_v2  ;;  %v3335_v29 = vsel %vm1294_vm15, 1.0, %v4104_v2  ;;  %v592_v22 = vadd.f32 %v3203_v21, %v482_v23  ;;  %vm1185_vm13 = vcmp.eq.s32.totalorder %v4513_v30, %v1162_v48  ;;  %v1998_v45 = vld [vmem:[%s6190_s3 + $0x68] sm:$0xff] }
 0x1f7   :  { %v1353_v59 = vadd.f32 %v3334_v13, %v1243_v37  ;;  %v1354_v53 = vadd.f32 %v3335_v29, %v1244_v14  ;;  %vm1186_vm14 = vcmp.eq.s32.totalorder %v4522_v32, %v1162_v48  ;;  %v3316_v54 = vsel %vm1185_vm13, 1.0, %v4104_v2 }
 0x1f8   :  { %v3317_v19 = vsel %vm1186_vm14, 1.0, %v4104_v2  ;;  %vm1405_vm15 = vcmp.eq.s32.totalorder %v4513_v30, %v5204_v7  ;;  %v1245_v4 = vadd.f32 %v3316_v54, %v1135_v36  ;;  %v3357_v13 = vsel %vm1406_vm0, 1.0, %v4104_v2  ;;  %v2013_v36 = vld [vmem:[%s6190_s3 + $0xe0] sm:$0xff] }
 0x1f9   :  { %v5184_v25 = vpop.permute.xlu1 %727  ;;  %v1246_v41 = vadd.f32 %v3317_v19, %v1136_v49  ;;  %v3356_v56 = vsel %vm1405_vm15, 1.0, %v4104_v2  ;;  %vm1298_vm9 = vcmp.eq.s32.totalorder %v4522_v32, %v4684_v12  ;;  %vm1408_vm13 = vcmp.eq.s32.totalorder %v4522_v32, %v5230_v31  ;;  %v1997_v54 = vld [vmem:[%s6190_s3 + $0x60] sm:$0xff] }
 0x1fa   :  { %v3338_v12 = vsel %vm1297_vm8, 1.0, %v4104_v2  ;;  %vm219_vm14 = vcmp.eq.s32.totalorder %v4513_v30, %v4465_v58  ;;  %vm220_vm15 = vcmp.eq.s32.totalorder %v4522_v32, %v4465_v58  ;;  %vm309_vm0 = vcmp.eq.s32.totalorder %v4513_v30, %v5045_v1  ;;  %v2011_v58 = vld [vmem:[%s6190_s3 + $0xd0] sm:$0xff] }
 0x1fb   :  { %v3140_v19 = vsel %vm219_vm14, 1.0, %v4104_v2  ;;  %vm640_vm8 = vcmp.eq.s32.totalorder %v4522_v32, %v5169_v63 }
 0x1fe   :  { %v5210_v38 = vpop.permute.xlu1 %944 }
 0x1ff   :  { %vm968_vm4 = vcmp.eq.s32.totalorder %v4522_v32, %v5210_v38 }
 0x203   :  { %v1379_v50 = vpop.permute.xlu1 %1378 }
 0x204   :  { %vm1403_vm2 = vcmp.eq.s32.totalorder %v4513_v30, %v1379_v50  ;;  %vm1404_vm3 = vcmp.eq.s32.totalorder %v4522_v32, %v1379_v50 }
 0x205   :  { %v3354_v20 = vsel %vm1403_vm2, 1.0, %v4104_v2  ;;  %v3355_v52 = vsel %vm1404_vm3, 1.0, %v4104_v2  ;;  %vm967_vm3 = vcmp.eq.s32.totalorder %v4513_v30, %v5210_v38 }
 0x206   :  { %v1463_v0 = vadd.f32 %v3354_v20, %v1353_v59  ;;  %v1464_v51 = vadd.f32 %v3355_v52, %v1354_v53  ;;  %v3278_v59 = vsel %vm967_vm3, 1.0, %v4104_v2  ;;  %v3279_v53 = vsel %vm968_vm4, 1.0, %v4104_v2 }
 0x207   :  { %v1027_v52 = vadd.f32 %v3278_v59, %v5138_v16  ;;  %vm420_vm3 = vcmp.eq.s32.totalorder %v4522_v32, %v5078_v18  ;;  %vm529_vm4 = vcmp.eq.s32.totalorder %v4513_v30, %v5157_v6  ;;  %v1994_v59 = vld [vmem:[%s6190_s3 + $0x48] sm:$0xff] }
 0x208   :  { %v621_v46 = vpop.permute.xlu1 %620  ;;  %3370 = vmatprep.mubr.msk.f32.mxu0 %vm1495_vm5, %v1464_v51 }
 0x209   :  { %vm641_vm11 = vcmp.eq.s32.totalorder %v4513_v30, %v621_v46  ;;  %vm642_vm12 = vcmp.eq.s32.totalorder %v4522_v32, %v621_v46  ;;  %1611 = vmatmul.mubr.f32.gmra.mxu0 %v1463_v0  ;;  %v1028_v0 = vadd.f32 %v3279_v53, %v5140_v40 }
 0x20a   :  { %v3222_v44 = vsel %vm641_vm11, 1.0, %v4104_v2  ;;  %v3223_v39 = vsel %vm642_vm12, 1.0, %v4104_v2  ;;  %vm1407_vm12 = vcmp.eq.s32.totalorder %v4513_v30, %v5230_v31  ;;  %v2000_v31 = vld [vmem:[%s6190_s3 + $0x78] sm:$0xff] }
 0x20b   :  { %v701_v11 = vadd.f32 %v3222_v44, %v591_v10  ;;  %v702_v3 = vadd.f32 %v3223_v39, %v592_v22  ;;  %v3339_v22 = vsel %vm1298_vm9, 1.0, %v4104_v2  ;;  %v3358_v44 = vsel %vm1407_vm12, 1.0, %v4104_v2 }
 0x20c   :  { %v3359_v39 = vsel %vm1408_vm13, 1.0, %v4104_v2  ;;  %vm749_vm9 = vcmp.eq.s32.totalorder %v4513_v30, %v5184_v25  ;;  %vm860_vm12 = vcmp.eq.s32.totalorder %v4522_v32, %v4551_v43 }
 0x20d   :  { %v1055_v61 = vpop.permute.xlu1 %1054  ;;  %v5271_v35 = vadd.f32 %v3242_v33, %v701_v11  ;;  %v5273_v27 = vadd.f32 %v3243_v15, %v702_v3  ;;  %v2016_v33 = vld [vmem:[%s6190_s3 + $0xf8] sm:$0xff]  ;;  %v2015_v15 = vld [vmem:[%s6190_s3 + $0xf0] sm:$0xff] }
 0x20e   :  { %vm1077_vm6 = vcmp.eq.s32.totalorder %v4513_v30, %v1055_v61  ;;  %vm1078_vm7 = vcmp.eq.s32.totalorder %v4522_v32, %v1055_v61  ;;  %3410 = vmatprep.subr.mxu1 %v2016_v33  ;;  %v2006_v33 = vld [vmem:[%s6190_s3 + $0xa8] sm:$0xff] }
 0x20f   :  { %v3298_v20 = vsel %vm1077_vm6, 1.0, %v4104_v2  ;;  %v3299_v38 = vsel %vm1078_vm7, 1.0, %v4104_v2  ;;  %3411 = vmatpush3.msra.mxu1 %v2000_v31  ;;  %vm530_vm6 = vcmp.eq.s32.totalorder %v4522_v32, %v5157_v6  ;;  %vm639_vm7 = vcmp.eq.s32.totalorder %v4513_v30, %v5169_v63  ;;  %v2010_v6 = vld [vmem:[%s6190_s3 + $0xc8] sm:$0xff]  ;;  %v2009_v63 = vld [vmem:[%s6190_s3 + $0xc0] sm:$0xff] }
 0x210   :  { %v1137_v62 = vadd.f32 %v3298_v20, %v1027_v52  ;;  %v1138_v21 = vadd.f32 %v3299_v38, %v1028_v0  ;;  %3412 = vmatprep.subr.mxu1 %v2015_v15  ;;  %v3220_v38 = vsel %vm639_vm7, 1.0, %v4104_v2  ;;  %v3221_v52 = vsel %vm640_vm8, 1.0, %v4104_v2  ;;  %v1993_v0 = vld [vmem:[%s6190_s3 + $0x40] sm:$0xff]  ;;  %v1990_v15 = vld [vmem:[%s6190_s3 + $0x28] sm:$0xff] }
 0x211   :  { %3413 = vmatpush3.msra.mxu1 %v1999_v55 }
 0x212   :  { %v1272_v57 = vpop.permute.xlu1 %1271  ;;  %3414 = vmatprep.subr.mxu1 %v2014_v34 }
 0x213   :  { %vm1295_vm1 = vcmp.eq.s32.totalorder %v4513_v30, %v1272_v57  ;;  %vm1296_vm2 = vcmp.eq.s32.totalorder %v4522_v32, %v1272_v57  ;;  %3415 = vmatpush3.msra.mxu1 %v1998_v45  ;;  %v3141_v57 = vsel %vm220_vm15, 1.0, %v4104_v2 }
 0x214   :  { %v3336_v29 = vsel %vm1295_vm1, 1.0, %v4104_v2  ;;  %v3337_v37 = vsel %vm1296_vm2, 1.0, %v4104_v2  ;;  %vm310_vm1 = vcmp.eq.s32.totalorder %v4522_v32, %v5045_v1  ;;  %vm419_vm2 = vcmp.eq.s32.totalorder %v4513_v30, %v5078_v18  ;;  %v2012_v1 = vld [vmem:[%s6190_s3 + $0xd8] sm:$0xff]  ;;  %3416 = vmatprep.subr.mxu1 %v2013_v36 }
 0x215   :  { %v1355_v7 = vadd.f32 %v3336_v29, %v1245_v4  ;;  %v1356_v14 = vadd.f32 %v3337_v37, %v1246_v41  ;;  %v3160_v4 = vsel %vm309_vm0, 1.0, %v4104_v2  ;;  %v3161_v41 = vsel %vm310_vm1, 1.0, %v4104_v2  ;;  %v1996_v18 = vld [vmem:[%s6190_s3 + $0x58] sm:$0xff]  ;;  %3417 = vmatpush3.msra.mxu1 %v1997_v54  ;;  %v1995_v37 = vld [vmem:[%s6190_s3 + $0x50] sm:$0xff] }
 0x216   :  { %3418 = vmatprep.subr.mxu1 %v2012_v1 }
 0x217   :  { %v1466_v60 = vadd.f32 %v3357_v13, %v1356_v14  ;;  %v5293_v23 = vpop.permute.xlu1 %947  ;;  %v1465_v50 = vadd.f32 %v3356_v56, %v1355_v7  ;;  %v3180_v56 = vsel %vm419_vm2, 1.0, %v4104_v2  ;;  %v3181_v13 = vsel %vm420_vm3, 1.0, %v4104_v2  ;;  %3419 = vmatpush3.msra.mxu1 %v1996_v18 }
 0x218   :  { %v369_v7 = vadd.f32 %v3160_v4, %v3140_v19  ;;  %v370_v14 = vadd.f32 %v3161_v41, %v3141_v57  ;;  %3420 = vmatprep.subr.mxu1 %v2011_v58  ;;  %vm969_vm13 = vcmp.eq.s32.totalorder %v4513_v30, %v5293_v23  ;;  %vm970_vm14 = vcmp.eq.s32.totalorder %v4522_v32, %v5293_v23  ;;  %v2005_v23 = vld [vmem:[%s6190_s3 + $0xa0] sm:$0xff] }
 0x219   :  { %3371 = vmatprep.mubr.msk.f32.mxu0 %vm1495_vm5, %v1466_v60  ;;  %v3200_v60 = vsel %vm529_vm4, 1.0, %v4104_v2  ;;  %3421 = vmatpush3.msra.mxu1 %v1995_v37  ;;  %v3280_v55 = vsel %vm969_vm13, 1.0, %v4104_v2  ;;  %v3281_v34 = vsel %vm970_vm14, 1.0, %v4104_v2 }
 0x21a   :  { %1616 = vmatmul.mubr.f32.gmra.mxu0 %v1465_v50  ;;  %v3201_v50 = vsel %vm530_vm6, 1.0, %v4104_v2  ;;  %v479_v53 = vadd.f32 %v3180_v56, %v369_v7  ;;  %v480_v20 = vadd.f32 %v3181_v13, %v370_v14  ;;  %3422 = vmatprep.subr.mxu1 %v2010_v6  ;;  %v1989_v7 = vld [vmem:[%s6190_s3 + $0x20] sm:$0xff]  ;;  %v1988_v14 = vld [vmem:[%s6190_s3 + $0x18] sm:$0xff] }
 0x21b   :  { %3423 = vmatpush3.msra.mxu1 %v1994_v59  ;;  %v2003_v59 = vld [vmem:[%s6190_s3 + $0x90] sm:$0xff] }
 0x21c   :  { %v1165_v51 = vpop.permute.xlu1 %1164  ;;  %3424 = vmatprep.subr.mxu1 %v2009_v63 }
 0x21d   :  { %vm1187_vm10 = vcmp.eq.s32.totalorder %v4513_v30, %v1165_v51  ;;  %vm1188_vm11 = vcmp.eq.s32.totalorder %v4522_v32, %v1165_v51  ;;  %v589_v51 = vadd.f32 %v3200_v60, %v479_v53  ;;  %3425 = vmatpush3.msra.mxu1 %v1993_v0 }
 0x21e   :  { %v3318_v46 = vsel %vm1187_vm10, 1.0, %v4104_v2  ;;  %v3319_v10 = vsel %vm1188_vm11, 1.0, %v4104_v2  ;;  %vm750_vm10 = vcmp.eq.s32.totalorder %v4522_v32, %v5184_v25  ;;  %v2008_v25 = vld [vmem:[%s6190_s3 + $0xb8] sm:$0xff]  ;;  %vm859_vm11 = vcmp.eq.s32.totalorder %v4513_v30, %v4551_v43 }
 0x21f   :  { %v1247_v16 = vadd.f32 %v3318_v46, %v1137_v62  ;;  %v1248_v40 = vadd.f32 %v3319_v10, %v1138_v21  ;;  %v590_v62 = vadd.f32 %v3201_v50, %v480_v20  ;;  %v3240_v46 = vsel %vm749_vm9, 1.0, %v4104_v2  ;;  %3426 = vmatprep.subr.mxu1 %v2008_v25  ;;  %v2002_v25 = vld [vmem:[%s6190_s3 + $0x88] sm:$0xff] }
 0x220   :  { %v3241_v10 = vsel %vm750_vm10, 1.0, %v4104_v2  ;;  %vm1734_vm9 = vcmask 1044480   ;;  %vm1886_vm10 = vcmask 1040384  }
 0x221   :  { %v1357_v48 = vadd.f32 %v3338_v12, %v1247_v16  ;;  %v1358_v26 = vadd.f32 %v3339_v22, %v1248_v40  ;;  %v5316_v47 = vpop.permute.xlu1 %840  ;;  %v1992_v16 = vld [vmem:[%s6190_s3 + $0x38] sm:$0xff]  ;;  %v699_v40 = vadd.f32 %v3220_v38, %v589_v51  ;;  %v700_v12 = vadd.f32 %v3221_v52, %v590_v62  ;;  %v2007_v22 = vld [vmem:[%s6190_s3 + $0xb0] sm:$0xff] }
 0x222   :  { %3427 = vmatpush3.msra.mxu1 %v1992_v16  ;;  %vm861_vm7 = vcmp.eq.s32.totalorder %v4513_v30, %v5316_v47  ;;  %vm862_vm8 = vcmp.eq.s32.totalorder %v4522_v32, %v5316_v47  ;;  %v2004_v47 = vld [vmem:[%s6190_s3 + $0x98] sm:$0xff] }
 0x223   :  { %v1468_v11 = vadd.f32 %v3359_v39, %v1358_v26  ;;  %v1467_v3 = vadd.f32 %v3358_v44, %v1357_v48  ;;  %v1991_v48 = vld [vmem:[%s6190_s3 + $0x30] sm:$0xff]  ;;  %v809_v26 = vadd.f32 %v3240_v46, %v699_v40  ;;  %v810_v44 = vadd.f32 %v3241_v10, %v700_v12  ;;  %v5434_v39 = vpop.permute.xlu0 %1170  ;;  %3428 = vmatprep.subr.mxu1 %v2007_v22  ;;  %v1986_v46 = vld [vmem:[%s6190_s3 + $0x8] sm:$0xff]  ;;  %v2001_v12 = vld [vmem:[%s6190_s3 + $0x80] sm:$0xff] }
 0x224   :  { %3429 = vmatpush3.msra.mxu1 %v1991_v48  ;;  %vm1191_vm1 = vcmp.eq.s32.totalorder %v4513_v30, %v5434_v39  ;;  %v3262_v6 = vsel %vm861_vm7, 1.0, %v4104_v2  ;;  %v3263_v60 = vsel %vm862_vm8, 1.0, %v4104_v2 }
 0x225   :  { %v5337_v42 = vpop.f32.mrf.mxu0  ;;  %3372 = vmatprep.mubr.msk.f32.mxu0 %vm1495_vm5, %v1468_v11  ;;  %v3260_v11 = vsel %vm859_vm11, 1.0, %v4104_v2  ;;  %3430 = vmatprep.subr.mxu1 %v2006_v33  ;;  %v5465_v1 = vsel %vm1191_vm1, 1.0, %v4104_v2  ;;  %vm1650_vm11 = vcmask 1046528   ;;  %v921_v10 = vadd.f32 %v3262_v6, %v5271_v35  ;;  %v1985_v33 = vld [vmem:[%s6190_s3] sm:$0xff] }
 0x226   :  { %v5349_v61 = vpop.permute.xlu1 %1057  ;;  %1621 = vmatmul.mubr.f32.gmra.mxu0 %v1467_v3  ;;  %v3261_v3 = vsel %vm860_vm12, 1.0, %v4104_v2  ;;  %v919_v45 = vadd.f32 %v3260_v11, %v809_v26  ;;  %3431 = vmatpush3.msra.mxu1 %v1990_v15  ;;  %vm1802_vm12 = vcmask 1042432   ;;  %v1735_v16 = vrot.slane %v5337_v42, 3 }
 0x227   :  { %v1594_v49 = vpop.f32.mrf.mxu0  ;;  %vm1079_vm15 = vcmp.eq.s32.totalorder %v4513_v30, %v5349_v61  ;;  %vm1080_vm0 = vcmp.eq.s32.totalorder %v4522_v32, %v5349_v61  ;;  %v920_v61 = vadd.f32 %v3261_v3, %v810_v44  ;;  %3432 = vmatprep.subr.mxu1 %v2005_v23  ;;  %v1887_v40 = vrot.slane %v5337_v42, 7 }
 0x228   :  { %v3300_v36 = vsel %vm1079_vm15, 1.0, %v4104_v2  ;;  %v3301_v43 = vsel %vm1080_vm0, 1.0, %v4104_v2  ;;  %v1029_v49 = vadd.f32 %v3280_v55, %v919_v45  ;;  %vm1192_vm15 = vcmp.eq.s32.totalorder %v4522_v32, %v5434_v39  ;;  %3433 = vmatpush3.msra.mxu1 %v1989_v7 }
 0x229   :  { %v1030_v54 = vadd.f32 %v3281_v34, %v920_v61  ;;  %vm1692_vm0 = vcmask 1045504   ;;  %3434 = vmatprep.subr.mxu1 %v2004_v47  ;;  %v1651_v26 = vrot.slane %v5337_v42, 1  ;;  %v1803_v44 = vrot.slane %v5337_v42, 5 }
 0x22a   :  { %v1139_v41 = vadd.f32 %v3300_v36, %v1029_v49  ;;  %3435 = vmatpush3.msra.mxu1 %v1988_v14  ;;  %v1693_v45 = vrot.slane %v5337_v42, 2  ;;  %v1845_v61 = vrot.slane %v5337_v42, 6 }
 0x22b   :  { %v5383_v29 = vpop.permute.xlu1 %950  ;;  %v1140_v18 = vadd.f32 %v3301_v43, %v1030_v54  ;;  %3436 = vmatprep.subr.mxu1 %v2003_v59 }
 0x22c   :  { %vm971_vm13 = vcmp.eq.s32.totalorder %v4513_v30, %v5383_v29  ;;  %vm972_vm14 = vcmp.eq.s32.totalorder %v4522_v32, %v5383_v29  ;;  %v922_v29 = vadd.f32 %v3263_v60, %v5273_v27 }
 0x22d   :  { %v3282_v52 = vsel %vm971_vm13, 1.0, %v4104_v2  ;;  %v3283_v0 = vsel %vm972_vm14, 1.0, %v4104_v2 }
 0x22e   :  { %v1031_v15 = vadd.f32 %v3282_v52, %v921_v10  ;;  %v1032_v11 = vadd.f32 %v3283_v0, %v922_v29 }
 0x230   :  { %v1168_v21 = vpop.permute.xlu1 %1167 }
 0x231   :  { %vm1189_vm2 = vcmp.eq.s32.totalorder %v4513_v30, %v1168_v21  ;;  %vm1190_vm3 = vcmp.eq.s32.totalorder %v4522_v32, %v1168_v21  ;;  %v1987_v21 = vld [vmem:[%s6190_s3 + $0x10] sm:$0xff] }
 0x232   :  { %v3320_v57 = vsel %vm1189_vm2, 1.0, %v4104_v2  ;;  %v3321_v4 = vsel %vm1190_vm3, 1.0, %v4104_v2  ;;  %vm1844_vm3 = vcmask 1041408   ;;  %3437 = vmatpush3.msra.mxu1 %v1987_v21 }
 0x233   :  { %v1249_v13 = vadd.f32 %v3320_v57, %v1139_v41  ;;  %v1250_v37 = vadd.f32 %v3321_v4, %v1140_v18  ;;  %3438 = vmatprep.subr.mxu1 %v2002_v25 }
 0x234   :  { %3439 = vmatpush3.msra.mxu1 %v1986_v46 }
 0x235   :  { %v5439_v31 = vpop.permute.xlu1 %1060  ;;  %3440 = vmatprep.subr.mxu1 %v2001_v12 }
 0x236   :  { %3441 = vmatpush3.msra.mxu1 %v1985_v33 }
 0x23a   :  { %v1278_v19 = vpop.permute.xlu1 %1277 }
 0x23b   :  { %vm1299_vm4 = vcmp.eq.s32.totalorder %v4513_v30, %v1278_v19  ;;  %vm1300_vm6 = vcmp.eq.s32.totalorder %v4522_v32, %v1278_v19  ;;  %v204_v19 = vpop.permute.xlu0 %203 }
 0x23c   :  { %v3340_v58 = vsel %vm1299_vm4, 1.0, %v4104_v2  ;;  %v3341_v56 = vsel %vm1300_vm6, 1.0, %v4104_v2  ;;  %vm1081_vm4 = vcmp.eq.s32.totalorder %v4513_v30, %v5439_v31  ;;  %vm1082_vm6 = vcmp.eq.s32.totalorder %v4522_v32, %v5439_v31 }
 0x23d   :  { %v1359_v53 = vadd.f32 %v3340_v58, %v1249_v13  ;;  %v1360_v20 = vadd.f32 %v3341_v56, %v1250_v37  ;;  %v3302_v22 = vsel %vm1081_vm4, 1.0, %v4104_v2  ;;  %v3303_v35 = vsel %vm1082_vm6, 1.0, %v4104_v2 }
 0x23e   :  { %v1141_v36 = vadd.f32 %v3302_v22, %v1031_v15  ;;  %v1142_v43 = vadd.f32 %v3303_v35, %v1032_v11  ;;  %v3323_v37 = vsel %vm1192_vm15, 1.0, %v4104_v2  ;;  %vm223_vm13 = vcmp.eq.s32.totalorder %v4513_v30, %v204_v19 }
 0x23f   :  { %v1388_v50 = vpop.permute.xlu1 %1387  ;;  %vm224_vm14 = vcmp.eq.s32.totalorder %v4522_v32, %v204_v19  ;;  %v3144_v59 = vsel %vm223_vm13, 1.0, %v4104_v2 }
 0x240   :  { %vm1409_vm1 = vcmp.eq.s32.totalorder %v4513_v30, %v1388_v50  ;;  %vm1410_vm2 = vcmp.eq.s32.totalorder %v4522_v32, %v1388_v50  ;;  %v1251_v39 = vadd.f32 %v5465_v1, %v1141_v36  ;;  %v1252_v60 = vadd.f32 %v3323_v37, %v1142_v43 }
 0x241   :  { %v3360_v63 = vsel %vm1409_vm1, 1.0, %v4104_v2  ;;  %v3361_v38 = vsel %vm1410_vm2, 1.0, %v4104_v2 }
 0x242   :  { %v1469_v51 = vadd.f32 %v3360_v63, %v1359_v53  ;;  %v1470_v62 = vadd.f32 %v3361_v38, %v1360_v20  ;;  %v3145_v53 = vsel %vm224_vm14, 1.0, %v4104_v2  ;;  %v404_v20 = vpop.permute.xlu0 %403 }
 0x243   :  { %vm423_vm6 = vcmp.eq.s32.totalorder %v4513_v30, %v404_v20 }
 0x244   :  { %v1281_v27 = vpop.permute.xlu1 %1280  ;;  %v5537_v48 = vpop.f32.mrf.mxu0  ;;  %3373 = vmatprep.mubr.msk.f32.mxu0 %vm1495_vm5, %v1470_v62 }
 0x245   :  { %1626 = vmatmul.mubr.f32.gmra.mxu0 %v1469_v51  ;;  %v1736_v31 = vrot.slane %v5537_v48, 3  ;;  %v1888_v23 = vrot.slane %v5537_v48, 7  ;;  %v1652_v55 = vrot.slane %v5537_v48, 1  ;;  %v1804_v34 = vrot.slane %v5537_v48, 5 }
 0x246   :  { %v1599_v3 = vpop.f32.mrf.mxu0  ;;  %v1694_v18 = vrot.slane %v5537_v48, 2  ;;  %vm1301_vm7 = vcmp.eq.s32.totalorder %v4513_v30, %v1281_v27  ;;  %vm1302_vm8 = vcmp.eq.s32.totalorder %v4522_v32, %v1281_v27  ;;  %v1846_v13 = vrot.slane %v5537_v48, 6  ;;  %v734_v12 = vpop.permute.xlu0 %733 }
 0x247   :  { %v1737_v49 = vsel %vm1734_vm9, %v1735_v16, %v1736_v31  ;;  %v1889_v54 = vsel %vm1886_vm10, %v1887_v40, %v1888_v23  ;;  %v1653_v4 = vsel %vm1650_vm11, %v1651_v26, %v1652_v55  ;;  %v1805_v41 = vsel %vm1802_vm12, %v1803_v44, %v1804_v34 }
 0x248   :  { %v3810_v57 = vpack.i.bf16 %v1737_v49, %v1889_v54  ;;  %v3800_v56 = vpack.i.bf16 %v1653_v4, %v1805_v41  ;;  %v1695_v7 = vsel %vm1692_vm0, %v1693_v45, %v1694_v18  ;;  %v1847_v47 = vsel %vm1844_vm3, %v1845_v61, %v1846_v13 }
 0x249   :  { %v294_v58 = vpop.permute.xlu1 %293  ;;  %v3342_v14 = vsel %vm1301_vm7, 1.0, %v4104_v2  ;;  %v3343_v6 = vsel %vm1302_vm8, 1.0, %v4104_v2  ;;  %v3805_v50 = vpack.i.bf16 %v1695_v7, %v1847_v47  ;;  %vm424_vm7 = vcmp.eq.s32.totalorder %v4522_v32, %v404_v20 }
 0x24a   :  { %3811 = vrot.lane.b32.xlu0 %v3810_v57, %s4115_s15  ;;  %3801 = vrot.lane.b32.xlu1 %v3800_v56, %s4116_s21  ;;  %vm313_vm15 = vcmp.eq.s32.totalorder %v4513_v30, %v294_v58  ;;  %vm314_vm1 = vcmp.eq.s32.totalorder %v4522_v32, %v294_v58  ;;  %v1361_v38 = vadd.f32 %v3342_v14, %v1251_v39  ;;  %v3184_v16 = vsel %vm423_vm6, 1.0, %v4104_v2  ;;  %v1064_v57 = vpop.permute.xlu0 %1063 }
 0x24b   :  { %v1362_v52 = vadd.f32 %v3343_v6, %v1252_v60  ;;  %v3164_v1 = vsel %vm313_vm15, 1.0, %v4104_v2  ;;  %v3165_v0 = vsel %vm314_vm1, 1.0, %v4104_v2  ;;  %v3185_v40 = vsel %vm424_vm7, 1.0, %v4104_v2 }
 0x24c   :  { %v373_v46 = vadd.f32 %v3164_v1, %v3144_v59  ;;  %v374_v10 = vadd.f32 %v3165_v0, %v3145_v53  ;;  %vm753_vm14 = vcmp.eq.s32.totalorder %v4513_v30, %v734_v12  ;;  %vm754_vm15 = vcmp.eq.s32.totalorder %v4522_v32, %v734_v12 }
 0x24d   :  { %v3244_v36 = vsel %vm753_vm14, 1.0, %v4104_v2  ;;  %v3245_v43 = vsel %vm754_vm15, 1.0, %v4104_v2  ;;  %vm1083_vm7 = vcmp.eq.s32.totalorder %v4513_v30, %v1064_v57 }
 0x24e   :  { %v1391_v63 = vpop.permute.xlu1 %1390  ;;  %3806 = vrot.lane.b32.xlu1 %v3805_v50, %s4117_s30  ;;  %v483_v27 = vadd.f32 %v3184_v16, %v373_v46  ;;  %v484_v26 = vadd.f32 %v3185_v40, %v374_v10  ;;  %v3304_v6 = vsel %vm1083_vm7, 1.0, %v4104_v2  ;;  %v1394_v50 = vpop.permute.xlu0 %1393 }
 0x24f   :  { %vm1411_vm2 = vcmp.eq.s32.totalorder %v4513_v30, %v1391_v63  ;;  %vm1412_vm4 = vcmp.eq.s32.totalorder %v4522_v32, %v1391_v63 }
 0x250   :  { %v3362_v51 = vsel %vm1411_vm2, 1.0, %v4104_v2  ;;  %v3363_v62 = vsel %vm1412_vm4, 1.0, %v4104_v2 }
 0x251   :  { %v1471_v21 = vadd.f32 %v3362_v51, %v1361_v38  ;;  %v1472_v25 = vadd.f32 %v3363_v62, %v1362_v52 }
 0x253   :  { %v514_v29 = vpop.permute.xlu1 %513  ;;  %3374 = vmatprep.mubr.msk.f32.mxu0 %vm1495_vm5, %v1472_v25 }
 0x254   :  { %vm533_vm8 = vcmp.eq.s32.totalorder %v4513_v30, %v514_v29  ;;  %vm534_vm13 = vcmp.eq.s32.totalorder %v4522_v32, %v514_v29  ;;  %1631 = vmatmul.mubr.f32.gmra.mxu0 %v1471_v21 }
 0x255   :  { %v3204_v22 = vsel %vm533_vm8, 1.0, %v4104_v2  ;;  %v3205_v35 = vsel %vm534_vm13, 1.0, %v4104_v2  ;;  %vm1084_vm8 = vcmp.eq.s32.totalorder %v4522_v32, %v1064_v57 }
 0x256   :  { %v593_v33 = vadd.f32 %v3204_v22, %v483_v27  ;;  %v594_v15 = vadd.f32 %v3205_v35, %v484_v26  ;;  %v3305_v60 = vsel %vm1084_vm8, 1.0, %v4104_v2  ;;  %vm1776_vm8 = vcmask 1043456  }
 0x258   :  { %v624_v44 = vpop.permute.xlu1 %623 }
 0x259   :  { %vm643_vm1 = vcmp.eq.s32.totalorder %v4513_v30, %v624_v44  ;;  %vm644_vm2 = vcmp.eq.s32.totalorder %v4522_v32, %v624_v44 }
 0x25a   :  { %v3224_v11 = vsel %vm643_vm1, 1.0, %v4104_v2  ;;  %v3225_v3 = vsel %vm644_vm2, 1.0, %v4104_v2  ;;  %vm1413_vm2 = vcmp.eq.s32.totalorder %v4513_v30, %v1394_v50 }
 0x25b   :  { %v703_v45 = vadd.f32 %v3224_v11, %v593_v33  ;;  %v704_v61 = vadd.f32 %v3225_v3, %v594_v15  ;;  %v3364_v62 = vsel %vm1413_vm2, 1.0, %v4104_v2 }
 0x25d   :  { %v844_v49 = vpop.permute.xlu1 %843  ;;  %v813_v54 = vadd.f32 %v3244_v36, %v703_v45  ;;  %v814_v19 = vadd.f32 %v3245_v43, %v704_v61 }
 0x25e   :  { %vm863_vm4 = vcmp.eq.s32.totalorder %v4513_v30, %v844_v49  ;;  %vm864_vm6 = vcmp.eq.s32.totalorder %v4522_v32, %v844_v49 }
 0x25f   :  { %v3264_v4 = vsel %vm863_vm4, 1.0, %v4104_v2  ;;  %v3265_v41 = vsel %vm864_vm6, 1.0, %v4104_v2  ;;  %vm1414_vm4 = vcmp.eq.s32.totalorder %v4522_v32, %v1394_v50 }
 0x260   :  { %v923_v56 = vadd.f32 %v3264_v4, %v813_v54  ;;  %v924_v37 = vadd.f32 %v3265_v41, %v814_v19  ;;  %v3365_v21 = vsel %vm1414_vm4, 1.0, %v4104_v2 }
 0x262   :  { %v954_v58 = vpop.permute.xlu1 %953 }
 0x263   :  { %vm973_vm13 = vcmp.eq.s32.totalorder %v4513_v30, %v954_v58  ;;  %vm974_vm14 = vcmp.eq.s32.totalorder %v4522_v32, %v954_v58 }
 0x264   :  { %v3284_v7 = vsel %vm973_vm13, 1.0, %v4104_v2  ;;  %v3285_v47 = vsel %vm974_vm14, 1.0, %v4104_v2  ;;  %vm1942_vm13 = vcmask 523264   ;;  %vm1951_vm14 = vcmask 785408  }
 0x265   :  { %v1033_v39 = vadd.f32 %v3284_v7, %v923_v56  ;;  %v1034_v14 = vadd.f32 %v3285_v47, %v924_v37 }
 0x267   :  { %v1174_v59 = vpop.permute.xlu1 %1173  ;;  %v1143_v53 = vadd.f32 %v3304_v6, %v1033_v39  ;;  %v1144_v20 = vadd.f32 %v3305_v60, %v1034_v14  ;;  %v1778_v6 = vrot.slane %v5537_v48, 4 }
 0x268   :  { %vm1193_vm15 = vcmp.eq.s32.totalorder %v4513_v30, %v1174_v59  ;;  %vm1194_vm1 = vcmp.eq.s32.totalorder %v4522_v32, %v1174_v59 }
 0x269   :  { %v3324_v63 = vsel %vm1193_vm15, 1.0, %v4104_v2  ;;  %v3325_v38 = vsel %vm1194_vm1, 1.0, %v4104_v2 }
 0x26a   :  { %v1253_v52 = vadd.f32 %v3324_v63, %v1143_v53  ;;  %v1254_v1 = vadd.f32 %v3325_v38, %v1144_v20  ;;  %v1777_v53 = vrot.slane %v5337_v42, 4 }
 0x26c   :  { %v1284_v0 = vpop.permute.xlu1 %1283  ;;  %v5630_v51 = vpop.f32.mrf.mxu0 }
 0x26d   :  { %vm1303_vm6 = vcmp.eq.s32.totalorder %v4513_v30, %v1284_v0  ;;  %vm1304_vm7 = vcmp.eq.s32.totalorder %v4522_v32, %v1284_v0  ;;  %v1654_v25 = vrot.slane %v5630_v51, 1  ;;  %v1696_v46 = vrot.slane %v5630_v51, 2 }
 0x26e   :  { %v3344_v10 = vsel %vm1303_vm6, 1.0, %v4104_v2  ;;  %v3345_v29 = vsel %vm1304_vm7, 1.0, %v4104_v2  ;;  %v1604_v16 = vpop.f32.mrf.mxu0  ;;  %v1848_v40 = vrot.slane %v5630_v51, 6  ;;  %v1738_v12 = vrot.slane %v5630_v51, 3 }
 0x26f   :  { %v1363_v22 = vadd.f32 %v3344_v10, %v1253_v52  ;;  %v1364_v35 = vadd.f32 %v3345_v29, %v1254_v1  ;;  %v1655_v27 = vsel %vm1650_vm11, %v1652_v55, %v1654_v25  ;;  %v1697_v26 = vsel %vm1692_vm0, %v1694_v18, %v1696_v46 }
 0x270   :  { %1670 = vrot.lane.b32.xlu0 %v1655_v27, %s4116_s21  ;;  %v1849_v44 = vsel %vm1844_vm3, %v1846_v13, %v1848_v40  ;;  %v1739_v33 = vsel %vm1734_vm9, %v1736_v31, %v1738_v12  ;;  %v1890_v15 = vrot.slane %v5630_v51, 7  ;;  %v1806_v13 = vrot.slane %v5630_v51, 5 }
 0x271   :  { %v1473_v11 = vadd.f32 %v3364_v62, %v1363_v22  ;;  %v1474_v3 = vadd.f32 %v3365_v21, %v1364_v35  ;;  %v3815_v45 = vpack.i.bf16 %v1697_v26, %v1849_v44  ;;  %v1779_v52 = vsel %vm1776_vm8, %v1777_v53, %v1778_v6 }
 0x272   :  { %v1891_v55 = vsel %vm1886_vm10, %v1888_v23, %v1890_v15  ;;  %v1807_v23 = vsel %vm1802_vm12, %v1804_v34, %v1806_v13 }
 0x273   :  { %3816 = vrot.lane.b32.xlu1 %v3815_v45, %s4117_s30  ;;  %3375 = vmatprep.mubr.msk.f32.mxu0 %vm1495_vm5, %v1474_v3  ;;  %v3820_v18 = vpack.i.bf16 %v1739_v33, %v1891_v55 }
 0x274   :  { %1636 = vmatmul.mubr.f32.gmra.mxu0 %v1473_v11 }
 0x275   :  { %3821 = vrot.lane.b32.xlu0 %v3820_v18, %s4115_s15 }
 0x294   :  { %v5663_v31 = vpop.f32.mrf.mxu0 }
 0x295   :  { %v1808_v61 = vrot.slane %v5663_v31, 5  ;;  %v1698_v36 = vrot.slane %v5663_v31, 2  ;;  %v1850_v43 = vrot.slane %v5663_v31, 6  ;;  %v1656_v58 = vrot.slane %v5663_v31, 1 }
 0x296   :  { %v1609_v49 = vpop.f32.mrf.mxu0  ;;  %v1740_v56 = vrot.slane %v5663_v31, 3  ;;  %v1892_v37 = vrot.slane %v5663_v31, 7 }
 0x297   :  { %v1809_v54 = vsel %vm1802_vm12, %v1806_v13, %v1808_v61  ;;  %v1699_v19 = vsel %vm1692_vm0, %v1696_v46, %v1698_v36  ;;  %v1851_v57 = vsel %vm1844_vm3, %v1848_v40, %v1850_v43  ;;  %v1657_v34 = vsel %vm1650_vm11, %v1654_v25, %v1656_v58 }
 0x298   :  { %v3825_v4 = vpack.i.bf16 %v1809_v54, %v1807_v23  ;;  %v3830_v41 = vpack.i.bf16 %v1699_v19, %v1851_v57  ;;  %v1741_v7 = vsel %vm1734_vm9, %v1738_v12, %v1740_v56  ;;  %v1893_v47 = vsel %vm1886_vm10, %v1890_v15, %v1892_v37 }
 0x299   :  { %v3835_v39 = vpack.i.bf16 %v1741_v7, %v1893_v47 }
 0x29a   :  { %3826 = vrot.lane.b32.xlu1 %v3825_v4, %s4116_s21  ;;  %3831 = vrot.lane.b32.xlu0 %v3830_v41, %s4117_s30 }
 0x29e   :  { %1672 = vrot.lane.b32.xlu1 %v1657_v34, %s4116_s21 }
 0x2a2   :  { %3836 = vrot.lane.b32.xlu1 %v3835_v39, %s4115_s15 }
 0x2bc   :  { %v3802_v14 = vpop.permute.xlu1 %3801  ;;  %v3812_v59 = vpop.permute.xlu0 %3811 }
 0x2bd   :  { %v3804_v60 = vunpack.i.h.bf16 %v3802_v14  ;;  %v3803_v50 = vunpack.i.l.bf16 %v3802_v14  ;;  %v3814_v1 = vunpack.i.h.bf16 %v3812_v59  ;;  %v3813_v0 = vunpack.i.l.bf16 %v3812_v59 }
 0x2bf   :  { %v1960_v62 = vsel %vm1495_vm5, %v1779_v52, %v3803_v50  ;;  %v1934_v21 = vsel %vm1495_vm5, %v5337_v42, %v3804_v60 }
 0x2c0   :  { %v3807_v20 = vpop.permute.xlu1 %3806 }
 0x2c1   :  { %v3809_v63 = vunpack.i.h.bf16 %v3807_v20  ;;  %v3808_v38 = vunpack.i.l.bf16 %v3807_v20 }
 0x2c3   :  { %v1968_v25 = vsel %vm1942_vm13, %v1960_v62, %v3808_v38  ;;  %v1943_v46 = vsel %vm1942_vm13, %v1934_v21, %v3809_v63 }
 0x2c4   :  { %v1976_v10 = vsel %vm1951_vm14, %v1968_v25, %v3813_v0  ;;  %v1952_v29 = vsel %vm1951_vm14, %v1943_v46, %v3814_v1  ;;  %v2024_v25 = vld [vmem:[%s6190_s3 + $0x138] sm:$0xff] }
 0x2c5   :  { %2120 = vmatprep.mubr.f32.mxu1 %v1976_v10  ;;  %3536 = vmatprep.subr.mxu1 %v2024_v25  ;;  %v2023_v10 = vld [vmem:[%s6190_s3 + $0x130] sm:$0xff] }
 0x2c6   :  { %2121 = vmatmul.mubr.f32.vlgmr.msra.gmra.mxu1 %v1952_v29 }
 0x2c7   :  { %3537 = vmatpush3.msra.mxu1 %v2024_v25 }
 0x2c8   :  { %3538 = vmatprep.subr.mxu1 %v2023_v10 }
 0x2c9   :  { %v5698_v16 = vpop.f32.mrf.mxu0  ;;  %3539 = vmatpush3.msra.mxu1 %v2023_v10 }
 0x2ca   :  { %v1658_v40 = vrot.slane %v5698_v16, 1  ;;  %v1700_v12 = vrot.slane %v5698_v16, 2  ;;  %v1852_v22 = vrot.slane %v5698_v16, 6  ;;  %v1742_v42 = vrot.slane %v5698_v16, 3 }
 0x2cb   :  { %v1614_v35 = vpop.f32.mrf.mxu0  ;;  %v1894_v27 = vrot.slane %v5698_v16, 7  ;;  %v1810_v55 = vrot.slane %v5698_v16, 5 }
 0x2cc   :  { %v1659_v26 = vsel %vm1650_vm11, %v1656_v58, %v1658_v40  ;;  %v1701_v44 = vsel %vm1692_vm0, %v1698_v36, %v1700_v12  ;;  %v1853_v33 = vsel %vm1844_vm3, %v1850_v43, %v1852_v22  ;;  %v1743_v15 = vsel %vm1734_vm9, %v1740_v56, %v1742_v42 }
 0x2cd   :  { %1674 = vrot.lane.b32.xlu1 %v1659_v26, %s4116_s21  ;;  %v3840_v11 = vpack.i.bf16 %v1701_v44, %v1853_v33  ;;  %v1895_v3 = vsel %vm1886_vm10, %v1892_v37, %v1894_v27  ;;  %v1811_v23 = vsel %vm1802_vm12, %v1808_v61, %v1810_v55  ;;  %v2022_v26 = vld [vmem:[%s6190_s3 + $0x128] sm:$0xff] }
 0x2ce   :  { %v3845_v45 = vpack.i.bf16 %v1743_v15, %v1895_v3  ;;  %3540 = vmatprep.subr.mxu1 %v2022_v26 }
 0x2cf   :  { %3841 = vrot.lane.b32.xlu0 %v3840_v11, %s4117_s30  ;;  %3541 = vmatpush3.msra.mxu1 %v2022_v26 }
 0x2d1   :  { %3846 = vrot.lane.b32.xlu1 %v3845_v45, %s4115_s15 }
 0x2da   :  { %v5714_v18 = vpop.f32.mrf.mxu0 }
 0x2db   :  { %v1812_v13 = vrot.slane %v5714_v18, 5  ;;  %v1702_v36 = vrot.slane %v5714_v18, 2  ;;  %v1854_v43 = vrot.slane %v5714_v18, 6  ;;  %v1660_v58 = vrot.slane %v5714_v18, 1 }
 0x2dc   :  { %v1619_v49 = vpop.f32.mrf.mxu0  ;;  %v1744_v56 = vrot.slane %v5714_v18, 3  ;;  %v1896_v37 = vrot.slane %v5714_v18, 7 }
 0x2dd   :  { %v1813_v54 = vsel %vm1802_vm12, %v1810_v55, %v1812_v13  ;;  %v1703_v19 = vsel %vm1692_vm0, %v1700_v12, %v1702_v36  ;;  %v1855_v57 = vsel %vm1844_vm3, %v1852_v22, %v1854_v43  ;;  %v1661_v61 = vsel %vm1650_vm11, %v1658_v40, %v1660_v58 }
 0x2de   :  { %v3850_v4 = vpack.i.bf16 %v1813_v54, %v1811_v23  ;;  %v3855_v41 = vpack.i.bf16 %v1703_v19, %v1855_v57  ;;  %v1745_v34 = vsel %vm1734_vm9, %v1742_v42, %v1744_v56  ;;  %v1897_v7 = vsel %vm1886_vm10, %v1894_v27, %v1896_v37  ;;  %v2021_v54 = vld [vmem:[%s6190_s3 + $0x120] sm:$0xff] }
 0x2df   :  { %v3860_v39 = vpack.i.bf16 %v1745_v34, %v1897_v7  ;;  %v1780_v27 = vrot.slane %v5630_v51, 4  ;;  %3542 = vmatprep.subr.mxu1 %v2021_v54 }
 0x2e0   :  { %3851 = vrot.lane.b32.xlu0 %v3850_v4, %s4116_s21  ;;  %3856 = vrot.lane.b32.xlu1 %v3855_v41, %s4117_s30  ;;  %v1782_v4 = vrot.slane %v5663_v31, 4 }
 0x2e1   :  { %v1781_v57 = vsel %vm1776_vm8, %v1778_v6, %v1780_v27  ;;  %3543 = vmatpush3.msra.mxu1 %v2021_v54 }
 0x2e2   :  { %v1671_v46 = vpop.permute.xlu0 %1670 }
 0x2e3   :  { %v5790_v41 = vsel %vm1495_vm5, %v5537_v48, %v1671_v46 }
 0x2e4   :  { %1676 = vrot.lane.b32.xlu0 %v1661_v61, %s4116_s21 }
 0x2e5   :  { %v3817_v44 = vpop.permute.xlu1 %3816 }
 0x2e6   :  { %v5734_v47 = vpop.f32.mrf.mxu0  ;;  %v3819_v23 = vunpack.i.h.bf16 %v3817_v44 }
 0x2e7   :  { %v1704_v14 = vrot.slane %v5734_v47, 2  ;;  %v1856_v60 = vrot.slane %v5734_v47, 6  ;;  %v1662_v50 = vrot.slane %v5734_v47, 1  ;;  %v1746_v59 = vrot.slane %v5734_v47, 3  ;;  %v3822_v45 = vpop.permute.xlu0 %3821 }
 0x2e8   :  { %3861 = vrot.lane.b32.xlu0 %v3860_v39, %s4115_s15  ;;  %v1624_v53 = vpop.f32.mrf.mxu0  ;;  %v1898_v20 = vrot.slane %v5734_v47, 7  ;;  %v1814_v29 = vrot.slane %v5734_v47, 5  ;;  %v3824_v34 = vunpack.i.h.bf16 %v3822_v45  ;;  %v3823_v48 = vunpack.i.l.bf16 %v3822_v45 }
 0x2e9   :  { %v1705_v63 = vsel %vm1692_vm0, %v1702_v36, %v1704_v14  ;;  %v1857_v38 = vsel %vm1844_vm3, %v1854_v43, %v1856_v60  ;;  %v1663_v1 = vsel %vm1650_vm11, %v1660_v58, %v1662_v50  ;;  %v1747_v0 = vsel %vm1734_vm9, %v1744_v56, %v1746_v59 }
 0x2ea   :  { %v3865_v52 = vpack.i.bf16 %v1705_v63, %v1857_v38  ;;  %v1899_v62 = vsel %vm1886_vm10, %v1896_v37, %v1898_v20  ;;  %v1815_v33 = vsel %vm1802_vm12, %v1812_v13, %v1814_v29  ;;  %v3818_v58 = vunpack.i.l.bf16 %v3817_v44 }
 0x2eb   :  { %v3870_v21 = vpack.i.bf16 %v1747_v0, %v1899_v62  ;;  %v1783_v38 = vsel %vm1776_vm8, %v1780_v27, %v1782_v4 }
 0x2ec   :  { %3866 = vrot.lane.b32.xlu1 %v3865_v52, %s4117_s30  ;;  %1678 = vrot.lane.b32.xlu0 %v1663_v1, %s4116_s21 }
 0x2f0   :  { %3871 = vrot.lane.b32.xlu0 %v3870_v21, %s4115_s15 }
 0x305   :  { %v5757_v40 = vpop.f32.mrf.mxu0 }
 0x306   :  { %v1816_v12 = vrot.slane %v5757_v40, 5  ;;  %v1706_v22 = vrot.slane %v5757_v40, 2  ;;  %v1858_v42 = vrot.slane %v5757_v40, 6  ;;  %v1664_v43 = vrot.slane %v5757_v40, 1 }
 0x307   :  { %v1629_v35 = vpop.f32.mrf.mxu0  ;;  %v1748_v13 = vrot.slane %v5757_v40, 3  ;;  %v1900_v49 = vrot.slane %v5757_v40, 7 }
 0x308   :  { %v1817_v15 = vsel %vm1802_vm12, %v1814_v29, %v1816_v12  ;;  %v1707_v11 = vsel %vm1692_vm0, %v1704_v14, %v1706_v22  ;;  %v1859_v3 = vsel %vm1844_vm3, %v1856_v60, %v1858_v42  ;;  %v1665_v7 = vsel %vm1650_vm11, %v1662_v50, %v1664_v43  ;;  %v2020_v50 = vld [vmem:[%s6190_s3 + $0x118] sm:$0xff]  ;;  %v2018_v35 = vld [vmem:[%s6190_s3 + $0x108] sm:$0xff] }
 0x309   :  { %v3875_v55 = vpack.i.bf16 %v1817_v15, %v1815_v33  ;;  %v3880_v36 = vpack.i.bf16 %v1707_v11, %v1859_v3  ;;  %v1749_v6 = vsel %vm1734_vm9, %v1746_v59, %v1748_v13  ;;  %v1901_v39 = vsel %vm1886_vm10, %v1898_v20, %v1900_v49  ;;  %v2019_v59 = vld [vmem:[%s6190_s3 + $0x110] sm:$0xff]  ;;  %3544 = vmatprep.subr.mxu1 %v2020_v50  ;;  %v2017_v15 = vld [vmem:[%s6190_s3 + $0x100] sm:$0xff] }
 0x30a   :  { %v1944_v60 = vsel %vm1942_vm13, %v5790_v41, %v3819_v23  ;;  %v3885_v0 = vpack.i.bf16 %v1749_v6, %v1901_v39  ;;  %3545 = vmatpush3.msra.mxu1 %v2020_v50 }
 0x30b   :  { %3876 = vrot.lane.b32.xlu1 %v3875_v55, %s4116_s21  ;;  %3881 = vrot.lane.b32.xlu0 %v3880_v36, %s4117_s30  ;;  %v1953_v25 = vsel %vm1951_vm14, %v1944_v60, %v3824_v34  ;;  %v2505_v34 = vld [vmem:[#allocation6 + $0x60] sm:$0xff]  ;;  %v1784_v60 = vrot.slane %v5698_v16, 4 }
 0x30c   :  { %v3827_v19 = vpop.permute.xlu1 %3826  ;;  %v3832_v61 = vpop.permute.xlu0 %3831  ;;  %3546 = vmatprep.subr.mxu1 %v2019_v59 }
 0x30d   :  { %v3829_v56 = vunpack.i.h.bf16 %v3827_v19  ;;  %v3828_v37 = vunpack.i.l.bf16 %v3827_v19  ;;  %v3833_v53 = vunpack.i.l.bf16 %v3832_v61  ;;  %v3834_v21 = vunpack.i.h.bf16 %v3832_v61  ;;  %3547 = vmatpush3.msra.mxu1 %v2019_v59 }
 0x30e   :  { %3548 = vmatprep.subr.mxu1 %v2018_v35 }
 0x30f   :  { %1680 = vrot.lane.b32.xlu1 %v1665_v7, %s4116_s21  ;;  %v1961_v14 = vsel %vm1495_vm5, %v1781_v57, %v3828_v37  ;;  %v1962_v62 = vsel %vm1495_vm5, %v1783_v38, %v3829_v56  ;;  %3549 = vmatpush3.msra.mxu1 %v2018_v35  ;;  %v2593_v7 = vld [vmem:[%s6196_s9] sm:$0xf]  ;;  %v2502_v35 = vld [vmem:[#allocation6 + $0x48] sm:$0xff] }
 0x310   :  { %v1673_v63 = vpop.permute.xlu1 %1672  ;;  %v1969_v20 = vsel %vm1942_vm13, %v1961_v14, %v3818_v58  ;;  %3550 = vmatprep.subr.mxu1 %v2017_v15  ;;  %v2504_v38 = vld [vmem:[#allocation6 + $0x58] sm:$0xff] }
 0x311   :  { %v5817_v52 = vsel %vm1495_vm5, %v5630_v51, %v1673_v63  ;;  %v1977_v1 = vsel %vm1951_vm14, %v1969_v20, %v3823_v48  ;;  %v1970_v51 = vsel %vm1942_vm13, %v1962_v62, %v3833_v53  ;;  %3551 = vmatpush3.msra.mxu1 %v2017_v15  ;;  %v1785_v20 = vsel %vm1776_vm8, %v1782_v4, %v1784_v60 }
 0x312   :  { %2125 = vmatprep.mubr.f32.mxu1 %v1977_v1  ;;  %v1945_v29 = vsel %vm1942_vm13, %v5817_v52, %v3834_v21  ;;  %3564 = vmatprep.subr.mxu1 %v4104_v2 }
 0x313   :  { %3886 = vrot.lane.b32.xlu1 %v3885_v0, %s4115_s15  ;;  %2126 = vmatmul.mubr.f32.gmra.mxu1 %v1953_v25 }
 0x314   :  { %v3837_v46 = vpop.permute.xlu1 %3836  ;;  %v5823_v10 = vpop.f32.mrf.mxu0 }
 0x315   :  { %v3839_v27 = vunpack.i.h.bf16 %v3837_v46  ;;  %v3838_v26 = vunpack.i.l.bf16 %v3837_v46  ;;  %v1818_v44 = vrot.slane %v5823_v10, 5  ;;  %v1666_v33 = vrot.slane %v5823_v10, 1 }
 0x316   :  { %v1634_v11 = vpop.f32.mrf.mxu0  ;;  %v1708_v3 = vrot.slane %v5823_v10, 2  ;;  %v1860_v45 = vrot.slane %v5823_v10, 6  ;;  %v1750_v55 = vrot.slane %v5823_v10, 3  ;;  %v1902_v36 = vrot.slane %v5823_v10, 7 }
 0x317   :  { %v1819_v23 = vsel %vm1802_vm12, %v1816_v12, %v1818_v44  ;;  %v1667_v54 = vsel %vm1650_vm11, %v1664_v43, %v1666_v33  ;;  %v1978_v19 = vsel %vm1951_vm14, %v1970_v51, %v3838_v26  ;;  %v1954_v57 = vsel %vm1951_vm14, %v1945_v29, %v3839_v27  ;;  %v2266_v29 = vld [vmem:[%s6247_s14] sm:$0xff] }
 0x318   :  { %1834 = vrot.lane.b32.xlu0 %v1819_v23, %s4116_s21  ;;  %1682 = vrot.lane.b32.xlu1 %v1667_v54, %s4116_s21  ;;  %v1709_v58 = vsel %vm1692_vm0, %v1706_v22, %v1708_v3  ;;  %v1861_v12 = vsel %vm1844_vm3, %v1858_v42, %v1860_v45  ;;  %v1751_v43 = vsel %vm1734_vm9, %v1748_v13, %v1750_v55  ;;  %v2428_v22 = vld [vmem:[%s6194_s7] sm:$0xf]  ;;  %v2507_v13 = vld [vmem:[#allocation6 + $0x70] sm:$0xff]  ;;  %vm4118_vm9 = vmmov 0  }
 0x319   :  { %2130 = vmatprep.mubr.f32.mxu1 %v1978_v19  ;;  %v1903_v56 = vsel %vm1886_vm10, %v1900_v49, %v1902_v36  ;;  %v3890_v37 = vpack.i.bf16 %v1709_v58, %v1861_v12  ;;  %v2508_v42 = vld [vmem:[#allocation6 + $0x78] sm:$0xff]  ;;  %v2506_v49 = vld [vmem:[#allocation6 + $0x68] sm:$0xff]  ;;  %v2501_v55 = vld [vmem:[#allocation6 + $0x40] sm:$0xff] }
 0x31a   :  { %2131 = vmatmul.mubr.f32.gmra.mxu1 %v1954_v57  ;;  %v3895_v61 = vpack.i.bf16 %v1751_v43, %v1903_v56  ;;  %2524 = vmatpush1.msra.mxu0 %v2508_v42  ;;  %v2268_v36 = vld [vmem:[%s6247_s14 + $0x10] sm:$0xff]  ;;  %v2500_v12 = vld [vmem:[#allocation6 + $0x38] sm:$0xff]  ;;  %v2271_v42 = vld [vmem:[%s6247_s14 + $0x28] sm:$0xff] }
 0x31b   :  { %2525 = vmatprep.subr.mxu0 %v4104_v2  ;;  %v2499_v43 = vld [vmem:[#allocation6 + $0x30] sm:$0xff] }
 0x31c   :  { %3891 = vrot.lane.b32.xlu0 %v3890_v37, %s4117_s30  ;;  %3896 = vrot.lane.b32.xlu1 %v3895_v61, %s4115_s15  ;;  %v2269_v56 = vld [vmem:[%s6247_s14 + $0x18] sm:$0xff]  ;;  %v2267_v37 = vld [vmem:[%s6247_s14 + $0x8] sm:$0xff] }
 0x31d   :  { %2526 = vmatpush1.msra.mxu0 %v2507_v13  ;;  %v2498_v61 = vld [vmem:[#allocation6 + $0x28] sm:$0xff]  ;;  %v2270_v13 = vld [vmem:[%s6247_s14 + $0x20] sm:$0xff] }
 0x31e   :  { %2527 = vmatprep.subr.mxu0 %v4104_v2 }
 0x31f   :  { %2528 = vmatpush1.msra.mxu0 %v2506_v49  ;;  %v2496_v49 = vld [vmem:[#allocation6 + $0x18] sm:$0xff] }
 0x320   :  { %2430 = vperm.xlu1 %3900, %v2428_v22   ;;  %2529 = vmatprep.subr.mxu0 %v4104_v2 }
 0x321   :  { %2530 = vmatpush1.msra.mxu0 %v2505_v34  ;;  %v2495_v34 = vld [vmem:[#allocation6 + $0x10] sm:$0xff] }
 0x322   :  { %2531 = vmatprep.subr.mxu0 %v4104_v2 }
 0x323   :  { %2532 = vmatpush1.msra.mxu0 %v2504_v38 }
 0x324   :  { %3902 = vset.pattern.permute.xlu1 %v6241_v9  ;;  %2533 = vmatprep.subr.mxu0 %v4104_v2 }
 0x325   :  { %2450 = vperm.xlu1 %3902, %v2428_v22  }
 0x329   :  { %3903 = vset.pattern.permute.xlu1 %v6237_v8 }
 0x32a   :  { %2461 = vperm.xlu1 %3903, %v2428_v22  }
 0x32e   :  { %3905 = vset.pattern.permute.xlu1 %v6235_v5 }
 0x32f   :  { %2483 = vperm.xlu1 %3905, %v2428_v22  }
 0x333   :  { %3906 = vset.pattern.permute.xlu1 %v6246_v24 }
 0x334   :  { %v1637_v8 = vpop.f32.mrf.mxu0  ;;  %2595 = vperm.xlu1 %3906, %v2593_v7  }
 0x335   :  { %v1929_v5 = vrot.slane %v1637_v8, 1  ;;  %v2272_v8 = vld [vmem:[%s6247_s14 + $0x30] sm:$0xff] }
 0x336   :  { %v1639_v6 = vpop.f32.mrf.mxu0 }
 0x337   :  { %v1930_v39 = vsel %vm1650_vm11, %v1666_v33, %v1929_v5  ;;  %v2494_v5 = vld [vmem:[#allocation6 + $0x8] sm:$0xff]  ;;  %v2493_v6 = vld [vmem:[#allocation6] sm:$0xff] }
 0x338   :  { %1931 = vrot.lane.b32.xlu0 %v1930_v39, %s4116_s21  ;;  %3908 = vset.pattern.permute.xlu1 %v6241_v9  ;;  %v2515_v39 = vld [vmem:[#allocation6 + $0xb0] sm:$0xf] }
 0x339   :  { %2608 = vperm.xlu1 %3908, %v2593_v7  }
 0x33c   :  { %2439 = vperm.xlu0 %3901, %v2428_v22  }
 0x33d   :  { %3909 = vset.pattern.permute.xlu1 %v6246_v24 }
 0x33e   :  { %2276 = vperm.xlu1 %3909, %v2266_v29  }
 0x33f   :  { %v1675_v48 = vpop.permute.xlu1 %1674 }
 0x340   :  { %3904 = vset.pattern.permute.xlu0 %v6242_v17  ;;  %v5892_v17 = vsel %vm1495_vm5, %v5663_v31, %v1675_v48  ;;  %v2503_v31 = vld [vmem:[#allocation6 + $0x50] sm:$0xff]  ;;  %v2514_v48 = vld [vmem:[#allocation6 + $0xa8] sm:$0xff] }
 0x341   :  { %2472 = vperm.xlu0 %3904, %v2428_v22   ;;  %v3842_v14 = vpop.permute.xlu0 %3841  ;;  %2534 = vmatpush1.msra.mxu0 %v2503_v31  ;;  %v2497_v22 = vld [vmem:[#allocation6 + $0x20] sm:$0xff] }
 0x342   :  { %v3844_v50 = vunpack.i.h.bf16 %v3842_v14  ;;  %2535 = vmatprep.subr.mxu0 %v4104_v2  ;;  %2286 = vperm.xlu1 %3909, %v2268_v36  }
 0x343   :  { %v3847_v59 = vpop.permute.xlu1 %3846  ;;  %2536 = vmatpush1.msra.mxu0 %v2502_v35 }
 0x344   :  { %v3849_v1 = vunpack.i.h.bf16 %v3847_v59  ;;  %v3848_v0 = vunpack.i.l.bf16 %v3847_v59  ;;  %v1946_v46 = vsel %vm1942_vm13, %v5892_v17, %v3844_v50  ;;  %2537 = vmatprep.subr.mxu0 %v4104_v2  ;;  %v2511_v50 = vld [vmem:[#allocation6 + $0x90] sm:$0xff]  ;;  %v2510_v59 = vld [vmem:[#allocation6 + $0x88] sm:$0xff] }
 0x345   :  { %3907 = vset.pattern.permute.xlu0 %v6236_v28  ;;  %v3843_v28 = vunpack.i.l.bf16 %v3842_v14  ;;  %2538 = vmatpush1.msra.mxu0 %v2501_v55  ;;  %v2513_v14 = vld [vmem:[#allocation6 + $0xa0] sm:$0xff] }
 0x346   :  { %2601 = vperm.xlu0 %3907, %v2593_v7   ;;  %v1955_v44 = vsel %vm1951_vm14, %v1946_v46, %v3849_v1  ;;  %2539 = vmatprep.subr.mxu0 %v4104_v2  ;;  %v2273_v7 = vld [vmem:[%s6247_s14 + $0x38] sm:$0xff] }
 0x347   :  { %2540 = vmatpush1.msra.mxu0 %v2500_v12  ;;  %2291 = vperm.xlu1 %3909, %v2269_v56  }
 0x348   :  { %2541 = vmatprep.subr.mxu0 %v4104_v2 }
 0x349   :  { %2542 = vmatpush1.msra.mxu0 %v2499_v43  ;;  %v1792_v43 = vrot.slane %v5823_v10, 4 }
 0x34a   :  { %3910 = vset.pattern.permute.xlu0 %v6246_v24  ;;  %v1786_v24 = vrot.slane %v5714_v18, 4  ;;  %2543 = vmatprep.subr.mxu0 %v4104_v2 }
 0x34b   :  { %2281 = vperm.xlu0 %3910, %v2267_v37   ;;  %2544 = vmatpush1.msra.mxu0 %v2498_v61 }
 0x34c   :  { %v1787_v33 = vsel %vm1776_vm8, %v1784_v60, %v1786_v24  ;;  %2545 = vmatprep.subr.mxu0 %v4104_v2  ;;  %2301 = vperm.xlu1 %3909, %v2271_v42   ;;  %v2512_v60 = vld [vmem:[#allocation6 + $0x98] sm:$0xff] }
 0x34d   :  { %2546 = vmatpush1.msra.mxu0 %v2497_v22 }
 0x34e   :  { %2547 = vmatprep.subr.mxu0 %v4104_v2 }
 0x34f   :  { %2296 = vperm.xlu0 %3910, %v2270_v13   ;;  %2548 = vmatpush1.msra.mxu0 %v2496_v49 }
 0x350   :  { %2549 = vmatprep.subr.mxu0 %v4104_v2  ;;  %2311 = vperm.xlu1 %3909, %v2273_v7  }
 0x351   :  { %2550 = vmatpush1.msra.mxu0 %v2495_v34 }
 0x352   :  { %v3852_v53 = vpop.permute.xlu0 %3851  ;;  %v3857_v62 = vpop.permute.xlu1 %3856  ;;  %2551 = vmatprep.subr.mxu0 %v4104_v2 }
 0x353   :  { %v3853_v63 = vunpack.i.l.bf16 %v3852_v53  ;;  %v3854_v21 = vunpack.i.h.bf16 %v3852_v53  ;;  %v3858_v26 = vunpack.i.l.bf16 %v3857_v62  ;;  %v3859_v3 = vunpack.i.h.bf16 %v3857_v62  ;;  %2306 = vperm.xlu0 %3910, %v2272_v8   ;;  %2552 = vmatpush1.msra.mxu0 %v2494_v5 }
 0x354   :  { %2553 = vmatprep.subr.mxu0 %v4104_v2 }
 0x355   :  { %v1963_v25 = vsel %vm1495_vm5, %v1785_v20, %v3853_v63  ;;  %v1964_v11 = vsel %vm1495_vm5, %v1787_v33, %v3854_v21  ;;  %2554 = vmatpush1.msra.mxu0 %v2493_v6  ;;  %v1788_v20 = vrot.slane %v5734_v47, 4 }
 0x356   :  { %v1677_v4 = vpop.permute.xlu0 %1676  ;;  %v1971_v51 = vsel %vm1942_vm13, %v1963_v25, %v3843_v28  ;;  %2573 = vmatprep.subr.mxu0 %v4104_v2 }
 0x357   :  { %v1979_v27 = vsel %vm1951_vm14, %v1971_v51, %v3848_v0  ;;  %v5911_v15 = vsel %vm1495_vm5, %v5698_v16, %v1677_v4  ;;  %v1972_v16 = vsel %vm1942_vm13, %v1964_v11, %v3858_v26  ;;  %3911 = vset.pattern.permute.xlu0 %v6241_v9  ;;  %3398 = vmatpush2.msk.msra.mxu0 %vm1776_vm8, %v2515_v39  ;;  %v2509_v9 = vld [vmem:[#allocation6 + $0x80] sm:$0xff]  ;;  %v1790_v4 = vrot.slane %v5757_v40, 4 }
 0x358   :  { %2135 = vmatprep.mubr.f32.mxu1 %v1979_v27  ;;  %v1947_v19 = vsel %vm1942_vm13, %v5911_v15, %v3859_v3  ;;  %2575 = vmatprep.subr.mxu0 %v4104_v2  ;;  %v1789_v62 = vsel %vm1776_vm8, %v1786_v24, %v1788_v20 }
 0x359   :  { %2136 = vmatmul.mubr.f32.gmra.mxu1 %v1955_v44  ;;  %2576 = vmatpush2.msra.mxu0 %v2514_v48  ;;  %v1793_v56 = vsel %vm1776_vm8, %v1790_v4, %v1792_v43  ;;  %v2616_v48 = vld [vmem:[#allocation7 + $0x10] sm:$0x3]  ;;  %v2706_v43 = vld [vmem:[#allocation9 + $0x60] sm:$0xff] }
 0x35a   :  { %v3862_v45 = vpop.permute.xlu0 %3861  ;;  %2577 = vmatprep.subr.mxu0 %v4104_v2 }
 0x35b   :  { %v3864_v23 = vunpack.i.h.bf16 %v3862_v45  ;;  %v3863_v54 = vunpack.i.l.bf16 %v3862_v45  ;;  %2578 = vmatpush2.msra.mxu0 %v2513_v14  ;;  %v2614_v14 = vld [vmem:[#allocation7] sm:$0xff] }
 0x35c   :  { %2579 = vmatprep.subr.mxu0 %v4104_v2 }
 0x35d   :  { %v1980_v57 = vsel %vm1951_vm14, %v1972_v16, %v3863_v54  ;;  %v1956_v58 = vsel %vm1951_vm14, %v1947_v19, %v3864_v23  ;;  %2580 = vmatpush2.msra.mxu0 %v2512_v60 }
 0x35e   :  { %2140 = vmatprep.mubr.f32.mxu1 %v1980_v57  ;;  %2581 = vmatprep.subr.mxu0 %v4104_v2  ;;  %v1679_v53 = vpop.permute.xlu0 %1678  ;;  %v3867_v63 = vpop.permute.xlu1 %3866 }
 0x35f   :  { %2141 = vmatmul.mubr.f32.gmra.mxu1 %v1956_v58  ;;  %2582 = vmatpush2.msra.mxu0 %v2511_v50  ;;  %v3869_v1 = vunpack.i.h.bf16 %v3867_v63  ;;  %v3868_v21 = vunpack.i.l.bf16 %v3867_v63  ;;  %v1939_v25 = vsel %vm1495_vm5, %v5714_v18, %v1679_v53  ;;  %v1791_v18 = vsel %vm1776_vm8, %v1788_v20, %v1790_v4 }
 0x360   :  { %2583 = vmatprep.subr.mxu0 %v4104_v2 }
 0x361   :  { %2584 = vmatpush2.msra.mxu0 %v2510_v59  ;;  %v1948_v33 = vsel %vm1942_vm13, %v1939_v25, %v3869_v1 }
 0x362   :  { %2585 = vmatprep.subr.mxu0 %v4104_v2  ;;  %v3872_v38 = vpop.permute.xlu0 %3871 }
 0x363   :  { %2586 = vmatpush2.msra.mxu0 %v2509_v9  ;;  %v3874_v46 = vunpack.i.h.bf16 %v3872_v38  ;;  %v3873_v51 = vunpack.i.l.bf16 %v3872_v38 }
 0x364   :  { %3584 = vmatprep.subr.mxu0 %v4104_v2 }
 0x365   :  { %v1957_v11 = vsel %vm1951_vm14, %v1948_v33, %v3874_v46 }
 0x37d   :  { %v3877_v28 = vpop.permute.xlu1 %3876  ;;  %v3882_v29 = vpop.permute.xlu0 %3881 }
 0x37e   :  { %v3878_v0 = vunpack.i.l.bf16 %v3877_v28  ;;  %v3879_v31 = vunpack.i.h.bf16 %v3877_v28  ;;  %v3883_v24 = vunpack.i.l.bf16 %v3882_v29  ;;  %v3884_v55 = vunpack.i.h.bf16 %v3882_v29 }
 0x380   :  { %v1965_v35 = vsel %vm1495_vm5, %v1789_v62, %v3878_v0  ;;  %v1966_v45 = vsel %vm1495_vm5, %v1791_v18, %v3879_v31 }
 0x381   :  { %v1681_v27 = vpop.permute.xlu1 %1680  ;;  %v1973_v26 = vsel %vm1942_vm13, %v1965_v35, %v3868_v21  ;;  %v1974_v16 = vsel %vm1942_vm13, %v1966_v45, %v3883_v24 }
 0x382   :  { %v1981_v44 = vsel %vm1951_vm14, %v1973_v26, %v3873_v51  ;;  %v1940_v3 = vsel %vm1495_vm5, %v5734_v47, %v1681_v27 }
 0x383   :  { %2145 = vmatprep.mubr.f32.mxu1 %v1981_v44  ;;  %v1949_v19 = vsel %vm1942_vm13, %v1940_v3, %v3884_v55 }
 0x384   :  { %2146 = vmatmul.mubr.f32.gmra.mxu1 %v1957_v11 }
 0x385   :  { %v3887_v36 = vpop.permute.xlu1 %3886 }
 0x386   :  { %v3889_v23 = vunpack.i.h.bf16 %v3887_v36  ;;  %v3888_v54 = vunpack.i.l.bf16 %v3887_v36 }
 0x388   :  { %v1982_v57 = vsel %vm1951_vm14, %v1974_v16, %v3888_v54  ;;  %v1958_v58 = vsel %vm1951_vm14, %v1949_v19, %v3889_v23  ;;  %v6042_v54 = vpop.f32.mrf.mxu1 }
 0x389   :  { %2150 = vmatprep.mubr.f32.mxu1 %v1982_v57  ;;  %v2708_v57 = vld [vmem:[#allocation9 + $0x70] sm:$0xff] }
 0x38a   :  { %v1683_v12 = vpop.permute.xlu1 %1682  ;;  %v1835_v47 = vpop.permute.xlu0 %1834  ;;  %2151 = vmatmul.mubr.f32.gmra.mxu1 %v1958_v58  ;;  %v2707_v58 = vld [vmem:[#allocation9 + $0x68] sm:$0xff] }
 0x38b   :  { %v1941_v34 = vsel %vm1495_vm5, %v5757_v40, %v1683_v12  ;;  %v1967_v7 = vsel %vm1495_vm5, %v1793_v56, %v1835_v47  ;;  %v2615_v40 = vld [vmem:[#allocation7 + $0x8] sm:$0xff]  ;;  %v6044_v16 = vpop.f32.mrf.mxu1  ;;  %v2713_v56 = vld [vmem:[%s6199_s12 + $0x18] sm:$0xff] }
 0x38e   :  { %v3897_v37 = vpop.permute.xlu1 %3896  ;;  %v3892_v61 = vpop.permute.xlu0 %3891 }
 0x38f   :  { %v3899_v22 = vunpack.i.h.bf16 %v3897_v37  ;;  %v3898_v42 = vunpack.i.l.bf16 %v3897_v37  ;;  %v3894_v13 = vunpack.i.h.bf16 %v3892_v61  ;;  %v3893_v49 = vunpack.i.l.bf16 %v3892_v61  ;;  %v2705_v37 = vld [vmem:[#allocation9 + $0x58] sm:$0xff] }
 0x390   :  { %v2712_v61 = vld [vmem:[%s6199_s12 + $0x10] sm:$0xff] }
 0x391   :  { %v1975_v8 = vsel %vm1942_vm13, %v1967_v7, %v3893_v49  ;;  %v1950_v5 = vsel %vm1942_vm13, %v1941_v34, %v3894_v13  ;;  %v2711_v13 = vld [vmem:[%s6199_s12 + $0x8] sm:$0xff]  ;;  %v2703_v49 = vld [vmem:[#allocation9 + $0x48] sm:$0xff] }
 0x392   :  { %v1983_v6 = vsel %vm1951_vm14, %v1975_v8, %v3898_v42  ;;  %v1959_v39 = vsel %vm1951_vm14, %v1950_v5, %v3899_v22  ;;  %v2704_v22 = vld [vmem:[#allocation9 + $0x50] sm:$0xff]  ;;  %v2702_v8 = vld [vmem:[#allocation9 + $0x40] sm:$0xff]  ;;  %v2701_v5 = vld [vmem:[#allocation9 + $0x38] sm:$0xff] }
 0x393   :  { %2155 = vmatprep.mubr.f32.mxu1 %v1983_v6  ;;  %v2710_v7 = vld [vmem:[%s6199_s12] sm:$0xff] }
 0x394   :  { %2156 = vmatmul.mubr.f32.gmra.mxu1 %v1959_v39  ;;  %v2700_v39 = vld [vmem:[#allocation9 + $0x30] sm:$0xff] }
 0x395   :  { %3552 = vmatprep.mubr.msk.f32.mxu1 %vm1942_vm13, %v5790_v41 }
 0x398   :  { %3553 = vmatmul.mubr.msk.f32.vlgmr.msra.gmra.mxu1 %vm1942_vm13, %v5817_v52 }
 0x399   :  { %3555 = vmatprep.mubr.msk.f32.mxu1 %vm1942_vm13, %v5892_v17  ;;  %3565 = vmatpush3.msk.msra.mxu1 %vm1844_vm3, %v2616_v48  ;;  %v2699_v48 = vld [vmem:[#allocation9 + $0x28] sm:$0xff] }
 0x39a   :  { %3566 = vmatprep.subr.mxu1 %v4104_v2 }
 0x39b   :  { %3567 = vmatpush3.msra.mxu1 %v2615_v40  ;;  %v2431_v41 = vpop.permute.xlu1 %2430 }
 0x39c   :  { %3556 = vmatmul.mubr.msk.f32.gmra.mxu1 %vm1942_vm13, %v5911_v15  ;;  %3568 = vmatprep.subr.mxu1 %v4104_v2  ;;  %vm2432_vm0 = vcmp.eq.s32.totalorder %v4513_v30, %v2431_v41  ;;  %vm2433_vm15 = vcmp.eq.s32.totalorder %v4522_v32, %v2431_v41  ;;  %v2697_v41 = vld [vmem:[#allocation9 + $0x18] sm:$0xff] }
 0x39d   :  { %3558 = vmatprep.mubr.msk.f32.mxu1 %vm1942_vm13, %v1939_v25  ;;  %3569 = vmatpush3.msra.mxu1 %v2614_v14  ;;  %v3386_v59 = vsel %vm2432_vm0, 1.0, %v4104_v2  ;;  %v2698_v14 = vld [vmem:[#allocation9 + $0x20] sm:$0xff] }
 0x39e   :  { %3573 = vmatprep.subr.mxu1 %v4104_v2 }
 0x3a0   :  { %3559 = vmatmul.mubr.msk.f32.gmra.mxu1 %vm1942_vm13, %v1940_v3  ;;  %v2451_v52 = vpop.permute.xlu1 %2450 }
 0x3a1   :  { %3561 = vmatprep.mubr.msk.f32.mxu1 %vm1942_vm13, %v1941_v34  ;;  %vm2452_vm1 = vcmp.eq.s32.totalorder %v4513_v30, %v2451_v52  ;;  %vm2453_vm2 = vcmp.eq.s32.totalorder %v4522_v32, %v2451_v52 }
 0x3a2   :  { %v3390_v63 = vsel %vm2452_vm1, 1.0, %v4104_v2  ;;  %v3391_v20 = vsel %vm2453_vm2, 1.0, %v4104_v2 }
 0x3a5   :  { %v2462_v15 = vpop.permute.xlu1 %2461 }
 0x3a6   :  { %vm2463_vm7 = vcmp.eq.s32.totalorder %v4513_v30, %v2462_v15  ;;  %vm2464_vm8 = vcmp.eq.s32.totalorder %v4522_v32, %v2462_v15  ;;  %v2695_v15 = vld [vmem:[#allocation9 + $0x8] sm:$0xff] }
 0x3a7   :  { %v3392_v62 = vsel %vm2463_vm7, 1.0, %v4104_v2  ;;  %v3393_v21 = vsel %vm2464_vm8, 1.0, %v4104_v2  ;;  %vm2617_vm7 = vcmask 146432  }
 0x3aa   :  { %v1932_v17 = vpop.permute.xlu0 %1931  ;;  %v2484_v50 = vpop.permute.xlu1 %2483 }
 0x3ab   :  { %v1984_v60 = vsel %vm1495_vm5, %v5823_v10, %v1932_v17  ;;  %v3387_v10 = vsel %vm2433_vm15, 1.0, %v4104_v2  ;;  %vm2486_vm14 = vcmp.eq.s32.totalorder %v4522_v32, %v2484_v50  ;;  %v2696_v17 = vld [vmem:[#allocation9 + $0x10] sm:$0xff] }
 0x3ac   :  { %3562 = vmatmul.mubr.msk.f32.gmra.mxu1 %vm1942_vm13, %v1984_v60  ;;  %vm2485_vm13 = vcmp.eq.s32.totalorder %v4513_v30, %v2484_v50  ;;  %v3397_v44 = vsel %vm2486_vm14, 1.0, %v4104_v2  ;;  %v2694_v50 = vld [vmem:[#allocation9] sm:$0xff] }
 0x3ad   :  { %3570 = vmatprep.mubr.msk.f32.mxu1 %vm4118_vm9, %v4104_v2  ;;  %v3396_v26 = vsel %vm2485_vm13, 1.0, %v4104_v2 }
 0x3af   :  { %v2596_v9 = vpop.permute.xlu1 %2595 }
 0x3b0   :  { %vm2597_vm1 = vcmp.eq.s32.totalorder %v4513_v30, %v2596_v9 }
 0x3b4   :  { %v2609_v51 = vpop.permute.xlu1 %2608 }
 0x3b5   :  { %vm2610_vm2 = vcmp.eq.s32.totalorder %v4513_v30, %v2609_v51 }
 0x3b6   :  { %v3402_v55 = vsel %vm2610_vm2, 1.0, %v4104_v2 }
 0x3b7   :  { %v2440_v53 = vpop.permute.xlu0 %2439 }
 0x3b8   :  { %vm2441_vm4 = vcmp.eq.s32.totalorder %v4513_v30, %v2440_v53  ;;  %vm2442_vm6 = vcmp.eq.s32.totalorder %v4522_v32, %v2440_v53 }
 0x3b9   :  { %v3388_v38 = vsel %vm2441_vm4, 1.0, %v4104_v2  ;;  %v3389_v28 = vsel %vm2442_vm6, 1.0, %v4104_v2  ;;  %vm2516_vm4 = vcmask 424960  }
 0x3ba   :  { %v2447_v1 = vadd.f32 %v3388_v38, %v3386_v59  ;;  %v2448_v0 = vadd.f32 %v3389_v28, %v3387_v10  ;;  %v3376_v38 = vld [vmem:[%s6191_s4] ss:$0 sm:$0xff] }
 0x3bc   :  { %v2458_v25 = vadd.f32 %v3390_v63, %v2447_v1  ;;  %v2459_v46 = vadd.f32 %v3391_v20, %v2448_v0  ;;  %v2473_v4 = vpop.permute.xlu0 %2472  ;;  %v3444_v63 = vadd.f32 %v6044_v16, %v6042_v54 }
 0x3bd   :  { %vm2474_vm0 = vcmp.eq.s32.totalorder %v4513_v30, %v2473_v4  ;;  %vm2475_vm15 = vcmp.eq.s32.totalorder %v4522_v32, %v2473_v4  ;;  %v3400_v32 = vsel %vm2597_vm1, 1.0, %v4104_v2 }
 0x3be   :  { %v2469_v31 = vadd.f32 %v3392_v62, %v2458_v25  ;;  %v2470_v29 = vadd.f32 %v3393_v21, %v2459_v46  ;;  %v3394_v35 = vsel %vm2474_vm0, 1.0, %v4104_v2  ;;  %v3395_v27 = vsel %vm2475_vm15, 1.0, %v4104_v2  ;;  %v6092_v21 = vpop.permute.xlu1 %2276 }
 0x3bf   :  { %v2123_v62 = vadd.f32 %v3444_v63, %v3376_v38 }
 0x3c0   :  { %v2480_v33 = vadd.f32 %v3394_v35, %v2469_v31  ;;  %v2481_v24 = vadd.f32 %v3395_v27, %v2470_v29 }
 0x3c1   :  { %v2602_v11 = vpop.permute.xlu0 %2601 }
 0x3c2   :  { %v2491_v18 = vadd.f32 %v3396_v26, %v2480_v33  ;;  %v2492_v3 = vadd.f32 %v3397_v44, %v2481_v24  ;;  %vm2603_vm6 = vcmp.eq.s32.totalorder %v4513_v30, %v2602_v11  ;;  %v2709_v30 = vld [vmem:[#allocation9 + $0x78] sm:$0xff] }
 0x3c3   :  { %v3401_v45 = vsel %vm2603_vm6, 1.0, %v4104_v2 }
 0x3c4   :  { %3399 = vmatprep.mubr.msk.f32.mxu0 %vm2516_vm4, %v2492_v3  ;;  %v2606_v36 = vadd.f32 %v3401_v45, %v3400_v32  ;;  %v6097_v32 = vpop.permute.xlu1 %2286 }
 0x3c5   :  { %2588 = vmatmul.mubr.f32.vlgmr.msra.gmra.mxu0 %v2491_v18 }
 0x3c6   :  { %v2613_v23 = vadd.f32 %v3402_v55, %v2606_v36  ;;  %3616 = vmatprep.mubr.msk.f32.mxu0 %vm4118_vm9, %v4104_v2  ;;  %3585 = vmatpush3.msra.mxu0 %v2709_v30  ;;  %v6094_v27 = vpop.permute.xlu0 %2281 }
 0x3c7   :  { %3586 = vmatprep.subr.mxu0 %v4104_v2 }
 0x3c8   :  { %3571 = vmatmul.mubr.msk.f32.vlgmr.msra.gmra.mxu1 %vm2617_vm7, %v2613_v23  ;;  %3587 = vmatpush3.msra.mxu0 %v2708_v57  ;;  %v6101_v57 = vpop.permute.xlu1 %2291 }
 0x3c9   :  { %3581 = vmatprep.mubr.msk.f32.mxu1 %vm4118_vm9, %v4104_v2  ;;  %3588 = vmatprep.subr.mxu0 %v4104_v2 }
 0x3ca   :  { %3589 = vmatpush3.msra.mxu0 %v2707_v58  ;;  %3574 = vmatpush3.msra.mxu1 %v2713_v56 }
 0x3cb   :  { %3590 = vmatprep.subr.mxu0 %v4104_v2  ;;  %3575 = vmatprep.subr.mxu1 %v4104_v2 }
 0x3cc   :  { %3591 = vmatpush3.msra.mxu0 %v2706_v43  ;;  %3576 = vmatpush3.msra.mxu1 %v2712_v61  ;;  %v6104_v43 = vpop.permute.xlu0 %2296 }
 0x3cd   :  { %3592 = vmatprep.subr.mxu0 %v4104_v2  ;;  %3577 = vmatprep.subr.mxu1 %v4104_v2 }
 0x3ce   :  { %3593 = vmatpush3.msra.mxu0 %v2705_v37  ;;  %3578 = vmatpush3.msra.mxu1 %v2711_v13 }
 0x3cf   :  { %3594 = vmatprep.subr.mxu0 %v4104_v2  ;;  %3579 = vmatprep.subr.mxu1 %v4104_v2 }
 0x3d0   :  { %3595 = vmatpush3.msra.mxu0 %v2704_v22  ;;  %3580 = vmatpush3.msra.mxu1 %v2710_v7 }
 0x3d1   :  { %3596 = vmatprep.subr.mxu0 %v4104_v2  ;;  %3619 = vmatprep.subr.mxu1 %v4104_v2 }
 0x3d2   :  { %3597 = vmatpush3.msra.mxu0 %v2703_v49 }
 0x3d3   :  { %v6046_v19 = vpop.f32.mrf.mxu1  ;;  %3598 = vmatprep.subr.mxu0 %v4104_v2 }
 0x3d4   :  { %3599 = vmatpush3.msra.mxu0 %v2702_v8 }
 0x3d5   :  { %v6050_v12 = vpop.f32.mrf.mxu1  ;;  %3600 = vmatprep.subr.mxu0 %v4104_v2 }
 0x3d6   :  { %3601 = vmatpush3.msra.mxu0 %v2701_v5  ;;  %v3447_v28 = vadd.f32 %v6050_v12, %v6046_v19 }
 0x3d7   :  { %3602 = vmatprep.subr.mxu0 %v4104_v2 }
 0x3d8   :  { %3603 = vmatpush3.msra.mxu0 %v2700_v39  ;;  %v2128_v46 = vadd.f32 %v3447_v28, %v3376_v38 }
 0x3d9   :  { %3604 = vmatprep.subr.mxu0 %v4104_v2 }
 0x3da   :  { %v6053_v47 = vpop.f32.mrf.mxu1  ;;  %3605 = vmatpush3.msra.mxu0 %v2699_v48  ;;  %v6110_v48 = vpop.permute.xlu0 %2306 }
 0x3db   :  { %3606 = vmatprep.subr.mxu0 %v4104_v2 }
 0x3dc   :  { %v3449_v42 = vpop.f32.mrf.mxu1  ;;  %3607 = vmatpush3.msra.mxu0 %v2698_v14 }
 0x3dd   :  { %3608 = vmatprep.subr.mxu0 %v4104_v2  ;;  %v3450_v0 = vadd.f32 %v3449_v42, %v6053_v47  ;;  %v6107_v42 = vpop.permute.xlu1 %2301 }
 0x3de   :  { %3609 = vmatpush3.msra.mxu0 %v2697_v41 }
 0x3df   :  { %3610 = vmatprep.subr.mxu0 %v4104_v2  ;;  %v2133_v35 = vadd.f32 %v3450_v0, %v3376_v38 }
 0x3e0   :  { %3611 = vmatpush3.msra.mxu0 %v2696_v17 }
 0x3e1   :  { %3612 = vmatprep.subr.mxu0 %v4104_v2  ;;  %v6113_v41 = vpop.permute.xlu1 %2311 }
 0x3e2   :  { %3613 = vmatpush3.msra.mxu0 %v2695_v15 }
 0x3e3   :  { %3614 = vmatprep.subr.mxu0 %v4104_v2 }
 0x3e4   :  { %3615 = vmatpush3.msra.mxu0 %v2694_v50 }
 0x3e5   :  { %3661 = vmatprep.subr.mxu0 %v4104_v2 }
 0x419   :  { %v3451_v34 = vpop.f32.mrf.mxu1 }
 0x41b   :  { %v3452_v6 = vpop.f32.mrf.mxu1 }
 0x41c   :  { %v3453_v31 = vadd.f32 %v3452_v6, %v3451_v34 }
 0x41e   :  { %v2138_v3 = vadd.f32 %v3453_v31, %v3376_v38  ;;  %v2859_v31 = vld [vmem:[#allocation10 + $0x10] sm:$0xff] }
 0x41f   :  { %v3454_v40 = vpop.f32.mrf.mxu1 }
 0x421   :  { %v3455_v52 = vpop.f32.mrf.mxu1 }
 0x422   :  { %v3456_v44 = vadd.f32 %v3455_v52, %v3454_v40 }
 0x424   :  { %v2143_v54 = vadd.f32 %v3456_v44, %v3376_v38 }
 0x444   :  { %v3457_v60 = vpop.f32.mrf.mxu1 }
 0x446   :  { %v3458_v59 = vpop.f32.mrf.mxu1 }
 0x447   :  { %v3459_v16 = vadd.f32 %v3458_v59, %v3457_v60 }
 0x449   :  { %v2148_v12 = vadd.f32 %v3459_v16, %v3376_v38  ;;  %v2948_v16 = vld [vmem:[#allocation12 + $0x68] sm:$0xff] }
 0x44a   :  { %v3460_v10 = vpop.f32.mrf.mxu1 }
 0x44c   :  { %v3461_v53 = vpop.f32.mrf.mxu1 }
 0x44d   :  { %v3462_v47 = vadd.f32 %v3461_v53, %v3460_v10 }
 0x44f   :  { %v2153_v7 = vadd.f32 %v3462_v47, %v3376_v38 }
 0x454   :  { %v3463_v9 = vpop.f32.mrf.mxu1 }
 0x456   :  { %v3464_v20 = vpop.f32.mrf.mxu1 }
 0x457   :  { %v3465_v56 = vadd.f32 %v3464_v20, %v3463_v9 }
 0x458   :  { %v3554_v1 = vpop.f32.mrf.mxu1 }
 0x459   :  { %v2233_v29 = vadd.f32 %v3554_v1, %v2128_v46  ;;  %v2158_v34 = vadd.f32 %v3465_v56, %v3376_v38  ;;  %v2860_v1 = vld [vmem:[#allocation10 + $0x18] sm:$0xff] }
 0x45a   :  { %v2227_v25 = vpop.f32.mrf.mxu1 }
 0x45b   :  { %v2228_v4 = vadd.f32 %v2227_v25, %v2123_v62  ;;  %v2315_v18 = vmul.f32 %v6094_v27, %v2233_v29 }
 0x45c   :  { %v3557_v51 = vpop.f32.mrf.mxu1 }
 0x45d   :  { %v2314_v33 = vmul.f32 %v6092_v21, %v2228_v4  ;;  %v2243_v23 = vadd.f32 %v3557_v51, %v2138_v3 }
 0x45e   :  { %v2237_v26 = vpop.f32.mrf.mxu1 }
 0x45f   :  { %v2238_v24 = vadd.f32 %v2237_v26, %v2133_v35  ;;  %v2322_v36 = vadd.f32 %v2315_v18, %v2314_v33  ;;  %v2317_v58 = vmul.f32 %v6101_v57, %v2243_v23 }
 0x460   :  { %v3560_v11 = vpop.f32.mrf.mxu1 }
 0x461   :  { %v2316_v45 = vmul.f32 %v6097_v32, %v2238_v24  ;;  %v2253_v22 = vadd.f32 %v3560_v11, %v2148_v12 }
 0x462   :  { %v2247_v55 = vpop.f32.mrf.mxu1 }
 0x463   :  { %v2323_v30 = vadd.f32 %v2322_v36, %v2316_v45  ;;  %v2248_v19 = vadd.f32 %v2247_v55, %v2143_v54  ;;  %v2319_v5 = vmul.f32 %v6107_v42, %v2253_v22 }
 0x465   :  { %v2318_v37 = vmul.f32 %v6104_v43, %v2248_v19  ;;  %v2324_v61 = vadd.f32 %v2323_v30, %v2317_v58  ;;  %v2947_v58 = vld [vmem:[#allocation12 + $0x60] sm:$0xff] }
 0x467   :  { %v2325_v49 = vadd.f32 %v2324_v61, %v2318_v37 }
 0x469   :  { %v2326_v14 = vadd.f32 %v2325_v49, %v2319_v5 }
 0x46c   :  { %v3563_v13 = vpop.f32.mrf.mxu1 }
 0x46d   :  { %v2263_v6 = vadd.f32 %v3563_v13, %v2158_v34 }
 0x46e   :  { %v2257_v8 = vpop.f32.mrf.mxu1 }
 0x46f   :  { %v2258_v39 = vadd.f32 %v2257_v8, %v2153_v7  ;;  %v2321_v52 = vmul.f32 %v6113_v41, %v2263_v6 }
 0x471   :  { %v2320_v40 = vmul.f32 %v6110_v48, %v2258_v39 }
 0x473   :  { %v2327_v17 = vadd.f32 %v2326_v14, %v2320_v40  ;;  %v2372_v40 = vld [vmem:[%s6192_s5] sm:$0x1] }
 0x475   :  { %v2328_v60 = vadd.f32 %v2327_v17, %v2321_v52 }
 0x477   :  { %v2329_v15 = vrot.slane %v2328_v60, 4 }
 0x479   :  { %v2330_v50 = vadd.f32 %v2329_v15, %v2328_v60  ;;  %v3385_v60 = vld [vmem:[#allocation4] ss:$0 sm:$0xff] }
 0x47b   :  { %v2331_v59 = vrot.slane %v2330_v50, 2 }
 0x47d   :  { %v2332_v10 = vadd.f32 %v2331_v59, %v2330_v50 }
 0x47f   :  { %v2333_v53 = vrot.slane %v2332_v10, 1 }
 0x481   :  { %v2334_v9 = vadd.f32 %v2333_v53, %v2332_v10 }
 0x483   :  { %v6116_v63 = vsub.f32 %v2228_v4, %v2334_v9  ;;  %v2336_v20 = vsub.f32 %v2233_v29, %v2334_v9  ;;  %v6118_v38 = vsub.f32 %v2238_v24, %v2334_v9  ;;  %v2338_v28 = vsub.f32 %v2243_v23, %v2334_v9  ;;  %v2858_v24 = vld [vmem:[#allocation10 + $0x8] sm:$0xff] }
 0x484   :  { %v6120_v0 = vsub.f32 %v2248_v19, %v2334_v9  ;;  %v2340_v4 = vsub.f32 %v2253_v22, %v2334_v9  ;;  %v2341_v33 = vsub.f32 %v2258_v39, %v2334_v9  ;;  %v2342_v55 = vsub.f32 %v2263_v6, %v2334_v9 }
 0x485   :  { %v2343_v62 = vmul.f32 %v6116_v63, %v6116_v63  ;;  %v2344_v25 = vmul.f32 %v2336_v20, %v2336_v20  ;;  %v2345_v46 = vmul.f32 %v6118_v38, %v6118_v38  ;;  %v2589_v51 = vpop.f32.mrf.mxu0  ;;  %v2346_v35 = vmul.f32 %v2338_v28, %v2338_v28 }
 0x486   :  { %3582 = vmatmul.mubr.msk.f32.vlgmr.msra.gmra.mxu1 %vm1495_vm5, %v2589_v51  ;;  %v2347_v18 = vmul.f32 %v6120_v0, %v6120_v0  ;;  %v2348_v36 = vmul.f32 %v2340_v4, %v2340_v4  ;;  %v2349_v30 = vmul.f32 %v2341_v33, %v2341_v33  ;;  %v2350_v12 = vmul.f32 %v2342_v55, %v2342_v55 }
 0x487   :  { %v2351_v29 = vmul.f32 %v2343_v62, %v6092_v21  ;;  %v2352_v26 = vmul.f32 %v2344_v25, %v6094_v27  ;;  %v2591_v44 = vpop.f32.mrf.mxu0  ;;  %3620 = vmatpush3.msra.mxu1 %v2860_v1  ;;  %v2353_v3 = vmul.f32 %v2345_v46, %v6097_v32  ;;  %3627 = vmatprep.mubr.msk.f32.mxu1 %vm4118_vm9, %v4104_v2  ;;  %v2857_v21 = vld [vmem:[#allocation10] sm:$0xff]  ;;  %v6248_v39 = vlaneseq }
 0x488   :  { %3621 = vmatprep.subr.mxu1 %v4104_v2  ;;  %v2690_v11 = vpop.f32.mrf.mxu1  ;;  %v2354_v23 = vmul.f32 %v2346_v35, %v6101_v57  ;;  %v2355_v32 = vmul.f32 %v2347_v18, %v6104_v43  ;;  %v2356_v47 = vmul.f32 %v2348_v36, %v6107_v42  ;;  %v2946_v57 = vld [vmem:[#allocation12 + $0x58] sm:$0xff]  ;;  %v2357_v43 = vmul.f32 %v2349_v30, %v6110_v48  ;;  %v2945_v30 = vld [vmem:[#allocation12 + $0x50] sm:$0xff] }
 0x489   :  { %v2359_v45 = vadd.f32 %v2352_v26, %v2351_v29  ;;  %3622 = vmatpush3.msra.mxu1 %v2859_v31  ;;  %v2358_v61 = vmul.f32 %v2350_v12, %v6113_v41  ;;  %v2378_v48 = vshrl.u32 %v6248_v39, 7  ;;  %v2943_v12 = vld [vmem:[#allocation12 + $0x40] sm:$0xff]  ;;  %v3024_v39 = vld [vmem:[#allocation13 + $0x8] sm:$0xff] }
 0x48a   :  { %3623 = vmatprep.subr.mxu1 %v4104_v2  ;;  %v3572_v27 = vpop.f32.mrf.mxu1 }
 0x48b   :  { %v2360_v54 = vadd.f32 %v2359_v45, %v2353_v3  ;;  %3624 = vmatpush3.msra.mxu1 %v2858_v24  ;;  %v2379_v14 = vsub.s32 0, %v2378_v48 }
 0x48c   :  { %3625 = vmatprep.subr.mxu1 %v4104_v2 }
 0x48d   :  { %v2361_v19 = vadd.f32 %v2360_v54, %v2354_v23  ;;  %3626 = vmatpush3.msra.mxu1 %v2857_v21 }
 0x48e   :  { %3628 = vmatmul.mubr.msk.f32.vlgmr.msra.gmra.mxu1 %vm1495_vm5, %v2690_v11  ;;  %3630 = vmatprep.subr.mxu1 %v4104_v2  ;;  %vm2949_vm5 = vcmask 916480  }
 0x48f   :  { %v2362_v56 = vadd.f32 %v2361_v19, %v2355_v32  ;;  %3631 = vmatpush3.msra.mxu1 %v2948_v16  ;;  %3658 = vmatprep.mubr.msk.f32.mxu1 %vm4118_vm9, %v4104_v2 }
 0x490   :  { %3632 = vmatprep.subr.mxu1 %v4104_v2 }
 0x491   :  { %v2363_v37 = vadd.f32 %v2362_v56, %v2356_v47  ;;  %3633 = vmatpush3.msra.mxu1 %v2947_v58  ;;  %v2944_v58 = vld [vmem:[#allocation12 + $0x48] sm:$0xff] }
 0x492   :  { %3634 = vmatprep.subr.mxu1 %v4104_v2 }
 0x493   :  { %v2364_v22 = vadd.f32 %v2363_v37, %v2357_v43  ;;  %3635 = vmatpush3.msra.mxu1 %v2946_v57  ;;  %v2942_v57 = vld [vmem:[#allocation12 + $0x38] sm:$0xff]  ;;  %v2941_v43 = vld [vmem:[#allocation12 + $0x30] sm:$0xff]  ;;  %v2940_v37 = vld [vmem:[#allocation12 + $0x28] sm:$0xff] }
 0x494   :  { %3636 = vmatprep.subr.mxu1 %v4104_v2 }
 0x495   :  { %v2365_v42 = vadd.f32 %v2364_v22, %v2358_v61  ;;  %3637 = vmatpush3.msra.mxu1 %v2945_v30  ;;  %v2939_v61 = vld [vmem:[#allocation12 + $0x20] sm:$0xff]  ;;  %v2938_v22 = vld [vmem:[#allocation12 + $0x18] sm:$0xff] }
 0x496   :  { %3638 = vmatprep.subr.mxu1 %v4104_v2 }
 0x497   :  { %v2366_v13 = vrot.slane %v2365_v42, 4  ;;  %3639 = vmatpush3.msra.mxu1 %v2944_v58 }
 0x498   :  { %3640 = vmatprep.subr.mxu1 %v4104_v2 }
 0x499   :  { %v2367_v49 = vadd.f32 %v2366_v13, %v2365_v42  ;;  %3641 = vmatpush3.msra.mxu1 %v2943_v12  ;;  %v2937_v42 = vld [vmem:[#allocation12 + $0x10] sm:$0xff]  ;;  %v2936_v13 = vld [vmem:[#allocation12 + $0x8] sm:$0xff] }
 0x49a   :  { %3642 = vmatprep.subr.mxu1 %v4104_v2 }
 0x49b   :  { %v2368_v34 = vrot.slane %v2367_v49, 2  ;;  %3643 = vmatpush3.msra.mxu1 %v2942_v57 }
 0x49c   :  { %3644 = vmatprep.subr.mxu1 %v4104_v2 }
 0x49d   :  { %v2369_v7 = vadd.f32 %v2368_v34, %v2367_v49  ;;  %3645 = vmatpush3.msra.mxu1 %v2941_v43  ;;  %v2935_v49 = vld [vmem:[#allocation12] sm:$0xff] }
 0x49e   :  { %3646 = vmatprep.subr.mxu1 %v4104_v2  ;;  %v3029_v34 = vld [vmem:[#allocation13 + $0x30] sm:$0xff] }
 0x49f   :  { %v2370_v8 = vrot.slane %v2369_v7, 1  ;;  %3647 = vmatpush3.msra.mxu1 %v2940_v37 }
 0x4a0   :  { %3648 = vmatprep.subr.mxu1 %v4104_v2 }
 0x4a1   :  { %v2371_v5 = vadd.f32 %v2370_v8, %v2369_v7  ;;  %3649 = vmatpush3.msra.mxu1 %v2939_v61  ;;  %v3028_v7 = vld [vmem:[#allocation13 + $0x28] sm:$0xff]  ;;  %v3027_v8 = vld [vmem:[#allocation13 + $0x20] sm:$0xff] }
 0x4a2   :  { %3650 = vmatprep.subr.mxu1 %v4104_v2 }
 0x4a3   :  { %v2373_v6 = vadd.f32 1e-05, %v2371_v5  ;;  %3651 = vmatpush3.msra.mxu1 %v2938_v22  ;;  %v3026_v5 = vld [vmem:[#allocation13 + $0x18] sm:$0xff] }
 0x4a4   :  { %3652 = vmatprep.subr.mxu1 %v4104_v2 }
 0x4a5   :  { %3912 = vrsqrt.f32 %v2373_v6  ;;  %3653 = vmatpush3.msra.mxu1 %v2937_v42  ;;  %v3025_v6 = vld [vmem:[#allocation13 + $0x10] sm:$0xff] }
 0x4a6   :  { %3654 = vmatprep.subr.mxu1 %v4104_v2 }
 0x4a7   :  { %3655 = vmatpush3.msra.mxu1 %v2936_v13 }
 0x4a8   :  { %3656 = vmatprep.subr.mxu1 %v4104_v2 }
 0x4a9   :  { %3657 = vmatpush3.msra.mxu1 %v2935_v49 }
 0x4b2   :  { %v3913_v41 = vpop.eup %3912 }
 0x4b3   :  { %v2375_v52 = vmul.f32 %v3913_v41, %v2372_v40 }
 0x4b5   :  { %v2380_v17 = vrot.slane %v2375_v52, %v2379_v14 }
 0x4b7   :  { %v2382_v15 = vmul.f32 %v2380_v17, %v6116_v63  ;;  %v2383_v50 = vmul.f32 %v2380_v17, %v6118_v38  ;;  %v2384_v59 = vmul.f32 %v2380_v17, %v6120_v0  ;;  %v2385_v10 = vmul.f32 %v2380_v17, %v2341_v33 }
 0x4b9   :  { %v2393_v53 = vadd.f32 %v3385_v60, %v2382_v15  ;;  %v2394_v9 = vadd.f32 %v3385_v60, %v2383_v50  ;;  %v2395_v20 = vadd.f32 %v3385_v60, %v2384_v59  ;;  %v2396_v28 = vadd.f32 %v3385_v60, %v2385_v10  ;;  %v3023_v50 = vld [vmem:[#allocation13] sm:$0xff] }
 0x4bb   :  { %v2397_v1 = vsel %vm1650_vm11, %v2393_v53, -inf  ;;  %v2404_v62 = vsel %vm1650_vm11, %v2394_v9, -inf  ;;  %v2418_v25 = vsel %vm1650_vm11, %v2396_v28, -inf  ;;  %v2411_v46 = vsel %vm1650_vm11, %v2395_v20, -inf }
 0x4bc   :  { %v2398_v51 = vrot.slane %v2397_v1, 4  ;;  %v2405_v31 = vrot.slane %v2404_v62, 4  ;;  %v2419_v63 = vrot.slane %v2418_v25, 4  ;;  %v2412_v4 = vrot.slane %v2411_v46, 4 }
 0x4bd   :  { %vm3104_vm11 = vcmask 3072  }
 0x4be   :  { %v2420_v38 = vmax.f32 %v2418_v25, %v2419_v63  ;;  %v2399_v35 = vmax.f32 %v2397_v1, %v2398_v51  ;;  %v2406_v0 = vmax.f32 %v2404_v62, %v2405_v31  ;;  %v2413_v29 = vmax.f32 %v2411_v46, %v2412_v4 }
 0x4c0   :  { %v2421_v26 = vrot.slane %v2420_v38, 2  ;;  %v2400_v44 = vrot.slane %v2399_v35, 2  ;;  %v2407_v33 = vrot.slane %v2406_v0, 2  ;;  %v2414_v24 = vrot.slane %v2413_v29, 2 }
 0x4c2   :  { %v2401_v11 = vmax.f32 %v2399_v35, %v2400_v44  ;;  %v2408_v18 = vmax.f32 %v2406_v0, %v2407_v33  ;;  %v2415_v3 = vmax.f32 %v2413_v29, %v2414_v24  ;;  %v2422_v45 = vmax.f32 %v2420_v38, %v2421_v26 }
 0x4c4   :  { %v2402_v21 = vrot.slane %v2401_v11, 1  ;;  %v2409_v27 = vrot.slane %v2408_v18, 1  ;;  %v2416_v55 = vrot.slane %v2415_v3, 1  ;;  %v2423_v36 = vrot.slane %v2422_v45, 1 }
 0x4c6   :  { %v2403_v23 = vmax.f32 %v2401_v11, %v2402_v21  ;;  %v2410_v54 = vmax.f32 %v2408_v18, %v2409_v27  ;;  %v2417_v16 = vmax.f32 %v2415_v3, %v2416_v55  ;;  %v2424_v32 = vmax.f32 %v2422_v45, %v2423_v36 }
 0x4c8   :  { %v2425_v19 = vsel %vm1886_vm10, %v2403_v23, %v2410_v54  ;;  %vm3030_vm10 = vcmask 457728  }
 0x4c9   :  { %v2426_v47 = vsel %vm1844_vm3, %v2425_v19, %v2417_v16 }
 0x4ca   :  { %v2427_v56 = vsel %vm1802_vm12, %v2426_v47, %v2424_v32 }
 0x4cb   :  { %3617 = vmatmul.mubr.f32.vlgmr.msra.gmra.mxu0 %v2427_v56 }
 0x4cc   :  { %3675 = vmatprep.mubr.msk.f32.mxu0 %vm4118_vm9, %v4104_v2  ;;  %3662 = vmatpush3.msra.mxu0 %v3029_v34 }
 0x4cd   :  { %3663 = vmatprep.subr.mxu0 %v4104_v2 }
 0x4ce   :  { %3664 = vmatpush3.msra.mxu0 %v3028_v7 }
 0x4cf   :  { %3665 = vmatprep.subr.mxu0 %v4104_v2 }
 0x4d0   :  { %3666 = vmatpush3.msra.mxu0 %v3027_v8 }
 0x4d1   :  { %3667 = vmatprep.subr.mxu0 %v4104_v2 }
 0x4d2   :  { %3668 = vmatpush3.msra.mxu0 %v3026_v5 }
 0x4d3   :  { %3669 = vmatprep.subr.mxu0 %v4104_v2 }
 0x4d4   :  { %3670 = vmatpush3.msra.mxu0 %v3025_v6 }
 0x4d5   :  { %3671 = vmatprep.subr.mxu0 %v4104_v2 }
 0x4d6   :  { %3672 = vmatpush3.msra.mxu0 %v3024_v39 }
 0x4d7   :  { %3673 = vmatprep.subr.mxu0 %v4104_v2 }
 0x4d8   :  { %3674 = vmatpush3.msra.mxu0 %v3023_v50 }
 0x546   :  { %v2783_v48 = vpop.f32.mrf.mxu1 }
 0x548   :  { %v3583_v40 = vpop.f32.mrf.mxu1 }
 0x54e   :  { %v2930_v14 = vpop.f32.mrf.mxu1 }
 0x550   :  { %v3629_v41 = vpop.f32.mrf.mxu1 }
 0x58b   :  { %v2853_v52 = vpop.f32.mrf.mxu0 }
 0x58c   :  { %v2854_v17 = vadd.f32 %v2853_v52, %v2783_v48 }
 0x58d   :  { %v3618_v60 = vpop.f32.mrf.mxu0 }
 0x58e   :  { %v2934_v15 = vadd.f32 %v2930_v14, %v2854_v17 }
 0x590   :  { %3659 = vmatmul.mubr.msk.f32.vlgmr.msra.gmra.mxu1 %vm2949_vm5, %v2934_v15 }
 0x650   :  { %v3019_v59 = vpop.f32.mrf.mxu1 }
 0x651   :  { %3676 = vmatmul.mubr.msk.f32.vlgmr.msra.gmra.mxu0 %vm3030_vm10, %v3019_v59 }
 0x652   :  { %v3660_v10 = vpop.f32.mrf.mxu1 }
 0x711   :  { %v3100_v53 = vpop.f32.mrf.mxu0 }
 0x712   :  { %3105 = vst.msk [vmem:[%s6204_s17] sm:$0xf] %vm3104_vm11, %v3100_v53  ;;  %v3409_v2 = vmul.f32 -1.442695, %v3100_v53 }
 0x713   :  { %v3677_v9 = vpop.f32.mrf.mxu0 }
 0x714   :  { %3914 = vpow2.f32 %v3409_v2 }
 0x721   :  { %v3915_v20 = vpop.eup %3914 }
 0x722   :  { %v3109_v28 = vadd.f32 1.0, %v3915_v20 }
 0x724   :  { %3916 = vrcp.f32 %v3109_v28 }
 0x731   :  { %v3917_v1 = vpop.eup %3916 }
 0x732   :  { %3112 = vst.msk [vmem:[%s6203_s16] sm:$0xf] %vm3104_vm11, %v3917_v1 }
 0x733   :  { %3121 = vsyncpa [#allocation3], 1 }
 0x734   :  { %3122 = vsyncpa [#allocation5], 1 }
 0x735   :  { %3123 = vsyncpa [#allocation8], 1 }
 0x736   :  { %3124 = vsyncpa [#allocation11], 1 }
 0x737   :  { %3125 = vsyncpa [#allocation14], 1 }

</bundles_post_ra>
